<compile_context>
chip_gen: v7x
topology: tpu7x:2x2x1
jax: 0.10.0
libtpu: 0.0.40
codegen_flags: <defaults>
</compile_context>

<pallas_src>
import functools

import numpy as np

import jax
import jax.numpy as jnp
from jax.experimental import pallas as pl
from jax.experimental.pallas import tpu as pltpu

BN_EPS = 1e-5
NEG_SLOPE = 0.03


# ---------------------------------------------------------------------------
# In-kernel helpers
# ---------------------------------------------------------------------------
def _bn_lrelu(y, gamma, beta):
    """Training-mode BatchNorm folded into one scale/shift, fused with LeakyReLU."""
    inv_m = 1.0 / y.shape[0]
    mean = jnp.sum(y, axis=0, keepdims=True) * inv_m
    mean_sq = jnp.sum(y * y, axis=0, keepdims=True) * inv_m
    var = mean_sq - mean * mean                      # biased, like PyTorch
    scale = gamma * jax.lax.rsqrt(var + BN_EPS)      # rsqrt -> EUP (free slot)
    shift = beta - mean * scale
    out = y * scale + shift
    return jnp.where(out >= 0, out, NEG_SLOPE * out)


def _encoder_kernel(*refs, z_len):
    """Entire ModalityEncoder forward in one Pallas kernel (all data in VMEM)."""
    o_ref = refs[-1]
    ins = refs[:-1]

    # --- block1: wrapper-side im2col -> one matmul + BN2d + LeakyReLU -------
    x_ref, w1_ref, b1_ref, g1_ref, be1_ref = ins[0:5]
    acc = jnp.dot(x_ref[...], w1_ref[...], preferred_element_type=jnp.float32)
    act = _bn_lrelu(acc + b1_ref[...], g1_ref[...], be1_ref[...]).astype(jnp.bfloat16)

    idx = 5
    # --- blocks 2..4: conv (9-tap gather-matmul form) + BN2d + LeakyReLU ----
    for _ in range(3):
        s_ref, w_ref, b_ref, g_ref, be_ref = ins[idx:idx + 5]
        idx += 5
        acc = None
        for t in range(9):
            # S_t is 0/1 so the f32->bf16 round trip of `patch` is exact.
            patch = jnp.dot(s_ref[t], act, preferred_element_type=jnp.float32)
            contrib = jnp.dot(patch.astype(jnp.bfloat16), w_ref[t],
                              preferred_element_type=jnp.float32)
            acc = contrib if acc is None else acc + contrib
        act = _bn_lrelu(acc + b_ref[...], g_ref[...], be_ref[...]).astype(jnp.bfloat16)

    # --- fc over the (C,H,W)-ordered flatten + BN1d + LeakyReLU -------------
    gfc_ref, wfc_ref, bfc_ref, gafc_ref, befc_ref = ins[idx:idx + 5]
    idx += 5
    accf = None
    for p in range(gfc_ref.shape[0]):                # spatial slots (1 here)
        rows = jnp.dot(gfc_ref[p], act, preferred_element_type=jnp.float32)
        contrib = jnp.dot(rows.astype(jnp.bfloat16), wfc_ref[p],
                          preferred_element_type=jnp.float32)
        accf = contrib if accf is None else accf + contrib
    hid = _bn_lrelu(accf + bfc_ref[...], gafc_ref[...], befc_ref[...])

    # --- fused mu/logvar heads + reparameterization (f32; Z is tiny) --------
    wh_ref, bh_ref, eps_ref = ins[idx:idx + 3]
    hw = jnp.dot(hid, wh_ref[...], preferred_element_type=jnp.float32) + bh_ref[...]
    mu = hw[:, 0:z_len]
    logvar = hw[:, z_len:2 * z_len]
    z = mu + eps_ref[...] * jnp.exp(0.5 * logvar)

    o_ref[:, 0:z_len] = z
    o_ref[:, z_len:2 * z_len] = mu
    o_ref[:, 2 * z_len:3 * z_len] = logvar


def _full_spec(shape):
    # whole array as a single block (block_shape == full dims satisfies TPU rules)
    return pl.BlockSpec(shape, lambda i: (0,) * len(shape))


# ---------------------------------------------------------------------------
# Host-side constant builders (shape-dependent 0/1 gather matrices)
# ---------------------------------------------------------------------------
def _build_conv_gather(n, h, w):
    """0/1 row-gather matrices (one per tap) for a 3x3/stride-2/pad-1 conv.

    Activation rows are ordered (n, h, w); columns are channels.  Rows that
    fall in the zero padding are simply all-zero (contribute nothing).
    """
    ho, wo = h // 2, w // 2
    s = np.zeros((9, n * ho * wo, n * h * w), np.float32)
    for di in range(3):
        for dj in range(3):
            t = di * 3 + dj
            for b in range(n):
                for oh in range(ho):
                    ih = 2 * oh + di - 1
                    if not 0 <= ih < h:
                        continue
                    for ow in range(wo):
                        iw = 2 * ow + dj - 1
                        if not 0 <= iw < w:
                            continue
                        s[t, (b * ho + oh) * wo + ow, (b * h + ih) * w + iw] = 1.0
    return s


def _build_fc_gather(n, p_spatial):
    """Row selectors turning the (C,H,W) flatten into a sum over spatial slots."""
    g = np.zeros((p_spatial, n, n * p_spatial), np.float32)
    for p in range(p_spatial):
        for b in range(n):
            g[p, b, b * p_spatial + p] = 1.0
    return g


def make_gathers(batch, target_size):
    # gathers are only needed for blocks 2..4 (block1 is im2col'd in wrapper)
    spatial = [target_size // (2 ** i) for i in range(1, 4)]   # inputs to blocks 2..4
    conv = [jnp.asarray(_build_conv_gather(batch, s, s), jnp.bfloat16) for s in spatial]
    p_spatial = (target_size // 16) ** 2
    fc = jnp.asarray(_build_fc_gather(batch, p_spatial), jnp.bfloat16)
    return {"conv": conv, "fc": fc}


# ---------------------------------------------------------------------------
# Parameter construction (deterministic, synthetic)
# ---------------------------------------------------------------------------
def init_params(key, in_channels, target_size, z_length):
    keys = iter(jax.random.split(key, 16))
    params = {}
    cin = in_channels
    for name, cout in zip(["block1", "block2", "block3", "block4"], [16, 32, 64, 128]):
        w = 0.05 * jax.random.normal(next(keys), (cout, cin, 3, 3), jnp.float32)
        b = 0.01 * jax.random.normal(next(keys), (cout,), jnp.float32)
        # PyTorch (Cout, Cin, kh, kw) -> per-tap (kh, kw, Cin, Cout), bf16 for MXU
        w_taps = jnp.transpose(w, (2, 3, 1, 0))
        if name == "block1":
            w_taps = w_taps.reshape(9 * cin, cout)       # matches im2col columns
        else:
            w_taps = w_taps.reshape(9, cin, cout)        # one slice per tap
        params[name] = dict(w=w_taps.astype(jnp.bfloat16),
                            b=b.reshape(1, cout),
                            gamma=jnp.ones((1, cout), jnp.float32),
                            beta=jnp.zeros((1, cout), jnp.float32))
        cin = cout

    p_spatial = (target_size // 16) ** 2
    fc_in = target_size ** 2 // 2                      # == 128 * p_spatial
    w_fc = 0.05 * jax.random.normal(next(keys), (fc_in, 32), jnp.float32)
    b_fc = 0.01 * jax.random.normal(next(keys), (32,), jnp.float32)
    # fold the (C,H,W) flatten order into the fc weight: (p_spatial, 128, 32)
    w_fc_stack = jnp.transpose(w_fc.reshape(128, p_spatial, 32), (1, 0, 2)).astype(jnp.bfloat16)
    params["fc"] = dict(w=w_fc_stack, b=b_fc.reshape(1, 32),
                        gamma=jnp.ones((1, 32), jnp.float32),
                        beta=jnp.zeros((1, 32), jnp.float32))

    w_mu = 0.05 * jax.random.normal(next(keys), (32, z_length), jnp.float32)
    b_mu = 0.01 * jax.random.normal(next(keys), (z_length,), jnp.float32)
    w_lv = 0.05 * jax.random.normal(next(keys), (32, z_length), jnp.float32)
    b_lv = 0.01 * jax.random.normal(next(keys), (z_length,), jnp.float32)
    params["heads"] = dict(w=jnp.concatenate([w_mu, w_lv], axis=1),          # (32, 2Z) f32
                           b=jnp.concatenate([b_mu, b_lv]).reshape(1, 2 * z_length))
    return params


# ---------------------------------------------------------------------------
# Full forward pass: one fused pallas_call
# ---------------------------------------------------------------------------
def modality_encoder_forward(x_nchw, params, gathers, eps):
    n, c, h, w = x_nchw.shape
    z_len = eps.shape[1]
    ho, wo = h // 2, w // 2

    # Wrapper-side layout plumbing on the tiny raw input only:
    # NCHW -> NHWC -> zero-pad -> 9-tap im2col rows=(n,oh,ow) x cols=(tap,cin).
    x_nhwc = jnp.transpose(x_nchw, (0, 2, 3, 1))
    xp = jnp.pad(x_nhwc, ((0, 0), (1, 1), (1, 1), (0, 0)))
    taps = [xp[:, di:di + h - 1:2, dj:dj + w - 1:2, :]
            for di in range(3) for dj in range(3)]
    patches = (jnp.concatenate(taps, axis=-1)
               .reshape(n * ho * wo, 9 * c)
               .astype(jnp.bfloat16))

    p1 = params["block1"]
    args = [patches, p1["w"], p1["b"], p1["gamma"], p1["beta"]]
    for i, name in enumerate(["block2", "block3", "block4"]):
        p = params[name]
        args += [gathers["conv"][i], p["w"], p["b"], p["gamma"], p["beta"]]
    pfc = params["fc"]
    args += [gathers["fc"], pfc["w"], pfc["b"], pfc["gamma"], pfc["beta"]]
    ph = params["heads"]
    args += [ph["w"], ph["b"], eps.astype(jnp.float32)]

    out = pl.pallas_call(
        functools.partial(_encoder_kernel, z_len=z_len),
        out_shape=jax.ShapeDtypeStruct((n, 3 * z_len), jnp.float32),
        grid=(1,),
        in_specs=[_full_spec(a.shape) for a in args],
        out_specs=_full_spec((n, 3 * z_len)),
        compiler_params=pltpu.CompilerParams(dimension_semantics=("arbitrary",)),
    )(*args)

    z = out[:, :z_len]
    mu = out[:, z_len:2 * z_len]
    logvar = out[:, 2 * z_len:]
    return z, mu, logvar


if __name__ == "__main__":
    # small, shape-consistent config: after 4 stride-2 convs target_size/16 = 1,
    # so the flatten size is 128*1*1 == target_size**2 // 2 == 128.
    batch, in_channels, target_size, z_length = 2, 4, 16, 8
    assert target_size % 16 == 0

    key = jax.random.PRNGKey(0)
    k_x, k_eps, k_params = jax.random.split(key, 3)
    x = jax.random.normal(k_x, (batch, in_channels, target_size, target_size), jnp.float32)
    # torch.randn_like(std) is supplied as an explicit deterministic eps input
    eps = jax.random.normal(k_eps, (batch, z_length), jnp.float32)
    params = init_params(k_params, in_channels, target_size, z_length)
    gathers = make_gathers(batch, target_size)

    fwd = jax.jit(modality_encoder_forward)
    z, mu, logvar = fwd(x, params, gathers, eps)
    jax.block_until_ready((z, mu, logvar))

    assert z.shape == (batch, z_length)
    assert mu.shape == (batch, z_length)
    assert logvar.shape == (batch, z_length)
    assert all(bool(jnp.all(jnp.isfinite(a))) for a in (z, mu, logvar))
    print("KERNEL_OK")
</pallas_src>

<mosaic_0001>
module attributes {stable_mosaic.version = 11 : i64} {
  func.func @_encoder_kernel(%arg0: i32, %arg1: memref<128x36xbf16, #tpu.memory_space<vmem>>, %arg2: memref<36x16xbf16, #tpu.memory_space<vmem>>, %arg3: memref<1x16xf32, #tpu.memory_space<vmem>>, %arg4: memref<1x16xf32, #tpu.memory_space<vmem>>, %arg5: memref<1x16xf32, #tpu.memory_space<vmem>>, %arg6: memref<9x32x128xbf16, #tpu.memory_space<vmem>>, %arg7: memref<9x16x32xbf16, #tpu.memory_space<vmem>>, %arg8: memref<1x32xf32, #tpu.memory_space<vmem>>, %arg9: memref<1x32xf32, #tpu.memory_space<vmem>>, %arg10: memref<1x32xf32, #tpu.memory_space<vmem>>, %arg11: memref<9x8x32xbf16, #tpu.memory_space<vmem>>, %arg12: memref<9x32x64xbf16, #tpu.memory_space<vmem>>, %arg13: memref<1x64xf32, #tpu.memory_space<vmem>>, %arg14: memref<1x64xf32, #tpu.memory_space<vmem>>, %arg15: memref<1x64xf32, #tpu.memory_space<vmem>>, %arg16: memref<9x2x8xbf16, #tpu.memory_space<vmem>>, %arg17: memref<9x64x128xbf16, #tpu.memory_space<vmem>>, %arg18: memref<1x128xf32, #tpu.memory_space<vmem>>, %arg19: memref<1x128xf32, #tpu.memory_space<vmem>>, %arg20: memref<1x128xf32, #tpu.memory_space<vmem>>, %arg21: memref<1x2x2xbf16, #tpu.memory_space<vmem>>, %arg22: memref<1x128x32xbf16, #tpu.memory_space<vmem>>, %arg23: memref<1x32xf32, #tpu.memory_space<vmem>>, %arg24: memref<1x32xf32, #tpu.memory_space<vmem>>, %arg25: memref<1x32xf32, #tpu.memory_space<vmem>>, %arg26: memref<32x16xf32, #tpu.memory_space<vmem>>, %arg27: memref<1x16xf32, #tpu.memory_space<vmem>>, %arg28: memref<2x8xf32, #tpu.memory_space<vmem>>, %arg29: memref<2x24xf32, #tpu.memory_space<vmem>>) attributes {dimension_semantics = [#tpu.dimension_semantics<arbitrary>], iteration_bounds = array<i64: 1>, scalar_prefetch = 0 : i64, scratch_operands = 0 : i64, tpu.core_type = #tpu.core_type<tc>, window_params = [{pipeline_mode = #tpu.pipeline_mode<synchronous>, transform_indices = @transform_0, window_bounds = array<i64: 128, 36>}, {pipeline_mode = #tpu.pipeline_mode<synchronous>, transform_indices = @transform_1, window_bounds = array<i64: 36, 16>}, {pipeline_mode = #tpu.pipeline_mode<synchronous>, transform_indices = @transform_2, window_bounds = array<i64: 1, 16>}, {pipeline_mode = #tpu.pipeline_mode<synchronous>, transform_indices = @transform_3, window_bounds = array<i64: 1, 16>}, {pipeline_mode = #tpu.pipeline_mode<synchronous>, transform_indices = @transform_4, window_bounds = array<i64: 1, 16>}, {pipeline_mode = #tpu.pipeline_mode<synchronous>, transform_indices = @transform_5, window_bounds = array<i64: 9, 32, 128>}, {pipeline_mode = #tpu.pipeline_mode<synchronous>, transform_indices = @transform_6, window_bounds = array<i64: 9, 16, 32>}, {pipeline_mode = #tpu.pipeline_mode<synchronous>, transform_indices = @transform_7, window_bounds = array<i64: 1, 32>}, {pipeline_mode = #tpu.pipeline_mode<synchronous>, transform_indices = @transform_8, window_bounds = array<i64: 1, 32>}, {pipeline_mode = #tpu.pipeline_mode<synchronous>, transform_indices = @transform_9, window_bounds = array<i64: 1, 32>}, {pipeline_mode = #tpu.pipeline_mode<synchronous>, transform_indices = @transform_10, window_bounds = array<i64: 9, 8, 32>}, {pipeline_mode = #tpu.pipeline_mode<synchronous>, transform_indices = @transform_11, window_bounds = array<i64: 9, 32, 64>}, {pipeline_mode = #tpu.pipeline_mode<synchronous>, transform_indices = @transform_12, window_bounds = array<i64: 1, 64>}, {pipeline_mode = #tpu.pipeline_mode<synchronous>, transform_indices = @transform_13, window_bounds = array<i64: 1, 64>}, {pipeline_mode = #tpu.pipeline_mode<synchronous>, transform_indices = @transform_14, window_bounds = array<i64: 1, 64>}, {pipeline_mode = #tpu.pipeline_mode<synchronous>, transform_indices = @transform_15, window_bounds = array<i64: 9, 2, 8>}, {pipeline_mode = #tpu.pipeline_mode<synchronous>, transform_indices = @transform_16, window_bounds = array<i64: 9, 64, 128>}, {pipeline_mode = #tpu.pipeline_mode<synchronous>, transform_indices = @transform_17, window_bounds = array<i64: 1, 128>}, {pipeline_mode = #tpu.pipeline_mode<synchronous>, transform_indices = @transform_18, window_bounds = array<i64: 1, 128>}, {pipeline_mode = #tpu.pipeline_mode<synchronous>, transform_indices = @transform_19, window_bounds = array<i64: 1, 128>}, {pipeline_mode = #tpu.pipeline_mode<synchronous>, transform_indices = @transform_20, window_bounds = array<i64: 1, 2, 2>}, {pipeline_mode = #tpu.pipeline_mode<synchronous>, transform_indices = @transform_21, window_bounds = array<i64: 1, 128, 32>}, {pipeline_mode = #tpu.pipeline_mode<synchronous>, transform_indices = @transform_22, window_bounds = array<i64: 1, 32>}, {pipeline_mode = #tpu.pipeline_mode<synchronous>, transform_indices = @transform_23, window_bounds = array<i64: 1, 32>}, {pipeline_mode = #tpu.pipeline_mode<synchronous>, transform_indices = @transform_24, window_bounds = array<i64: 1, 32>}, {pipeline_mode = #tpu.pipeline_mode<synchronous>, transform_indices = @transform_25, window_bounds = array<i64: 32, 16>}, {pipeline_mode = #tpu.pipeline_mode<synchronous>, transform_indices = @transform_26, window_bounds = array<i64: 1, 16>}, {pipeline_mode = #tpu.pipeline_mode<synchronous>, transform_indices = @transform_27, window_bounds = array<i64: 2, 8>}, {pipeline_mode = #tpu.pipeline_mode<synchronous>, transform_indices = @transform_28, window_bounds = array<i64: 2, 24>}]} {
    %c0 = arith.constant 0 : index
    %c0_0 = arith.constant 0 : index
    %0 = vector.load %arg1[%c0, %c0_0] : memref<128x36xbf16, #tpu.memory_space<vmem>>, vector<128x36xbf16>
    %c0_1 = arith.constant 0 : index
    %c0_2 = arith.constant 0 : index
    %1 = vector.load %arg2[%c0_1, %c0_2] : memref<36x16xbf16, #tpu.memory_space<vmem>>, vector<36x16xbf16>
    %cst = arith.constant dense<0.000000e+00> : vector<128x16xf32>
    %2 = tpu.matmul %0, %1, %cst {dimension_numbers = #tpu.dot_dimension_numbers<[1], [0], [0], [1], [0, 0, 1, 1], [], []>} : vector<128x36xbf16>, vector<36x16xbf16>, vector<128x16xf32> -> vector<128x16xf32>
    %c0_3 = arith.constant 0 : index
    %c0_4 = arith.constant 0 : index
    %3 = vector.load %arg3[%c0_3, %c0_4] : memref<1x16xf32, #tpu.memory_space<vmem>>, vector<1x16xf32>
    %4 = vector.broadcast %3 : vector<1x16xf32> to vector<128x16xf32>
    %5 = arith.addf %2, %4 : vector<128x16xf32>
    %c0_5 = arith.constant 0 : index
    %c0_6 = arith.constant 0 : index
    %6 = vector.load %arg4[%c0_5, %c0_6] : memref<1x16xf32, #tpu.memory_space<vmem>>, vector<1x16xf32>
    %c0_7 = arith.constant 0 : index
    %c0_8 = arith.constant 0 : index
    %7 = vector.load %arg5[%c0_7, %c0_8] : memref<1x16xf32, #tpu.memory_space<vmem>>, vector<1x16xf32>
    %cst_9 = arith.constant dense<0.000000e+00> : vector<16xf32>
    %8 = vector.multi_reduction <add>, %5, %cst_9 [0] : vector<128x16xf32> to vector<16xf32>
    %9 = vector.shape_cast %8 : vector<16xf32> to vector<1x16xf32>
    %cst_10 = arith.constant 7.812500e-03 : f32
    %10 = vector.broadcast %cst_10 : f32 to vector<1x16xf32>
    %11 = arith.mulf %9, %10 : vector<1x16xf32>
    %12 = arith.mulf %5, %5 : vector<128x16xf32>
    %cst_11 = arith.constant dense<0.000000e+00> : vector<16xf32>
    %13 = vector.multi_reduction <add>, %12, %cst_11 [0] : vector<128x16xf32> to vector<16xf32>
    %14 = vector.shape_cast %13 : vector<16xf32> to vector<1x16xf32>
    %cst_12 = arith.constant 7.812500e-03 : f32
    %15 = vector.broadcast %cst_12 : f32 to vector<1x16xf32>
    %16 = arith.mulf %14, %15 : vector<1x16xf32>
    %17 = arith.mulf %11, %11 : vector<1x16xf32>
    %18 = arith.subf %16, %17 : vector<1x16xf32>
    %cst_13 = arith.constant 9.99999974E-6 : f32
    %19 = vector.broadcast %cst_13 : f32 to vector<1x16xf32>
    %20 = arith.addf %18, %19 : vector<1x16xf32>
    %21 = math.rsqrt %20 : vector<1x16xf32>
    %22 = arith.mulf %6, %21 : vector<1x16xf32>
    %23 = arith.mulf %11, %22 : vector<1x16xf32>
    %24 = arith.subf %7, %23 : vector<1x16xf32>
    %25 = vector.broadcast %22 : vector<1x16xf32> to vector<128x16xf32>
    %26 = arith.mulf %5, %25 : vector<128x16xf32>
    %27 = vector.broadcast %24 : vector<1x16xf32> to vector<128x16xf32>
    %28 = arith.addf %26, %27 : vector<128x16xf32>
    %cst_14 = arith.constant 0.000000e+00 : f32
    %29 = vector.broadcast %cst_14 : f32 to vector<128x16xf32>
    %30 = arith.cmpf oge, %28, %29 : vector<128x16xf32>
    %cst_15 = arith.constant 3.000000e-02 : f32
    %31 = vector.broadcast %cst_15 : f32 to vector<128x16xf32>
    %32 = arith.mulf %31, %28 : vector<128x16xf32>
    %33 = arith.select %30, %28, %32 : vector<128x16xi1>, vector<128x16xf32>
    %34 = arith.truncf %33 : vector<128x16xf32> to vector<128x16xbf16>
    %c0_16 = arith.constant 0 : index
    %c0_17 = arith.constant 0 : index
    %c0_18 = arith.constant 0 : index
    %35 = vector.load %arg6[%c0_16, %c0_17, %c0_18] : memref<9x32x128xbf16, #tpu.memory_space<vmem>>, vector<1x32x128xbf16>
    %36 = vector.shape_cast %35 : vector<1x32x128xbf16> to vector<32x128xbf16>
    %cst_19 = arith.constant dense<0.000000e+00> : vector<32x16xf32>
    %37 = tpu.matmul %36, %34, %cst_19 {dimension_numbers = #tpu.dot_dimension_numbers<[1], [0], [0], [1], [0, 0, 1, 1], [], []>} : vector<32x128xbf16>, vector<128x16xbf16>, vector<32x16xf32> -> vector<32x16xf32>
    %38 = arith.truncf %37 : vector<32x16xf32> to vector<32x16xbf16>
    %c0_20 = arith.constant 0 : index
    %c0_21 = arith.constant 0 : index
    %c0_22 = arith.constant 0 : index
    %39 = vector.load %arg7[%c0_20, %c0_21, %c0_22] : memref<9x16x32xbf16, #tpu.memory_space<vmem>>, vector<1x16x32xbf16>
    %40 = vector.shape_cast %39 : vector<1x16x32xbf16> to vector<16x32xbf16>
    %cst_23 = arith.constant dense<0.000000e+00> : vector<32x32xf32>
    %41 = tpu.matmul %38, %40, %cst_23 {dimension_numbers = #tpu.dot_dimension_numbers<[1], [0], [0], [1], [0, 0, 1, 1], [], []>} : vector<32x16xbf16>, vector<16x32xbf16>, vector<32x32xf32> -> vector<32x32xf32>
    %c1 = arith.constant 1 : index
    %c0_24 = arith.constant 0 : index
    %c0_25 = arith.constant 0 : index
    %42 = vector.load %arg6[%c1, %c0_24, %c0_25] : memref<9x32x128xbf16, #tpu.memory_space<vmem>>, vector<1x32x128xbf16>
    %43 = vector.shape_cast %42 : vector<1x32x128xbf16> to vector<32x128xbf16>
    %cst_26 = arith.constant dense<0.000000e+00> : vector<32x16xf32>
    %44 = tpu.matmul %43, %34, %cst_26 {dimension_numbers = #tpu.dot_dimension_numbers<[1], [0], [0], [1], [0, 0, 1, 1], [], []>} : vector<32x128xbf16>, vector<128x16xbf16>, vector<32x16xf32> -> vector<32x16xf32>
    %45 = arith.truncf %44 : vector<32x16xf32> to vector<32x16xbf16>
    %c1_27 = arith.constant 1 : index
    %c0_28 = arith.constant 0 : index
    %c0_29 = arith.constant 0 : index
    %46 = vector.load %arg7[%c1_27, %c0_28, %c0_29] : memref<9x16x32xbf16, #tpu.memory_space<vmem>>, vector<1x16x32xbf16>
    %47 = vector.shape_cast %46 : vector<1x16x32xbf16> to vector<16x32xbf16>
    %cst_30 = arith.constant dense<0.000000e+00> : vector<32x32xf32>
    %48 = tpu.matmul %45, %47, %cst_30 {dimension_numbers = #tpu.dot_dimension_numbers<[1], [0], [0], [1], [0, 0, 1, 1], [], []>} : vector<32x16xbf16>, vector<16x32xbf16>, vector<32x32xf32> -> vector<32x32xf32>
    %49 = arith.addf %41, %48 : vector<32x32xf32>
    %c2 = arith.constant 2 : index
    %c0_31 = arith.constant 0 : index
    %c0_32 = arith.constant 0 : index
    %50 = vector.load %arg6[%c2, %c0_31, %c0_32] : memref<9x32x128xbf16, #tpu.memory_space<vmem>>, vector<1x32x128xbf16>
    %51 = vector.shape_cast %50 : vector<1x32x128xbf16> to vector<32x128xbf16>
    %cst_33 = arith.constant dense<0.000000e+00> : vector<32x16xf32>
    %52 = tpu.matmul %51, %34, %cst_33 {dimension_numbers = #tpu.dot_dimension_numbers<[1], [0], [0], [1], [0, 0, 1, 1], [], []>} : vector<32x128xbf16>, vector<128x16xbf16>, vector<32x16xf32> -> vector<32x16xf32>
    %53 = arith.truncf %52 : vector<32x16xf32> to vector<32x16xbf16>
    %c2_34 = arith.constant 2 : index
    %c0_35 = arith.constant 0 : index
    %c0_36 = arith.constant 0 : index
    %54 = vector.load %arg7[%c2_34, %c0_35, %c0_36] : memref<9x16x32xbf16, #tpu.memory_space<vmem>>, vector<1x16x32xbf16>
    %55 = vector.shape_cast %54 : vector<1x16x32xbf16> to vector<16x32xbf16>
    %cst_37 = arith.constant dense<0.000000e+00> : vector<32x32xf32>
    %56 = tpu.matmul %53, %55, %cst_37 {dimension_numbers = #tpu.dot_dimension_numbers<[1], [0], [0], [1], [0, 0, 1, 1], [], []>} : vector<32x16xbf16>, vector<16x32xbf16>, vector<32x32xf32> -> vector<32x32xf32>
    %57 = arith.addf %49, %56 : vector<32x32xf32>
    %c3 = arith.constant 3 : index
    %c0_38 = arith.constant 0 : index
    %c0_39 = arith.constant 0 : index
    %58 = vector.load %arg6[%c3, %c0_38, %c0_39] : memref<9x32x128xbf16, #tpu.memory_space<vmem>>, vector<1x32x128xbf16>
    %59 = vector.shape_cast %58 : vector<1x32x128xbf16> to vector<32x128xbf16>
    %cst_40 = arith.constant dense<0.000000e+00> : vector<32x16xf32>
    %60 = tpu.matmul %59, %34, %cst_40 {dimension_numbers = #tpu.dot_dimension_numbers<[1], [0], [0], [1], [0, 0, 1, 1], [], []>} : vector<32x128xbf16>, vector<128x16xbf16>, vector<32x16xf32> -> vector<32x16xf32>
    %61 = arith.truncf %60 : vector<32x16xf32> to vector<32x16xbf16>
    %c3_41 = arith.constant 3 : index
    %c0_42 = arith.constant 0 : index
    %c0_43 = arith.constant 0 : index
    %62 = vector.load %arg7[%c3_41, %c0_42, %c0_43] : memref<9x16x32xbf16, #tpu.memory_space<vmem>>, vector<1x16x32xbf16>
    %63 = vector.shape_cast %62 : vector<1x16x32xbf16> to vector<16x32xbf16>
    %cst_44 = arith.constant dense<0.000000e+00> : vector<32x32xf32>
    %64 = tpu.matmul %61, %63, %cst_44 {dimension_numbers = #tpu.dot_dimension_numbers<[1], [0], [0], [1], [0, 0, 1, 1], [], []>} : vector<32x16xbf16>, vector<16x32xbf16>, vector<32x32xf32> -> vector<32x32xf32>
    %65 = arith.addf %57, %64 : vector<32x32xf32>
    %c4 = arith.constant 4 : index
    %c0_45 = arith.constant 0 : index
    %c0_46 = arith.constant 0 : index
    %66 = vector.load %arg6[%c4, %c0_45, %c0_46] : memref<9x32x128xbf16, #tpu.memory_space<vmem>>, vector<1x32x128xbf16>
    %67 = vector.shape_cast %66 : vector<1x32x128xbf16> to vector<32x128xbf16>
    %cst_47 = arith.constant dense<0.000000e+00> : vector<32x16xf32>
    %68 = tpu.matmul %67, %34, %cst_47 {dimension_numbers = #tpu.dot_dimension_numbers<[1], [0], [0], [1], [0, 0, 1, 1], [], []>} : vector<32x128xbf16>, vector<128x16xbf16>, vector<32x16xf32> -> vector<32x16xf32>
    %69 = arith.truncf %68 : vector<32x16xf32> to vector<32x16xbf16>
    %c4_48 = arith.constant 4 : index
    %c0_49 = arith.constant 0 : index
    %c0_50 = arith.constant 0 : index
    %70 = vector.load %arg7[%c4_48, %c0_49, %c0_50] : memref<9x16x32xbf16, #tpu.memory_space<vmem>>, vector<1x16x32xbf16>
    %71 = vector.shape_cast %70 : vector<1x16x32xbf16> to vector<16x32xbf16>
    %cst_51 = arith.constant dense<0.000000e+00> : vector<32x32xf32>
    %72 = tpu.matmul %69, %71, %cst_51 {dimension_numbers = #tpu.dot_dimension_numbers<[1], [0], [0], [1], [0, 0, 1, 1], [], []>} : vector<32x16xbf16>, vector<16x32xbf16>, vector<32x32xf32> -> vector<32x32xf32>
    %73 = arith.addf %65, %72 : vector<32x32xf32>
    %c5 = arith.constant 5 : index
    %c0_52 = arith.constant 0 : index
    %c0_53 = arith.constant 0 : index
    %74 = vector.load %arg6[%c5, %c0_52, %c0_53] : memref<9x32x128xbf16, #tpu.memory_space<vmem>>, vector<1x32x128xbf16>
    %75 = vector.shape_cast %74 : vector<1x32x128xbf16> to vector<32x128xbf16>
    %cst_54 = arith.constant dense<0.000000e+00> : vector<32x16xf32>
    %76 = tpu.matmul %75, %34, %cst_54 {dimension_numbers = #tpu.dot_dimension_numbers<[1], [0], [0], [1], [0, 0, 1, 1], [], []>} : vector<32x128xbf16>, vector<128x16xbf16>, vector<32x16xf32> -> vector<32x16xf32>
    %77 = arith.truncf %76 : vector<32x16xf32> to vector<32x16xbf16>
    %c5_55 = arith.constant 5 : index
    %c0_56 = arith.constant 0 : index
    %c0_57 = arith.constant 0 : index
    %78 = vector.load %arg7[%c5_55, %c0_56, %c0_57] : memref<9x16x32xbf16, #tpu.memory_space<vmem>>, vector<1x16x32xbf16>
    %79 = vector.shape_cast %78 : vector<1x16x32xbf16> to vector<16x32xbf16>
    %cst_58 = arith.constant dense<0.000000e+00> : vector<32x32xf32>
    %80 = tpu.matmul %77, %79, %cst_58 {dimension_numbers = #tpu.dot_dimension_numbers<[1], [0], [0], [1], [0, 0, 1, 1], [], []>} : vector<32x16xbf16>, vector<16x32xbf16>, vector<32x32xf32> -> vector<32x32xf32>
    %81 = arith.addf %73, %80 : vector<32x32xf32>
    %c6 = arith.constant 6 : index
    %c0_59 = arith.constant 0 : index
    %c0_60 = arith.constant 0 : index
    %82 = vector.load %arg6[%c6, %c0_59, %c0_60] : memref<9x32x128xbf16, #tpu.memory_space<vmem>>, vector<1x32x128xbf16>
    %83 = vector.shape_cast %82 : vector<1x32x128xbf16> to vector<32x128xbf16>
    %cst_61 = arith.constant dense<0.000000e+00> : vector<32x16xf32>
    %84 = tpu.matmul %83, %34, %cst_61 {dimension_numbers = #tpu.dot_dimension_numbers<[1], [0], [0], [1], [0, 0, 1, 1], [], []>} : vector<32x128xbf16>, vector<128x16xbf16>, vector<32x16xf32> -> vector<32x16xf32>
    %85 = arith.truncf %84 : vector<32x16xf32> to vector<32x16xbf16>
    %c6_62 = arith.constant 6 : index
    %c0_63 = arith.constant 0 : index
    %c0_64 = arith.constant 0 : index
    %86 = vector.load %arg7[%c6_62, %c0_63, %c0_64] : memref<9x16x32xbf16, #tpu.memory_space<vmem>>, vector<1x16x32xbf16>
    %87 = vector.shape_cast %86 : vector<1x16x32xbf16> to vector<16x32xbf16>
    %cst_65 = arith.constant dense<0.000000e+00> : vector<32x32xf32>
    %88 = tpu.matmul %85, %87, %cst_65 {dimension_numbers = #tpu.dot_dimension_numbers<[1], [0], [0], [1], [0, 0, 1, 1], [], []>} : vector<32x16xbf16>, vector<16x32xbf16>, vector<32x32xf32> -> vector<32x32xf32>
    %89 = arith.addf %81, %88 : vector<32x32xf32>
    %c7 = arith.constant 7 : index
    %c0_66 = arith.constant 0 : index
    %c0_67 = arith.constant 0 : index
    %90 = vector.load %arg6[%c7, %c0_66, %c0_67] : memref<9x32x128xbf16, #tpu.memory_space<vmem>>, vector<1x32x128xbf16>
    %91 = vector.shape_cast %90 : vector<1x32x128xbf16> to vector<32x128xbf16>
    %cst_68 = arith.constant dense<0.000000e+00> : vector<32x16xf32>
    %92 = tpu.matmul %91, %34, %cst_68 {dimension_numbers = #tpu.dot_dimension_numbers<[1], [0], [0], [1], [0, 0, 1, 1], [], []>} : vector<32x128xbf16>, vector<128x16xbf16>, vector<32x16xf32> -> vector<32x16xf32>
    %93 = arith.truncf %92 : vector<32x16xf32> to vector<32x16xbf16>
    %c7_69 = arith.constant 7 : index
    %c0_70 = arith.constant 0 : index
    %c0_71 = arith.constant 0 : index
    %94 = vector.load %arg7[%c7_69, %c0_70, %c0_71] : memref<9x16x32xbf16, #tpu.memory_space<vmem>>, vector<1x16x32xbf16>
    %95 = vector.shape_cast %94 : vector<1x16x32xbf16> to vector<16x32xbf16>
    %cst_72 = arith.constant dense<0.000000e+00> : vector<32x32xf32>
    %96 = tpu.matmul %93, %95, %cst_72 {dimension_numbers = #tpu.dot_dimension_numbers<[1], [0], [0], [1], [0, 0, 1, 1], [], []>} : vector<32x16xbf16>, vector<16x32xbf16>, vector<32x32xf32> -> vector<32x32xf32>
    %97 = arith.addf %89, %96 : vector<32x32xf32>
    %c8 = arith.constant 8 : index
    %c0_73 = arith.constant 0 : index
    %c0_74 = arith.constant 0 : index
    %98 = vector.load %arg6[%c8, %c0_73, %c0_74] : memref<9x32x128xbf16, #tpu.memory_space<vmem>>, vector<1x32x128xbf16>
    %99 = vector.shape_cast %98 : vector<1x32x128xbf16> to vector<32x128xbf16>
    %cst_75 = arith.constant dense<0.000000e+00> : vector<32x16xf32>
    %100 = tpu.matmul %99, %34, %cst_75 {dimension_numbers = #tpu.dot_dimension_numbers<[1], [0], [0], [1], [0, 0, 1, 1], [], []>} : vector<32x128xbf16>, vector<128x16xbf16>, vector<32x16xf32> -> vector<32x16xf32>
    %101 = arith.truncf %100 : vector<32x16xf32> to vector<32x16xbf16>
    %c8_76 = arith.constant 8 : index
    %c0_77 = arith.constant 0 : index
    %c0_78 = arith.constant 0 : index
    %102 = vector.load %arg7[%c8_76, %c0_77, %c0_78] : memref<9x16x32xbf16, #tpu.memory_space<vmem>>, vector<1x16x32xbf16>
    %103 = vector.shape_cast %102 : vector<1x16x32xbf16> to vector<16x32xbf16>
    %cst_79 = arith.constant dense<0.000000e+00> : vector<32x32xf32>
    %104 = tpu.matmul %101, %103, %cst_79 {dimension_numbers = #tpu.dot_dimension_numbers<[1], [0], [0], [1], [0, 0, 1, 1], [], []>} : vector<32x16xbf16>, vector<16x32xbf16>, vector<32x32xf32> -> vector<32x32xf32>
    %105 = arith.addf %97, %104 : vector<32x32xf32>
    %c0_80 = arith.constant 0 : index
    %c0_81 = arith.constant 0 : index
    %106 = vector.load %arg8[%c0_80, %c0_81] : memref<1x32xf32, #tpu.memory_space<vmem>>, vector<1x32xf32>
    %107 = vector.broadcast %106 : vector<1x32xf32> to vector<32x32xf32>
    %108 = arith.addf %105, %107 : vector<32x32xf32>
    %c0_82 = arith.constant 0 : index
    %c0_83 = arith.constant 0 : index
    %109 = vector.load %arg9[%c0_82, %c0_83] : memref<1x32xf32, #tpu.memory_space<vmem>>, vector<1x32xf32>
    %c0_84 = arith.constant 0 : index
    %c0_85 = arith.constant 0 : index
    %110 = vector.load %arg10[%c0_84, %c0_85] : memref<1x32xf32, #tpu.memory_space<vmem>>, vector<1x32xf32>
    %cst_86 = arith.constant dense<0.000000e+00> : vector<32xf32>
    %111 = vector.multi_reduction <add>, %108, %cst_86 [0] : vector<32x32xf32> to vector<32xf32>
    %112 = vector.shape_cast %111 : vector<32xf32> to vector<1x32xf32>
    %cst_87 = arith.constant 3.125000e-02 : f32
    %113 = vector.broadcast %cst_87 : f32 to vector<1x32xf32>
    %114 = arith.mulf %112, %113 : vector<1x32xf32>
    %115 = arith.mulf %108, %108 : vector<32x32xf32>
    %cst_88 = arith.constant dense<0.000000e+00> : vector<32xf32>
    %116 = vector.multi_reduction <add>, %115, %cst_88 [0] : vector<32x32xf32> to vector<32xf32>
    %117 = vector.shape_cast %116 : vector<32xf32> to vector<1x32xf32>
    %cst_89 = arith.constant 3.125000e-02 : f32
    %118 = vector.broadcast %cst_89 : f32 to vector<1x32xf32>
    %119 = arith.mulf %117, %118 : vector<1x32xf32>
    %120 = arith.mulf %114, %114 : vector<1x32xf32>
    %121 = arith.subf %119, %120 : vector<1x32xf32>
    %cst_90 = arith.constant 9.99999974E-6 : f32
    %122 = vector.broadcast %cst_90 : f32 to vector<1x32xf32>
    %123 = arith.addf %121, %122 : vector<1x32xf32>
    %124 = math.rsqrt %123 : vector<1x32xf32>
    %125 = arith.mulf %109, %124 : vector<1x32xf32>
    %126 = arith.mulf %114, %125 : vector<1x32xf32>
    %127 = arith.subf %110, %126 : vector<1x32xf32>
    %128 = vector.broadcast %125 : vector<1x32xf32> to vector<32x32xf32>
    %129 = arith.mulf %108, %128 : vector<32x32xf32>
    %130 = vector.broadcast %127 : vector<1x32xf32> to vector<32x32xf32>
    %131 = arith.addf %129, %130 : vector<32x32xf32>
    %cst_91 = arith.constant 0.000000e+00 : f32
    %132 = vector.broadcast %cst_91 : f32 to vector<32x32xf32>
    %133 = arith.cmpf oge, %131, %132 : vector<32x32xf32>
    %cst_92 = arith.constant 3.000000e-02 : f32
    %134 = vector.broadcast %cst_92 : f32 to vector<32x32xf32>
    %135 = arith.mulf %134, %131 : vector<32x32xf32>
    %136 = arith.select %133, %131, %135 : vector<32x32xi1>, vector<32x32xf32>
    %137 = arith.truncf %136 : vector<32x32xf32> to vector<32x32xbf16>
    %c0_93 = arith.constant 0 : index
    %c0_94 = arith.constant 0 : index
    %c0_95 = arith.constant 0 : index
    %138 = vector.load %arg11[%c0_93, %c0_94, %c0_95] : memref<9x8x32xbf16, #tpu.memory_space<vmem>>, vector<1x8x32xbf16>
    %139 = vector.shape_cast %138 : vector<1x8x32xbf16> to vector<8x32xbf16>
    %cst_96 = arith.constant dense<0.000000e+00> : vector<8x32xf32>
    %140 = tpu.matmul %139, %137, %cst_96 {dimension_numbers = #tpu.dot_dimension_numbers<[1], [0], [0], [1], [0, 0, 1, 1], [], []>} : vector<8x32xbf16>, vector<32x32xbf16>, vector<8x32xf32> -> vector<8x32xf32>
    %141 = arith.truncf %140 : vector<8x32xf32> to vector<8x32xbf16>
    %c0_97 = arith.constant 0 : index
    %c0_98 = arith.constant 0 : index
    %c0_99 = arith.constant 0 : index
    %142 = vector.load %arg12[%c0_97, %c0_98, %c0_99] : memref<9x32x64xbf16, #tpu.memory_space<vmem>>, vector<1x32x64xbf16>
    %143 = vector.shape_cast %142 : vector<1x32x64xbf16> to vector<32x64xbf16>
    %cst_100 = arith.constant dense<0.000000e+00> : vector<8x64xf32>
    %144 = tpu.matmul %141, %143, %cst_100 {dimension_numbers = #tpu.dot_dimension_numbers<[1], [0], [0], [1], [0, 0, 1, 1], [], []>} : vector<8x32xbf16>, vector<32x64xbf16>, vector<8x64xf32> -> vector<8x64xf32>
    %c1_101 = arith.constant 1 : index
    %c0_102 = arith.constant 0 : index
    %c0_103 = arith.constant 0 : index
    %145 = vector.load %arg11[%c1_101, %c0_102, %c0_103] : memref<9x8x32xbf16, #tpu.memory_space<vmem>>, vector<1x8x32xbf16>
    %146 = vector.shape_cast %145 : vector<1x8x32xbf16> to vector<8x32xbf16>
    %cst_104 = arith.constant dense<0.000000e+00> : vector<8x32xf32>
    %147 = tpu.matmul %146, %137, %cst_104 {dimension_numbers = #tpu.dot_dimension_numbers<[1], [0], [0], [1], [0, 0, 1, 1], [], []>} : vector<8x32xbf16>, vector<32x32xbf16>, vector<8x32xf32> -> vector<8x32xf32>
    %148 = arith.truncf %147 : vector<8x32xf32> to vector<8x32xbf16>
    %c1_105 = arith.constant 1 : index
    %c0_106 = arith.constant 0 : index
    %c0_107 = arith.constant 0 : index
    %149 = vector.load %arg12[%c1_105, %c0_106, %c0_107] : memref<9x32x64xbf16, #tpu.memory_space<vmem>>, vector<1x32x64xbf16>
    %150 = vector.shape_cast %149 : vector<1x32x64xbf16> to vector<32x64xbf16>
    %cst_108 = arith.constant dense<0.000000e+00> : vector<8x64xf32>
    %151 = tpu.matmul %148, %150, %cst_108 {dimension_numbers = #tpu.dot_dimension_numbers<[1], [0], [0], [1], [0, 0, 1, 1], [], []>} : vector<8x32xbf16>, vector<32x64xbf16>, vector<8x64xf32> -> vector<8x64xf32>
    %152 = arith.addf %144, %151 : vector<8x64xf32>
    %c2_109 = arith.constant 2 : index
    %c0_110 = arith.constant 0 : index
    %c0_111 = arith.constant 0 : index
    %153 = vector.load %arg11[%c2_109, %c0_110, %c0_111] : memref<9x8x32xbf16, #tpu.memory_space<vmem>>, vector<1x8x32xbf16>
    %154 = vector.shape_cast %153 : vector<1x8x32xbf16> to vector<8x32xbf16>
    %cst_112 = arith.constant dense<0.000000e+00> : vector<8x32xf32>
    %155 = tpu.matmul %154, %137, %cst_112 {dimension_numbers = #tpu.dot_dimension_numbers<[1], [0], [0], [1], [0, 0, 1, 1], [], []>} : vector<8x32xbf16>, vector<32x32xbf16>, vector<8x32xf32> -> vector<8x32xf32>
    %156 = arith.truncf %155 : vector<8x32xf32> to vector<8x32xbf16>
    %c2_113 = arith.constant 2 : index
    %c0_114 = arith.constant 0 : index
    %c0_115 = arith.constant 0 : index
    %157 = vector.load %arg12[%c2_113, %c0_114, %c0_115] : memref<9x32x64xbf16, #tpu.memory_space<vmem>>, vector<1x32x64xbf16>
    %158 = vector.shape_cast %157 : vector<1x32x64xbf16> to vector<32x64xbf16>
    %cst_116 = arith.constant dense<0.000000e+00> : vector<8x64xf32>
    %159 = tpu.matmul %156, %158, %cst_116 {dimension_numbers = #tpu.dot_dimension_numbers<[1], [0], [0], [1], [0, 0, 1, 1], [], []>} : vector<8x32xbf16>, vector<32x64xbf16>, vector<8x64xf32> -> vector<8x64xf32>
    %160 = arith.addf %152, %159 : vector<8x64xf32>
    %c3_117 = arith.constant 3 : index
    %c0_118 = arith.constant 0 : index
    %c0_119 = arith.constant 0 : index
    %161 = vector.load %arg11[%c3_117, %c0_118, %c0_119] : memref<9x8x32xbf16, #tpu.memory_space<vmem>>, vector<1x8x32xbf16>
    %162 = vector.shape_cast %161 : vector<1x8x32xbf16> to vector<8x32xbf16>
    %cst_120 = arith.constant dense<0.000000e+00> : vector<8x32xf32>
    %163 = tpu.matmul %162, %137, %cst_120 {dimension_numbers = #tpu.dot_dimension_numbers<[1], [0], [0], [1], [0, 0, 1, 1], [], []>} : vector<8x32xbf16>, vector<32x32xbf16>, vector<8x32xf32> -> vector<8x32xf32>
    %164 = arith.truncf %163 : vector<8x32xf32> to vector<8x32xbf16>
    %c3_121 = arith.constant 3 : index
    %c0_122 = arith.constant 0 : index
    %c0_123 = arith.constant 0 : index
    %165 = vector.load %arg12[%c3_121, %c0_122, %c0_123] : memref<9x32x64xbf16, #tpu.memory_space<vmem>>, vector<1x32x64xbf16>
    %166 = vector.shape_cast %165 : vector<1x32x64xbf16> to vector<32x64xbf16>
    %cst_124 = arith.constant dense<0.000000e+00> : vector<8x64xf32>
    %167 = tpu.matmul %164, %166, %cst_124 {dimension_numbers = #tpu.dot_dimension_numbers<[1], [0], [0], [1], [0, 0, 1, 1], [], []>} : vector<8x32xbf16>, vector<32x64xbf16>, vector<8x64xf32> -> vector<8x64xf32>
    %168 = arith.addf %160, %167 : vector<8x64xf32>
    %c4_125 = arith.constant 4 : index
    %c0_126 = arith.constant 0 : index
    %c0_127 = arith.constant 0 : index
    %169 = vector.load %arg11[%c4_125, %c0_126, %c0_127] : memref<9x8x32xbf16, #tpu.memory_space<vmem>>, vector<1x8x32xbf16>
    %170 = vector.shape_cast %169 : vector<1x8x32xbf16> to vector<8x32xbf16>
    %cst_128 = arith.constant dense<0.000000e+00> : vector<8x32xf32>
    %171 = tpu.matmul %170, %137, %cst_128 {dimension_numbers = #tpu.dot_dimension_numbers<[1], [0], [0], [1], [0, 0, 1, 1], [], []>} : vector<8x32xbf16>, vector<32x32xbf16>, vector<8x32xf32> -> vector<8x32xf32>
    %172 = arith.truncf %171 : vector<8x32xf32> to vector<8x32xbf16>
    %c4_129 = arith.constant 4 : index
    %c0_130 = arith.constant 0 : index
    %c0_131 = arith.constant 0 : index
    %173 = vector.load %arg12[%c4_129, %c0_130, %c0_131] : memref<9x32x64xbf16, #tpu.memory_space<vmem>>, vector<1x32x64xbf16>
    %174 = vector.shape_cast %173 : vector<1x32x64xbf16> to vector<32x64xbf16>
    %cst_132 = arith.constant dense<0.000000e+00> : vector<8x64xf32>
    %175 = tpu.matmul %172, %174, %cst_132 {dimension_numbers = #tpu.dot_dimension_numbers<[1], [0], [0], [1], [0, 0, 1, 1], [], []>} : vector<8x32xbf16>, vector<32x64xbf16>, vector<8x64xf32> -> vector<8x64xf32>
    %176 = arith.addf %168, %175 : vector<8x64xf32>
    %c5_133 = arith.constant 5 : index
    %c0_134 = arith.constant 0 : index
    %c0_135 = arith.constant 0 : index
    %177 = vector.load %arg11[%c5_133, %c0_134, %c0_135] : memref<9x8x32xbf16, #tpu.memory_space<vmem>>, vector<1x8x32xbf16>
    %178 = vector.shape_cast %177 : vector<1x8x32xbf16> to vector<8x32xbf16>
    %cst_136 = arith.constant dense<0.000000e+00> : vector<8x32xf32>
    %179 = tpu.matmul %178, %137, %cst_136 {dimension_numbers = #tpu.dot_dimension_numbers<[1], [0], [0], [1], [0, 0, 1, 1], [], []>} : vector<8x32xbf16>, vector<32x32xbf16>, vector<8x32xf32> -> vector<8x32xf32>
    %180 = arith.truncf %179 : vector<8x32xf32> to vector<8x32xbf16>
    %c5_137 = arith.constant 5 : index
    %c0_138 = arith.constant 0 : index
    %c0_139 = arith.constant 0 : index
    %181 = vector.load %arg12[%c5_137, %c0_138, %c0_139] : memref<9x32x64xbf16, #tpu.memory_space<vmem>>, vector<1x32x64xbf16>
    %182 = vector.shape_cast %181 : vector<1x32x64xbf16> to vector<32x64xbf16>
    %cst_140 = arith.constant dense<0.000000e+00> : vector<8x64xf32>
    %183 = tpu.matmul %180, %182, %cst_140 {dimension_numbers = #tpu.dot_dimension_numbers<[1], [0], [0], [1], [0, 0, 1, 1], [], []>} : vector<8x32xbf16>, vector<32x64xbf16>, vector<8x64xf32> -> vector<8x64xf32>
    %184 = arith.addf %176, %183 : vector<8x64xf32>
    %c6_141 = arith.constant 6 : index
    %c0_142 = arith.constant 0 : index
    %c0_143 = arith.constant 0 : index
    %185 = vector.load %arg11[%c6_141, %c0_142, %c0_143] : memref<9x8x32xbf16, #tpu.memory_space<vmem>>, vector<1x8x32xbf16>
    %186 = vector.shape_cast %185 : vector<1x8x32xbf16> to vector<8x32xbf16>
    %cst_144 = arith.constant dense<0.000000e+00> : vector<8x32xf32>
    %187 = tpu.matmul %186, %137, %cst_144 {dimension_numbers = #tpu.dot_dimension_numbers<[1], [0], [0], [1], [0, 0, 1, 1], [], []>} : vector<8x32xbf16>, vector<32x32xbf16>, vector<8x32xf32> -> vector<8x32xf32>
    %188 = arith.truncf %187 : vector<8x32xf32> to vector<8x32xbf16>
    %c6_145 = arith.constant 6 : index
    %c0_146 = arith.constant 0 : index
    %c0_147 = arith.constant 0 : index
    %189 = vector.load %arg12[%c6_145, %c0_146, %c0_147] : memref<9x32x64xbf16, #tpu.memory_space<vmem>>, vector<1x32x64xbf16>
    %190 = vector.shape_cast %189 : vector<1x32x64xbf16> to vector<32x64xbf16>
    %cst_148 = arith.constant dense<0.000000e+00> : vector<8x64xf32>
    %191 = tpu.matmul %188, %190, %cst_148 {dimension_numbers = #tpu.dot_dimension_numbers<[1], [0], [0], [1], [0, 0, 1, 1], [], []>} : vector<8x32xbf16>, vector<32x64xbf16>, vector<8x64xf32> -> vector<8x64xf32>
    %192 = arith.addf %184, %191 : vector<8x64xf32>
    %c7_149 = arith.constant 7 : index
    %c0_150 = arith.constant 0 : index
    %c0_151 = arith.constant 0 : index
    %193 = vector.load %arg11[%c7_149, %c0_150, %c0_151] : memref<9x8x32xbf16, #tpu.memory_space<vmem>>, vector<1x8x32xbf16>
    %194 = vector.shape_cast %193 : vector<1x8x32xbf16> to vector<8x32xbf16>
    %cst_152 = arith.constant dense<0.000000e+00> : vector<8x32xf32>
    %195 = tpu.matmul %194, %137, %cst_152 {dimension_numbers = #tpu.dot_dimension_numbers<[1], [0], [0], [1], [0, 0, 1, 1], [], []>} : vector<8x32xbf16>, vector<32x32xbf16>, vector<8x32xf32> -> vector<8x32xf32>
    %196 = arith.truncf %195 : vector<8x32xf32> to vector<8x32xbf16>
    %c7_153 = arith.constant 7 : index
    %c0_154 = arith.constant 0 : index
    %c0_155 = arith.constant 0 : index
    %197 = vector.load %arg12[%c7_153, %c0_154, %c0_155] : memref<9x32x64xbf16, #tpu.memory_space<vmem>>, vector<1x32x64xbf16>
    %198 = vector.shape_cast %197 : vector<1x32x64xbf16> to vector<32x64xbf16>
    %cst_156 = arith.constant dense<0.000000e+00> : vector<8x64xf32>
    %199 = tpu.matmul %196, %198, %cst_156 {dimension_numbers = #tpu.dot_dimension_numbers<[1], [0], [0], [1], [0, 0, 1, 1], [], []>} : vector<8x32xbf16>, vector<32x64xbf16>, vector<8x64xf32> -> vector<8x64xf32>
    %200 = arith.addf %192, %199 : vector<8x64xf32>
    %c8_157 = arith.constant 8 : index
    %c0_158 = arith.constant 0 : index
    %c0_159 = arith.constant 0 : index
    %201 = vector.load %arg11[%c8_157, %c0_158, %c0_159] : memref<9x8x32xbf16, #tpu.memory_space<vmem>>, vector<1x8x32xbf16>
    %202 = vector.shape_cast %201 : vector<1x8x32xbf16> to vector<8x32xbf16>
    %cst_160 = arith.constant dense<0.000000e+00> : vector<8x32xf32>
    %203 = tpu.matmul %202, %137, %cst_160 {dimension_numbers = #tpu.dot_dimension_numbers<[1], [0], [0], [1], [0, 0, 1, 1], [], []>} : vector<8x32xbf16>, vector<32x32xbf16>, vector<8x32xf32> -> vector<8x32xf32>
    %204 = arith.truncf %203 : vector<8x32xf32> to vector<8x32xbf16>
    %c8_161 = arith.constant 8 : index
    %c0_162 = arith.constant 0 : index
    %c0_163 = arith.constant 0 : index
    %205 = vector.load %arg12[%c8_161, %c0_162, %c0_163] : memref<9x32x64xbf16, #tpu.memory_space<vmem>>, vector<1x32x64xbf16>
    %206 = vector.shape_cast %205 : vector<1x32x64xbf16> to vector<32x64xbf16>
    %cst_164 = arith.constant dense<0.000000e+00> : vector<8x64xf32>
    %207 = tpu.matmul %204, %206, %cst_164 {dimension_numbers = #tpu.dot_dimension_numbers<[1], [0], [0], [1], [0, 0, 1, 1], [], []>} : vector<8x32xbf16>, vector<32x64xbf16>, vector<8x64xf32> -> vector<8x64xf32>
    %208 = arith.addf %200, %207 : vector<8x64xf32>
    %c0_165 = arith.constant 0 : index
    %c0_166 = arith.constant 0 : index
    %209 = vector.load %arg13[%c0_165, %c0_166] : memref<1x64xf32, #tpu.memory_space<vmem>>, vector<1x64xf32>
    %210 = vector.broadcast %209 : vector<1x64xf32> to vector<8x64xf32>
    %211 = arith.addf %208, %210 : vector<8x64xf32>
    %c0_167 = arith.constant 0 : index
    %c0_168 = arith.constant 0 : index
    %212 = vector.load %arg14[%c0_167, %c0_168] : memref<1x64xf32, #tpu.memory_space<vmem>>, vector<1x64xf32>
    %c0_169 = arith.constant 0 : index
    %c0_170 = arith.constant 0 : index
    %213 = vector.load %arg15[%c0_169, %c0_170] : memref<1x64xf32, #tpu.memory_space<vmem>>, vector<1x64xf32>
    %cst_171 = arith.constant dense<0.000000e+00> : vector<64xf32>
    %214 = vector.multi_reduction <add>, %211, %cst_171 [0] : vector<8x64xf32> to vector<64xf32>
    %215 = vector.shape_cast %214 : vector<64xf32> to vector<1x64xf32>
    %cst_172 = arith.constant 1.250000e-01 : f32
    %216 = vector.broadcast %cst_172 : f32 to vector<1x64xf32>
    %217 = arith.mulf %215, %216 : vector<1x64xf32>
    %218 = arith.mulf %211, %211 : vector<8x64xf32>
    %cst_173 = arith.constant dense<0.000000e+00> : vector<64xf32>
    %219 = vector.multi_reduction <add>, %218, %cst_173 [0] : vector<8x64xf32> to vector<64xf32>
    %220 = vector.shape_cast %219 : vector<64xf32> to vector<1x64xf32>
    %cst_174 = arith.constant 1.250000e-01 : f32
    %221 = vector.broadcast %cst_174 : f32 to vector<1x64xf32>
    %222 = arith.mulf %220, %221 : vector<1x64xf32>
    %223 = arith.mulf %217, %217 : vector<1x64xf32>
    %224 = arith.subf %222, %223 : vector<1x64xf32>
    %cst_175 = arith.constant 9.99999974E-6 : f32
    %225 = vector.broadcast %cst_175 : f32 to vector<1x64xf32>
    %226 = arith.addf %224, %225 : vector<1x64xf32>
    %227 = math.rsqrt %226 : vector<1x64xf32>
    %228 = arith.mulf %212, %227 : vector<1x64xf32>
    %229 = arith.mulf %217, %228 : vector<1x64xf32>
    %230 = arith.subf %213, %229 : vector<1x64xf32>
    %231 = vector.broadcast %228 : vector<1x64xf32> to vector<8x64xf32>
    %232 = arith.mulf %211, %231 : vector<8x64xf32>
    %233 = vector.broadcast %230 : vector<1x64xf32> to vector<8x64xf32>
    %234 = arith.addf %232, %233 : vector<8x64xf32>
    %cst_176 = arith.constant 0.000000e+00 : f32
    %235 = vector.broadcast %cst_176 : f32 to vector<8x64xf32>
    %236 = arith.cmpf oge, %234, %235 : vector<8x64xf32>
    %cst_177 = arith.constant 3.000000e-02 : f32
    %237 = vector.broadcast %cst_177 : f32 to vector<8x64xf32>
    %238 = arith.mulf %237, %234 : vector<8x64xf32>
    %239 = arith.select %236, %234, %238 : vector<8x64xi1>, vector<8x64xf32>
    %240 = arith.truncf %239 : vector<8x64xf32> to vector<8x64xbf16>
    %c0_178 = arith.constant 0 : index
    %c0_179 = arith.constant 0 : index
    %c0_180 = arith.constant 0 : index
    %241 = vector.load %arg16[%c0_178, %c0_179, %c0_180] : memref<9x2x8xbf16, #tpu.memory_space<vmem>>, vector<1x2x8xbf16>
    %242 = vector.shape_cast %241 : vector<1x2x8xbf16> to vector<2x8xbf16>
    %cst_181 = arith.constant dense<0.000000e+00> : vector<2x64xf32>
    %243 = tpu.matmul %242, %240, %cst_181 {dimension_numbers = #tpu.dot_dimension_numbers<[1], [0], [0], [1], [0, 0, 1, 1], [], []>} : vector<2x8xbf16>, vector<8x64xbf16>, vector<2x64xf32> -> vector<2x64xf32>
    %244 = arith.truncf %243 : vector<2x64xf32> to vector<2x64xbf16>
    %c0_182 = arith.constant 0 : index
    %c0_183 = arith.constant 0 : index
    %c0_184 = arith.constant 0 : index
    %245 = vector.load %arg17[%c0_182, %c0_183, %c0_184] : memref<9x64x128xbf16, #tpu.memory_space<vmem>>, vector<1x64x128xbf16>
    %246 = vector.shape_cast %245 : vector<1x64x128xbf16> to vector<64x128xbf16>
    %cst_185 = arith.constant dense<0.000000e+00> : vector<2x128xf32>
    %247 = tpu.matmul %244, %246, %cst_185 {dimension_numbers = #tpu.dot_dimension_numbers<[1], [0], [0], [1], [0, 0, 1, 1], [], []>} : vector<2x64xbf16>, vector<64x128xbf16>, vector<2x128xf32> -> vector<2x128xf32>
    %c1_186 = arith.constant 1 : index
    %c0_187 = arith.constant 0 : index
    %c0_188 = arith.constant 0 : index
    %248 = vector.load %arg16[%c1_186, %c0_187, %c0_188] : memref<9x2x8xbf16, #tpu.memory_space<vmem>>, vector<1x2x8xbf16>
    %249 = vector.shape_cast %248 : vector<1x2x8xbf16> to vector<2x8xbf16>
    %cst_189 = arith.constant dense<0.000000e+00> : vector<2x64xf32>
    %250 = tpu.matmul %249, %240, %cst_189 {dimension_numbers = #tpu.dot_dimension_numbers<[1], [0], [0], [1], [0, 0, 1, 1], [], []>} : vector<2x8xbf16>, vector<8x64xbf16>, vector<2x64xf32> -> vector<2x64xf32>
    %251 = arith.truncf %250 : vector<2x64xf32> to vector<2x64xbf16>
    %c1_190 = arith.constant 1 : index
    %c0_191 = arith.constant 0 : index
    %c0_192 = arith.constant 0 : index
    %252 = vector.load %arg17[%c1_190, %c0_191, %c0_192] : memref<9x64x128xbf16, #tpu.memory_space<vmem>>, vector<1x64x128xbf16>
    %253 = vector.shape_cast %252 : vector<1x64x128xbf16> to vector<64x128xbf16>
    %cst_193 = arith.constant dense<0.000000e+00> : vector<2x128xf32>
    %254 = tpu.matmul %251, %253, %cst_193 {dimension_numbers = #tpu.dot_dimension_numbers<[1], [0], [0], [1], [0, 0, 1, 1], [], []>} : vector<2x64xbf16>, vector<64x128xbf16>, vector<2x128xf32> -> vector<2x128xf32>
    %255 = arith.addf %247, %254 : vector<2x128xf32>
    %c2_194 = arith.constant 2 : index
    %c0_195 = arith.constant 0 : index
    %c0_196 = arith.constant 0 : index
    %256 = vector.load %arg16[%c2_194, %c0_195, %c0_196] : memref<9x2x8xbf16, #tpu.memory_space<vmem>>, vector<1x2x8xbf16>
    %257 = vector.shape_cast %256 : vector<1x2x8xbf16> to vector<2x8xbf16>
    %cst_197 = arith.constant dense<0.000000e+00> : vector<2x64xf32>
    %258 = tpu.matmul %257, %240, %cst_197 {dimension_numbers = #tpu.dot_dimension_numbers<[1], [0], [0], [1], [0, 0, 1, 1], [], []>} : vector<2x8xbf16>, vector<8x64xbf16>, vector<2x64xf32> -> vector<2x64xf32>
    %259 = arith.truncf %258 : vector<2x64xf32> to vector<2x64xbf16>
    %c2_198 = arith.constant 2 : index
    %c0_199 = arith.constant 0 : index
    %c0_200 = arith.constant 0 : index
    %260 = vector.load %arg17[%c2_198, %c0_199, %c0_200] : memref<9x64x128xbf16, #tpu.memory_space<vmem>>, vector<1x64x128xbf16>
    %261 = vector.shape_cast %260 : vector<1x64x128xbf16> to vector<64x128xbf16>
    %cst_201 = arith.constant dense<0.000000e+00> : vector<2x128xf32>
    %262 = tpu.matmul %259, %261, %cst_201 {dimension_numbers = #tpu.dot_dimension_numbers<[1], [0], [0], [1], [0, 0, 1, 1], [], []>} : vector<2x64xbf16>, vector<64x128xbf16>, vector<2x128xf32> -> vector<2x128xf32>
    %263 = arith.addf %255, %262 : vector<2x128xf32>
    %c3_202 = arith.constant 3 : index
    %c0_203 = arith.constant 0 : index
    %c0_204 = arith.constant 0 : index
    %264 = vector.load %arg16[%c3_202, %c0_203, %c0_204] : memref<9x2x8xbf16, #tpu.memory_space<vmem>>, vector<1x2x8xbf16>
    %265 = vector.shape_cast %264 : vector<1x2x8xbf16> to vector<2x8xbf16>
    %cst_205 = arith.constant dense<0.000000e+00> : vector<2x64xf32>
    %266 = tpu.matmul %265, %240, %cst_205 {dimension_numbers = #tpu.dot_dimension_numbers<[1], [0], [0], [1], [0, 0, 1, 1], [], []>} : vector<2x8xbf16>, vector<8x64xbf16>, vector<2x64xf32> -> vector<2x64xf32>
    %267 = arith.truncf %266 : vector<2x64xf32> to vector<2x64xbf16>
    %c3_206 = arith.constant 3 : index
    %c0_207 = arith.constant 0 : index
    %c0_208 = arith.constant 0 : index
    %268 = vector.load %arg17[%c3_206, %c0_207, %c0_208] : memref<9x64x128xbf16, #tpu.memory_space<vmem>>, vector<1x64x128xbf16>
    %269 = vector.shape_cast %268 : vector<1x64x128xbf16> to vector<64x128xbf16>
    %cst_209 = arith.constant dense<0.000000e+00> : vector<2x128xf32>
    %270 = tpu.matmul %267, %269, %cst_209 {dimension_numbers = #tpu.dot_dimension_numbers<[1], [0], [0], [1], [0, 0, 1, 1], [], []>} : vector<2x64xbf16>, vector<64x128xbf16>, vector<2x128xf32> -> vector<2x128xf32>
    %271 = arith.addf %263, %270 : vector<2x128xf32>
    %c4_210 = arith.constant 4 : index
    %c0_211 = arith.constant 0 : index
    %c0_212 = arith.constant 0 : index
    %272 = vector.load %arg16[%c4_210, %c0_211, %c0_212] : memref<9x2x8xbf16, #tpu.memory_space<vmem>>, vector<1x2x8xbf16>
    %273 = vector.shape_cast %272 : vector<1x2x8xbf16> to vector<2x8xbf16>
    %cst_213 = arith.constant dense<0.000000e+00> : vector<2x64xf32>
    %274 = tpu.matmul %273, %240, %cst_213 {dimension_numbers = #tpu.dot_dimension_numbers<[1], [0], [0], [1], [0, 0, 1, 1], [], []>} : vector<2x8xbf16>, vector<8x64xbf16>, vector<2x64xf32> -> vector<2x64xf32>
    %275 = arith.truncf %274 : vector<2x64xf32> to vector<2x64xbf16>
    %c4_214 = arith.constant 4 : index
    %c0_215 = arith.constant 0 : index
    %c0_216 = arith.constant 0 : index
    %276 = vector.load %arg17[%c4_214, %c0_215, %c0_216] : memref<9x64x128xbf16, #tpu.memory_space<vmem>>, vector<1x64x128xbf16>
    %277 = vector.shape_cast %276 : vector<1x64x128xbf16> to vector<64x128xbf16>
    %cst_217 = arith.constant dense<0.000000e+00> : vector<2x128xf32>
    %278 = tpu.matmul %275, %277, %cst_217 {dimension_numbers = #tpu.dot_dimension_numbers<[1], [0], [0], [1], [0, 0, 1, 1], [], []>} : vector<2x64xbf16>, vector<64x128xbf16>, vector<2x128xf32> -> vector<2x128xf32>
    %279 = arith.addf %271, %278 : vector<2x128xf32>
    %c5_218 = arith.constant 5 : index
    %c0_219 = arith.constant 0 : index
    %c0_220 = arith.constant 0 : index
    %280 = vector.load %arg16[%c5_218, %c0_219, %c0_220] : memref<9x2x8xbf16, #tpu.memory_space<vmem>>, vector<1x2x8xbf16>
    %281 = vector.shape_cast %280 : vector<1x2x8xbf16> to vector<2x8xbf16>
    %cst_221 = arith.constant dense<0.000000e+00> : vector<2x64xf32>
    %282 = tpu.matmul %281, %240, %cst_221 {dimension_numbers = #tpu.dot_dimension_numbers<[1], [0], [0], [1], [0, 0, 1, 1], [], []>} : vector<2x8xbf16>, vector<8x64xbf16>, vector<2x64xf32> -> vector<2x64xf32>
    %283 = arith.truncf %282 : vector<2x64xf32> to vector<2x64xbf16>
    %c5_222 = arith.constant 5 : index
    %c0_223 = arith.constant 0 : index
    %c0_224 = arith.constant 0 : index
    %284 = vector.load %arg17[%c5_222, %c0_223, %c0_224] : memref<9x64x128xbf16, #tpu.memory_space<vmem>>, vector<1x64x128xbf16>
    %285 = vector.shape_cast %284 : vector<1x64x128xbf16> to vector<64x128xbf16>
    %cst_225 = arith.constant dense<0.000000e+00> : vector<2x128xf32>
    %286 = tpu.matmul %283, %285, %cst_225 {dimension_numbers = #tpu.dot_dimension_numbers<[1], [0], [0], [1], [0, 0, 1, 1], [], []>} : vector<2x64xbf16>, vector<64x128xbf16>, vector<2x128xf32> -> vector<2x128xf32>
    %287 = arith.addf %279, %286 : vector<2x128xf32>
    %c6_226 = arith.constant 6 : index
    %c0_227 = arith.constant 0 : index
    %c0_228 = arith.constant 0 : index
    %288 = vector.load %arg16[%c6_226, %c0_227, %c0_228] : memref<9x2x8xbf16, #tpu.memory_space<vmem>>, vector<1x2x8xbf16>
    %289 = vector.shape_cast %288 : vector<1x2x8xbf16> to vector<2x8xbf16>
    %cst_229 = arith.constant dense<0.000000e+00> : vector<2x64xf32>
    %290 = tpu.matmul %289, %240, %cst_229 {dimension_numbers = #tpu.dot_dimension_numbers<[1], [0], [0], [1], [0, 0, 1, 1], [], []>} : vector<2x8xbf16>, vector<8x64xbf16>, vector<2x64xf32> -> vector<2x64xf32>
    %291 = arith.truncf %290 : vector<2x64xf32> to vector<2x64xbf16>
    %c6_230 = arith.constant 6 : index
    %c0_231 = arith.constant 0 : index
    %c0_232 = arith.constant 0 : index
    %292 = vector.load %arg17[%c6_230, %c0_231, %c0_232] : memref<9x64x128xbf16, #tpu.memory_space<vmem>>, vector<1x64x128xbf16>
    %293 = vector.shape_cast %292 : vector<1x64x128xbf16> to vector<64x128xbf16>
    %cst_233 = arith.constant dense<0.000000e+00> : vector<2x128xf32>
    %294 = tpu.matmul %291, %293, %cst_233 {dimension_numbers = #tpu.dot_dimension_numbers<[1], [0], [0], [1], [0, 0, 1, 1], [], []>} : vector<2x64xbf16>, vector<64x128xbf16>, vector<2x128xf32> -> vector<2x128xf32>
    %295 = arith.addf %287, %294 : vector<2x128xf32>
    %c7_234 = arith.constant 7 : index
    %c0_235 = arith.constant 0 : index
    %c0_236 = arith.constant 0 : index
    %296 = vector.load %arg16[%c7_234, %c0_235, %c0_236] : memref<9x2x8xbf16, #tpu.memory_space<vmem>>, vector<1x2x8xbf16>
    %297 = vector.shape_cast %296 : vector<1x2x8xbf16> to vector<2x8xbf16>
    %cst_237 = arith.constant dense<0.000000e+00> : vector<2x64xf32>
    %298 = tpu.matmul %297, %240, %cst_237 {dimension_numbers = #tpu.dot_dimension_numbers<[1], [0], [0], [1], [0, 0, 1, 1], [], []>} : vector<2x8xbf16>, vector<8x64xbf16>, vector<2x64xf32> -> vector<2x64xf32>
    %299 = arith.truncf %298 : vector<2x64xf32> to vector<2x64xbf16>
    %c7_238 = arith.constant 7 : index
    %c0_239 = arith.constant 0 : index
    %c0_240 = arith.constant 0 : index
    %300 = vector.load %arg17[%c7_238, %c0_239, %c0_240] : memref<9x64x128xbf16, #tpu.memory_space<vmem>>, vector<1x64x128xbf16>
    %301 = vector.shape_cast %300 : vector<1x64x128xbf16> to vector<64x128xbf16>
    %cst_241 = arith.constant dense<0.000000e+00> : vector<2x128xf32>
    %302 = tpu.matmul %299, %301, %cst_241 {dimension_numbers = #tpu.dot_dimension_numbers<[1], [0], [0], [1], [0, 0, 1, 1], [], []>} : vector<2x64xbf16>, vector<64x128xbf16>, vector<2x128xf32> -> vector<2x128xf32>
    %303 = arith.addf %295, %302 : vector<2x128xf32>
    %c8_242 = arith.constant 8 : index
    %c0_243 = arith.constant 0 : index
    %c0_244 = arith.constant 0 : index
    %304 = vector.load %arg16[%c8_242, %c0_243, %c0_244] : memref<9x2x8xbf16, #tpu.memory_space<vmem>>, vector<1x2x8xbf16>
    %305 = vector.shape_cast %304 : vector<1x2x8xbf16> to vector<2x8xbf16>
    %cst_245 = arith.constant dense<0.000000e+00> : vector<2x64xf32>
    %306 = tpu.matmul %305, %240, %cst_245 {dimension_numbers = #tpu.dot_dimension_numbers<[1], [0], [0], [1], [0, 0, 1, 1], [], []>} : vector<2x8xbf16>, vector<8x64xbf16>, vector<2x64xf32> -> vector<2x64xf32>
    %307 = arith.truncf %306 : vector<2x64xf32> to vector<2x64xbf16>
    %c8_246 = arith.constant 8 : index
    %c0_247 = arith.constant 0 : index
    %c0_248 = arith.constant 0 : index
    %308 = vector.load %arg17[%c8_246, %c0_247, %c0_248] : memref<9x64x128xbf16, #tpu.memory_space<vmem>>, vector<1x64x128xbf16>
    %309 = vector.shape_cast %308 : vector<1x64x128xbf16> to vector<64x128xbf16>
    %cst_249 = arith.constant dense<0.000000e+00> : vector<2x128xf32>
    %310 = tpu.matmul %307, %309, %cst_249 {dimension_numbers = #tpu.dot_dimension_numbers<[1], [0], [0], [1], [0, 0, 1, 1], [], []>} : vector<2x64xbf16>, vector<64x128xbf16>, vector<2x128xf32> -> vector<2x128xf32>
    %311 = arith.addf %303, %310 : vector<2x128xf32>
    %c0_250 = arith.constant 0 : index
    %c0_251 = arith.constant 0 : index
    %312 = vector.load %arg18[%c0_250, %c0_251] : memref<1x128xf32, #tpu.memory_space<vmem>>, vector<1x128xf32>
    %313 = vector.broadcast %312 : vector<1x128xf32> to vector<2x128xf32>
    %314 = arith.addf %311, %313 : vector<2x128xf32>
    %c0_252 = arith.constant 0 : index
    %c0_253 = arith.constant 0 : index
    %315 = vector.load %arg19[%c0_252, %c0_253] : memref<1x128xf32, #tpu.memory_space<vmem>>, vector<1x128xf32>
    %c0_254 = arith.constant 0 : index
    %c0_255 = arith.constant 0 : index
    %316 = vector.load %arg20[%c0_254, %c0_255] : memref<1x128xf32, #tpu.memory_space<vmem>>, vector<1x128xf32>
    %cst_256 = arith.constant dense<0.000000e+00> : vector<128xf32>
    %317 = vector.multi_reduction <add>, %314, %cst_256 [0] : vector<2x128xf32> to vector<128xf32>
    %318 = vector.shape_cast %317 : vector<128xf32> to vector<1x128xf32>
    %cst_257 = arith.constant 5.000000e-01 : f32
    %319 = vector.broadcast %cst_257 : f32 to vector<1x128xf32>
    %320 = arith.mulf %318, %319 : vector<1x128xf32>
    %321 = arith.mulf %314, %314 : vector<2x128xf32>
    %cst_258 = arith.constant dense<0.000000e+00> : vector<128xf32>
    %322 = vector.multi_reduction <add>, %321, %cst_258 [0] : vector<2x128xf32> to vector<128xf32>
    %323 = vector.shape_cast %322 : vector<128xf32> to vector<1x128xf32>
    %cst_259 = arith.constant 5.000000e-01 : f32
    %324 = vector.broadcast %cst_259 : f32 to vector<1x128xf32>
    %325 = arith.mulf %323, %324 : vector<1x128xf32>
    %326 = arith.mulf %320, %320 : vector<1x128xf32>
    %327 = arith.subf %325, %326 : vector<1x128xf32>
    %cst_260 = arith.constant 9.99999974E-6 : f32
    %328 = vector.broadcast %cst_260 : f32 to vector<1x128xf32>
    %329 = arith.addf %327, %328 : vector<1x128xf32>
    %330 = math.rsqrt %329 : vector<1x128xf32>
    %331 = arith.mulf %315, %330 : vector<1x128xf32>
    %332 = arith.mulf %320, %331 : vector<1x128xf32>
    %333 = arith.subf %316, %332 : vector<1x128xf32>
    %334 = vector.broadcast %331 : vector<1x128xf32> to vector<2x128xf32>
    %335 = arith.mulf %314, %334 : vector<2x128xf32>
    %336 = vector.broadcast %333 : vector<1x128xf32> to vector<2x128xf32>
    %337 = arith.addf %335, %336 : vector<2x128xf32>
    %cst_261 = arith.constant 0.000000e+00 : f32
    %338 = vector.broadcast %cst_261 : f32 to vector<2x128xf32>
    %339 = arith.cmpf oge, %337, %338 : vector<2x128xf32>
    %cst_262 = arith.constant 3.000000e-02 : f32
    %340 = vector.broadcast %cst_262 : f32 to vector<2x128xf32>
    %341 = arith.mulf %340, %337 : vector<2x128xf32>
    %342 = arith.select %339, %337, %341 : vector<2x128xi1>, vector<2x128xf32>
    %343 = arith.truncf %342 : vector<2x128xf32> to vector<2x128xbf16>
    %c0_263 = arith.constant 0 : index
    %c0_264 = arith.constant 0 : index
    %c0_265 = arith.constant 0 : index
    %344 = vector.load %arg21[%c0_263, %c0_264, %c0_265] : memref<1x2x2xbf16, #tpu.memory_space<vmem>>, vector<1x2x2xbf16>
    %345 = vector.shape_cast %344 : vector<1x2x2xbf16> to vector<2x2xbf16>
    %cst_266 = arith.constant dense<0.000000e+00> : vector<2x128xf32>
    %346 = tpu.matmul %345, %343, %cst_266 {dimension_numbers = #tpu.dot_dimension_numbers<[1], [0], [0], [1], [0, 0, 1, 1], [], []>} : vector<2x2xbf16>, vector<2x128xbf16>, vector<2x128xf32> -> vector<2x128xf32>
    %347 = arith.truncf %346 : vector<2x128xf32> to vector<2x128xbf16>
    %c0_267 = arith.constant 0 : index
    %c0_268 = arith.constant 0 : index
    %c0_269 = arith.constant 0 : index
    %348 = vector.load %arg22[%c0_267, %c0_268, %c0_269] : memref<1x128x32xbf16, #tpu.memory_space<vmem>>, vector<1x128x32xbf16>
    %349 = vector.shape_cast %348 : vector<1x128x32xbf16> to vector<128x32xbf16>
    %cst_270 = arith.constant dense<0.000000e+00> : vector<2x32xf32>
    %350 = tpu.matmul %347, %349, %cst_270 {dimension_numbers = #tpu.dot_dimension_numbers<[1], [0], [0], [1], [0, 0, 1, 1], [], []>} : vector<2x128xbf16>, vector<128x32xbf16>, vector<2x32xf32> -> vector<2x32xf32>
    %c0_271 = arith.constant 0 : index
    %c0_272 = arith.constant 0 : index
    %351 = vector.load %arg23[%c0_271, %c0_272] : memref<1x32xf32, #tpu.memory_space<vmem>>, vector<1x32xf32>
    %352 = vector.broadcast %351 : vector<1x32xf32> to vector<2x32xf32>
    %353 = arith.addf %350, %352 : vector<2x32xf32>
    %c0_273 = arith.constant 0 : index
    %c0_274 = arith.constant 0 : index
    %354 = vector.load %arg24[%c0_273, %c0_274] : memref<1x32xf32, #tpu.memory_space<vmem>>, vector<1x32xf32>
    %c0_275 = arith.constant 0 : index
    %c0_276 = arith.constant 0 : index
    %355 = vector.load %arg25[%c0_275, %c0_276] : memref<1x32xf32, #tpu.memory_space<vmem>>, vector<1x32xf32>
    %cst_277 = arith.constant dense<0.000000e+00> : vector<32xf32>
    %356 = vector.multi_reduction <add>, %353, %cst_277 [0] : vector<2x32xf32> to vector<32xf32>
    %357 = vector.shape_cast %356 : vector<32xf32> to vector<1x32xf32>
    %cst_278 = arith.constant 5.000000e-01 : f32
    %358 = vector.broadcast %cst_278 : f32 to vector<1x32xf32>
    %359 = arith.mulf %357, %358 : vector<1x32xf32>
    %360 = arith.mulf %353, %353 : vector<2x32xf32>
    %cst_279 = arith.constant dense<0.000000e+00> : vector<32xf32>
    %361 = vector.multi_reduction <add>, %360, %cst_279 [0] : vector<2x32xf32> to vector<32xf32>
    %362 = vector.shape_cast %361 : vector<32xf32> to vector<1x32xf32>
    %cst_280 = arith.constant 5.000000e-01 : f32
    %363 = vector.broadcast %cst_280 : f32 to vector<1x32xf32>
    %364 = arith.mulf %362, %363 : vector<1x32xf32>
    %365 = arith.mulf %359, %359 : vector<1x32xf32>
    %366 = arith.subf %364, %365 : vector<1x32xf32>
    %cst_281 = arith.constant 9.99999974E-6 : f32
    %367 = vector.broadcast %cst_281 : f32 to vector<1x32xf32>
    %368 = arith.addf %366, %367 : vector<1x32xf32>
    %369 = math.rsqrt %368 : vector<1x32xf32>
    %370 = arith.mulf %354, %369 : vector<1x32xf32>
    %371 = arith.mulf %359, %370 : vector<1x32xf32>
    %372 = arith.subf %355, %371 : vector<1x32xf32>
    %373 = vector.broadcast %370 : vector<1x32xf32> to vector<2x32xf32>
    %374 = arith.mulf %353, %373 : vector<2x32xf32>
    %375 = vector.broadcast %372 : vector<1x32xf32> to vector<2x32xf32>
    %376 = arith.addf %374, %375 : vector<2x32xf32>
    %cst_282 = arith.constant 0.000000e+00 : f32
    %377 = vector.broadcast %cst_282 : f32 to vector<2x32xf32>
    %378 = arith.cmpf oge, %376, %377 : vector<2x32xf32>
    %cst_283 = arith.constant 3.000000e-02 : f32
    %379 = vector.broadcast %cst_283 : f32 to vector<2x32xf32>
    %380 = arith.mulf %379, %376 : vector<2x32xf32>
    %381 = arith.select %378, %376, %380 : vector<2x32xi1>, vector<2x32xf32>
    %c0_284 = arith.constant 0 : index
    %c0_285 = arith.constant 0 : index
    %382 = vector.load %arg26[%c0_284, %c0_285] : memref<32x16xf32, #tpu.memory_space<vmem>>, vector<32x16xf32>
    %cst_286 = arith.constant dense<0.000000e+00> : vector<2x16xf32>
    %383 = tpu.matmul %381, %382, %cst_286 {dimension_numbers = #tpu.dot_dimension_numbers<[1], [0], [0], [1], [0, 0, 1, 1], [], []>} : vector<2x32xf32>, vector<32x16xf32>, vector<2x16xf32> -> vector<2x16xf32>
    %c0_287 = arith.constant 0 : index
    %c0_288 = arith.constant 0 : index
    %384 = vector.load %arg27[%c0_287, %c0_288] : memref<1x16xf32, #tpu.memory_space<vmem>>, vector<1x16xf32>
    %385 = vector.broadcast %384 : vector<1x16xf32> to vector<2x16xf32>
    %386 = arith.addf %383, %385 : vector<2x16xf32>
    %387 = vector.extract_strided_slice %386 {offsets = [0, 0], sizes = [2, 8], strides = [1, 1]} : vector<2x16xf32> to vector<2x8xf32>
    %388 = vector.extract_strided_slice %386 {offsets = [0, 8], sizes = [2, 8], strides = [1, 1]} : vector<2x16xf32> to vector<2x8xf32>
    %c0_289 = arith.constant 0 : index
    %c0_290 = arith.constant 0 : index
    %389 = vector.load %arg28[%c0_289, %c0_290] : memref<2x8xf32, #tpu.memory_space<vmem>>, vector<2x8xf32>
    %cst_291 = arith.constant 5.000000e-01 : f32
    %390 = vector.broadcast %cst_291 : f32 to vector<2x8xf32>
    %391 = arith.mulf %390, %388 : vector<2x8xf32>
    %392 = math.exp %391 : vector<2x8xf32>
    %393 = arith.mulf %389, %392 : vector<2x8xf32>
    %394 = arith.addf %387, %393 : vector<2x8xf32>
    %c0_292 = arith.constant 0 : index
    %c0_293 = arith.constant 0 : index
    %395 = vector.load %arg29[%c0_292, %c0_293] : memref<2x24xf32, #tpu.memory_space<vmem>>, vector<2x8xf32>
    tpu.vector_store %arg29[%c0_292, %c0_293], %394 {strides = array<i32>} : memref<2x24xf32, #tpu.memory_space<vmem>>, vector<2x8xf32>,
    %c0_294 = arith.constant 0 : index
    %c8_295 = arith.constant 8 : index
    %396 = vector.load %arg29[%c0_294, %c8_295] : memref<2x24xf32, #tpu.memory_space<vmem>>, vector<2x8xf32>
    tpu.vector_store %arg29[%c0_294, %c8_295], %387 {strides = array<i32>} : memref<2x24xf32, #tpu.memory_space<vmem>>, vector<2x8xf32>,
    %c0_296 = arith.constant 0 : index
    %c16 = arith.constant 16 : index
    %397 = vector.load %arg29[%c0_296, %c16] : memref<2x24xf32, #tpu.memory_space<vmem>>, vector<2x8xf32>
    tpu.vector_store %arg29[%c0_296, %c16], %388 {strides = array<i32>} : memref<2x24xf32, #tpu.memory_space<vmem>>, vector<2x8xf32>,
    return
  }
  func.func @transform_0(%arg0: i32) -> (i32, i32) {
    %c0_i32 = arith.constant 0 : i32
    %c0_i32_0 = arith.constant 0 : i32
    %c0_i32_1 = arith.constant 0 : i32
    return %c0_i32, %c0_i32_0 : i32, i32
  }
  func.func @transform_1(%arg0: i32) -> (i32, i32) {
    %c0_i32 = arith.constant 0 : i32
    %c0_i32_0 = arith.constant 0 : i32
    %c0_i32_1 = arith.constant 0 : i32
    return %c0_i32, %c0_i32_0 : i32, i32
  }
  func.func @transform_2(%arg0: i32) -> (i32, i32) {
    %c0_i32 = arith.constant 0 : i32
    %c0_i32_0 = arith.constant 0 : i32
    %c0_i32_1 = arith.constant 0 : i32
    return %c0_i32, %c0_i32_0 : i32, i32
  }
  func.func @transform_3(%arg0: i32) -> (i32, i32) {
    %c0_i32 = arith.constant 0 : i32
    %c0_i32_0 = arith.constant 0 : i32
    %c0_i32_1 = arith.constant 0 : i32
    return %c0_i32, %c0_i32_0 : i32, i32
  }
  func.func @transform_4(%arg0: i32) -> (i32, i32) {
    %c0_i32 = arith.constant 0 : i32
    %c0_i32_0 = arith.constant 0 : i32
    %c0_i32_1 = arith.constant 0 : i32
    return %c0_i32, %c0_i32_0 : i32, i32
  }
  func.func @transform_5(%arg0: i32) -> (i32, i32, i32) {
    %c0_i32 = arith.constant 0 : i32
    %c0_i32_0 = arith.constant 0 : i32
    %c0_i32_1 = arith.constant 0 : i32
    %c0_i32_2 = arith.constant 0 : i32
    return %c0_i32, %c0_i32_0, %c0_i32_1 : i32, i32, i32
  }
  func.func @transform_6(%arg0: i32) -> (i32, i32, i32) {
    %c0_i32 = arith.constant 0 : i32
    %c0_i32_0 = arith.constant 0 : i32
    %c0_i32_1 = arith.constant 0 : i32
    %c0_i32_2 = arith.constant 0 : i32
    return %c0_i32, %c0_i32_0, %c0_i32_1 : i32, i32, i32
  }
  func.func @transform_7(%arg0: i32) -> (i32, i32) {
    %c0_i32 = arith.constant 0 : i32
    %c0_i32_0 = arith.constant 0 : i32
    %c0_i32_1 = arith.constant 0 : i32
    return %c0_i32, %c0_i32_0 : i32, i32
  }
  func.func @transform_8(%arg0: i32) -> (i32, i32) {
    %c0_i32 = arith.constant 0 : i32
    %c0_i32_0 = arith.constant 0 : i32
    %c0_i32_1 = arith.constant 0 : i32
    return %c0_i32, %c0_i32_0 : i32, i32
  }
  func.func @transform_9(%arg0: i32) -> (i32, i32) {
    %c0_i32 = arith.constant 0 : i32
    %c0_i32_0 = arith.constant 0 : i32
    %c0_i32_1 = arith.constant 0 : i32
    return %c0_i32, %c0_i32_0 : i32, i32
  }
  func.func @transform_10(%arg0: i32) -> (i32, i32, i32) {
    %c0_i32 = arith.constant 0 : i32
    %c0_i32_0 = arith.constant 0 : i32
    %c0_i32_1 = arith.constant 0 : i32
    %c0_i32_2 = arith.constant 0 : i32
    return %c0_i32, %c0_i32_0, %c0_i32_1 : i32, i32, i32
  }
  func.func @transform_11(%arg0: i32) -> (i32, i32, i32) {
    %c0_i32 = arith.constant 0 : i32
    %c0_i32_0 = arith.constant 0 : i32
    %c0_i32_1 = arith.constant 0 : i32
    %c0_i32_2 = arith.constant 0 : i32
    return %c0_i32, %c0_i32_0, %c0_i32_1 : i32, i32, i32
  }
  func.func @transform_12(%arg0: i32) -> (i32, i32) {
    %c0_i32 = arith.constant 0 : i32
    %c0_i32_0 = arith.constant 0 : i32
    %c0_i32_1 = arith.constant 0 : i32
    return %c0_i32, %c0_i32_0 : i32, i32
  }
  func.func @transform_13(%arg0: i32) -> (i32, i32) {
    %c0_i32 = arith.constant 0 : i32
    %c0_i32_0 = arith.constant 0 : i32
    %c0_i32_1 = arith.constant 0 : i32
    return %c0_i32, %c0_i32_0 : i32, i32
  }
  func.func @transform_14(%arg0: i32) -> (i32, i32) {
    %c0_i32 = arith.constant 0 : i32
    %c0_i32_0 = arith.constant 0 : i32
    %c0_i32_1 = arith.constant 0 : i32
    return %c0_i32, %c0_i32_0 : i32, i32
  }
  func.func @transform_15(%arg0: i32) -> (i32, i32, i32) {
    %c0_i32 = arith.constant 0 : i32
    %c0_i32_0 = arith.constant 0 : i32
    %c0_i32_1 = arith.constant 0 : i32
    %c0_i32_2 = arith.constant 0 : i32
    return %c0_i32, %c0_i32_0, %c0_i32_1 : i32, i32, i32
  }
  func.func @transform_16(%arg0: i32) -> (i32, i32, i32) {
    %c0_i32 = arith.constant 0 : i32
    %c0_i32_0 = arith.constant 0 : i32
    %c0_i32_1 = arith.constant 0 : i32
    %c0_i32_2 = arith.constant 0 : i32
    return %c0_i32, %c0_i32_0, %c0_i32_1 : i32, i32, i32
  }
  func.func @transform_17(%arg0: i32) -> (i32, i32) {
    %c0_i32 = arith.constant 0 : i32
    %c0_i32_0 = arith.constant 0 : i32
    %c0_i32_1 = arith.constant 0 : i32
    return %c0_i32, %c0_i32_0 : i32, i32
  }
  func.func @transform_18(%arg0: i32) -> (i32, i32) {
    %c0_i32 = arith.constant 0 : i32
    %c0_i32_0 = arith.constant 0 : i32
    %c0_i32_1 = arith.constant 0 : i32
    return %c0_i32, %c0_i32_0 : i32, i32
  }
  func.func @transform_19(%arg0: i32) -> (i32, i32) {
    %c0_i32 = arith.constant 0 : i32
    %c0_i32_0 = arith.constant 0 : i32
    %c0_i32_1 = arith.constant 0 : i32
    return %c0_i32, %c0_i32_0 : i32, i32
  }
  func.func @transform_20(%arg0: i32) -> (i32, i32, i32) {
    %c0_i32 = arith.constant 0 : i32
    %c0_i32_0 = arith.constant 0 : i32
    %c0_i32_1 = arith.constant 0 : i32
    %c0_i32_2 = arith.constant 0 : i32
    return %c0_i32, %c0_i32_0, %c0_i32_1 : i32, i32, i32
  }
  func.func @transform_21(%arg0: i32) -> (i32, i32, i32) {
    %c0_i32 = arith.constant 0 : i32
    %c0_i32_0 = arith.constant 0 : i32
    %c0_i32_1 = arith.constant 0 : i32
    %c0_i32_2 = arith.constant 0 : i32
    return %c0_i32, %c0_i32_0, %c0_i32_1 : i32, i32, i32
  }
  func.func @transform_22(%arg0: i32) -> (i32, i32) {
    %c0_i32 = arith.constant 0 : i32
    %c0_i32_0 = arith.constant 0 : i32
    %c0_i32_1 = arith.constant 0 : i32
    return %c0_i32, %c0_i32_0 : i32, i32
  }
  func.func @transform_23(%arg0: i32) -> (i32, i32) {
    %c0_i32 = arith.constant 0 : i32
    %c0_i32_0 = arith.constant 0 : i32
    %c0_i32_1 = arith.constant 0 : i32
    return %c0_i32, %c0_i32_0 : i32, i32
  }
  func.func @transform_24(%arg0: i32) -> (i32, i32) {
    %c0_i32 = arith.constant 0 : i32
    %c0_i32_0 = arith.constant 0 : i32
    %c0_i32_1 = arith.constant 0 : i32
    return %c0_i32, %c0_i32_0 : i32, i32
  }
  func.func @transform_25(%arg0: i32) -> (i32, i32) {
    %c0_i32 = arith.constant 0 : i32
    %c0_i32_0 = arith.constant 0 : i32
    %c0_i32_1 = arith.constant 0 : i32
    return %c0_i32, %c0_i32_0 : i32, i32
  }
  func.func @transform_26(%arg0: i32) -> (i32, i32) {
    %c0_i32 = arith.constant 0 : i32
    %c0_i32_0 = arith.constant 0 : i32
    %c0_i32_1 = arith.constant 0 : i32
    return %c0_i32, %c0_i32_0 : i32, i32
  }
  func.func @transform_27(%arg0: i32) -> (i32, i32) {
    %c0_i32 = arith.constant 0 : i32
    %c0_i32_0 = arith.constant 0 : i32
    %c0_i32_1 = arith.constant 0 : i32
    return %c0_i32, %c0_i32_0 : i32, i32
  }
  func.func @transform_28(%arg0: i32) -> (i32, i32) {
    %c0_i32 = arith.constant 0 : i32
    %c0_i32_0 = arith.constant 0 : i32
    %c0_i32_1 = arith.constant 0 : i32
    return %c0_i32, %c0_i32_0 : i32, i32
  }
}

</mosaic_0001>

<bundles_post_ra>
// kernel: modality_encoder_forward.1
= control target key start
LH: loop header
LB: loop body
LE: loop exit
PB: predicated region body
PF: predicated region fallthrough
CT: control target
= control target key end

     0   :  { %vm173_vm0 = vcmask 293888   ;;  %vm6853_vm1 = vcmask 1041408   ;;  %vm6854_vm2 = vcmask 130048   ;;  %s6817_s1 = inlined_call_operand.vmem [shape: bf16[36,16], index: 1, kind: input, shape index: {}]   ;;  %s6818_s0 = inlined_call_operand.vmem [shape: bf16[128,36], index: 0, kind: input, shape index: {}]   ;;  %s6819_s2 = inlined_call_operand.vmem [shape: f32[1,16], index: 2, kind: input, shape index: {}]   ;;  %s6820_s5 = inlined_call_operand.vmem [shape: bf16[9,32,128], index: 5, kind: input, shape index: {}]   ;;  %s6821_s6 = inlined_call_operand.vmem [shape: bf16[9,16,32], index: 6, kind: input, shape index: {}]   ;;  %s6822_s3 = inlined_call_operand.vmem [shape: f32[1,16], index: 3, kind: input, shape index: {}]   ;;  %s6823_s4 = inlined_call_operand.vmem [shape: f32[1,16], index: 4, kind: input, shape index: {}]   ;;  %s6824_s7 = inlined_call_operand.vmem [shape: f32[1,32], index: 7, kind: input, shape index: {}]   ;;  %s6825_s8 = inlined_call_operand.vmem [shape: f32[1,32], index: 8, kind: input, shape index: {}]   ;;  %s6826_s9 = inlined_call_operand.vmem [shape: f32[1,32], index: 9, kind: input, shape index: {}]   ;;  %s6827_s10 = inlined_call_operand.vmem [shape: bf16[9,8,32], index: 10, kind: input, shape index: {}]   ;;  %s6828_s11 = inlined_call_operand.vmem [shape: bf16[9,32,64], index: 11, kind: input, shape index: {}]   ;;  %s6829_s16 = inlined_call_operand.vmem [shape: bf16[9,64,128], index: 16, kind: input, shape index: {}]   ;;  %s6830_s12 = inlined_call_operand.vmem [shape: f32[1,64], index: 12, kind: input, shape index: {}]   ;;  %s6831_s13 = inlined_call_operand.vmem [shape: f32[1,64], index: 13, kind: input, shape index: {}]   ;;  %s6832_s14 = inlined_call_operand.vmem [shape: f32[1,64], index: 14, kind: input, shape index: {}]   ;;  %s6833_s15 = inlined_call_operand.vmem [shape: bf16[9,2,8], index: 15, kind: input, shape index: {}]   ;;  %s6834_s21 = inlined_call_operand.vmem [shape: bf16[1,128,32], index: 21, kind: input, shape index: {}]   ;;  %s6835_s17 = inlined_call_operand.vmem [shape: f32[1,128], index: 17, kind: input, shape index: {}]   ;;  %s6836_s18 = inlined_call_operand.vmem [shape: f32[1,128], index: 18, kind: input, shape index: {}]   ;;  %s6837_s19 = inlined_call_operand.vmem [shape: f32[1,128], index: 19, kind: input, shape index: {}]   ;;  %s6838_s20 = inlined_call_operand.vmem [shape: bf16[1,2,2], index: 20, kind: input, shape index: {}]   ;;  %s6839_s25 = inlined_call_operand.vmem [shape: f32[32,16], index: 25, kind: input, shape index: {}]   ;;  %s6840_s22 = inlined_call_operand.vmem [shape: f32[1,32], index: 22, kind: input, shape index: {}]   ;;  %s6841_s23 = inlined_call_operand.vmem [shape: f32[1,32], index: 23, kind: input, shape index: {}]   ;;  %s6842_s24 = inlined_call_operand.vmem [shape: f32[1,32], index: 24, kind: input, shape index: {}]   ;;  %s6843_s26 = inlined_call_operand.vmem [shape: f32[1,16], index: 26, kind: input, shape index: {}]   ;;  %s6844_s27 = inlined_call_operand.vmem [shape: f32[2,8], index: 27, kind: input, shape index: {}]   ;;  %s6845_s28 = inlined_call_operand.vmem [shape: f32[2,24], index: 28, kind: output, shape index: {}]  }
   0x1   :  { %6855 = sst [smem:[#allocation2_spill]] %s6817_s1  ;;  %s5637_s1 = smov 8  }
   0x2   :  { %6856 = sst [smem:[#allocation3_spill]] %s6818_s0 }
   0x3   :  { %6857 = sst [smem:[#allocation4_spill]] %s6819_s2  ;;  %s6869_s29 = sld [smem:[#allocation3_spill]] }
   0x4   :  { %6858 = sst [smem:[#allocation5_spill]] %s6820_s5 }
   0x5   :  { %6859 = sst [smem:[#allocation6_spill]] %s6821_s6 }
   0x6   :  { %6860 = sst [smem:[#allocation7_spill]] %s6822_s3 }
   0x7   :  { %6861 = sst [smem:[#allocation8_spill]] %s6823_s4  ;;  %s6872_s4 = sld [smem:[#allocation7_spill]] }
   0x8   :  { %6862 = sst [smem:[#allocation9_spill]] %s6824_s7  ;;  %s6873_s0 = sld [smem:[#allocation8_spill]] }
   0x9   :  { %6863 = sst [smem:[#allocation10_spill]] %s6825_s8  ;;  %v5524_v3 = vld [vmem:[%s6869_s29] sm:$0xff]   ;;  %v5525_v5 = vld [vmem:[%s6869_s29 + $0x8] sm:$0xff]   ;;  %v5526_v6 = vld [vmem:[%s6869_s29 + $0x10] sm:$0xff]   ;;  %s6871_s8 = sld [smem:[#allocation5_spill]] }
   0xa   :  { %6864 = sst [smem:[#allocation11_spill]] %s6826_s9  ;;  %s6868_s9 = sld [smem:[#allocation2_spill]]  ;;  %4884 = vmatprep.mubr.msk.bf16.mxu0 %vm173_vm0, %v5524_v3  ;;  %v5527_v7 = vld [vmem:[%s6869_s29 + $0x18] sm:$0xff]   ;;  %v5528_v8 = vld [vmem:[%s6869_s29 + $0x20] sm:$0xff]   ;;  %v5529_v9 = vld [vmem:[%s6869_s29 + $0x28] sm:$0xff]  }
   0xb   :  { %6865 = sst [smem:[#allocation12_spill]] %s6827_s10  ;;  %v5530_v10 = vld [vmem:[%s6869_s29 + $0x30] sm:$0xff]   ;;  %v5531_v11 = vld [vmem:[%s6869_s29 + $0x38] sm:$0xff]   ;;  %s6874_s7 = sld [smem:[#allocation6_spill]] }
   0xc   :  { %6866 = sst [smem:[#allocation13_spill]] %s6828_s11  ;;  %s6893_s10 = sld [smem:[#allocation9_spill]] }
   0xd   :  { %6867 = sst [smem:[#allocation14_spill]] %s6829_s16  ;;  %s6870_s16 = sld [smem:[#allocation4_spill]] }
   0xe   :  { %s6894_s2 = sld [smem:[#allocation10_spill]]  ;;  %s6895_s6 = sld [smem:[#allocation11_spill]] }
   0xf   :  { %v5532_v13 = vld [vmem:[%s6871_s8] sm:$0xff]   ;;  %v5533_v15 = vld [vmem:[%s6871_s8 + $0x10] sm:$0xff]   ;;  %s6896_s29 = sld [smem:[#allocation12_spill]] }
  0x10   :  { %v5521_v0 = vld [vmem:[%s6868_s9] sm:$0xff]   ;;  %v5522_v1 = vld [vmem:[%s6868_s9 + $0x8] sm:$0xff]   ;;  %v5523_v2 = vld [vmem:[%s6868_s9 + $0x10] ss:$0 sps:$4 sm:$0x33]   ;;  %4916 = vmatprep.mubr.bf16.mxu1 %v5532_v13 }
  0x11   :  { %4878 = vmatprep.subr.bf16.mxu0 %v5521_v0  ;;  %v200_v4 = vsel %vm6853_vm1, %v5523_v2, 0 }
  0x12   :  { %4879 = vmatpush3.bf16.msra.mxu0 %v5521_v0 }
  0x13   :  { %4880 = vmatprep.subr.bf16.mxu0 %v5522_v1  ;;  %v5829_v12 = vld [vmem:[%s6870_s16] ss:$0 sm:$0xff] }
  0x16   :  { %4881 = vmatpush3.bf16.msra.mxu0 %v5522_v1 }
  0x17   :  { %5515 = vmatprep.subr.msk.bf16.mxu0 %vm6853_vm1, %v5523_v2 }
  0x1a   :  { %4883 = vmatpush3.bf16.msra.mxu0 %v200_v4 }
  0x1d   :  { %4885 = vmatmul.mubr.msk.bf16.vlgmr.msra.gmra.mrb[0].mxu0 %vm173_vm0, %v5525_v5 }
  0x1e   :  { %4888 = vmatprep.mubr.msk.bf16.mxu0 %vm173_vm0, %v5526_v6 }
  0x25   :  { %4889 = vmatmul.mubr.msk.bf16.gmra.mrb[4].mxu0 %vm173_vm0, %v5527_v7 }
  0x26   :  { %4892 = vmatprep.mubr.msk.bf16.mxu0 %vm173_vm0, %v5528_v8 }
  0x2d   :  { %4893 = vmatmul.mubr.msk.bf16.gmra.mrb[8].mxu0 %vm173_vm0, %v5529_v9 }
  0x2e   :  { %4896 = vmatprep.mubr.msk.bf16.mxu0 %vm173_vm0, %v5530_v10 }
  0x35   :  { %4897 = vmatmul.mubr.msk.bf16.gmra.mrb[12].mxu0 %vm173_vm0, %v5531_v11 }
  0x36   :  { %4936 = vmatprep.mubr.bf16.mxu0 %v5533_v15 }
  0xf0   :  { %v4886_v14 = vpop.f32.mrb[0].mxu0 }
  0xf1   :  { %v5838_v16 = vadd.f32 %v4886_v14, %v5829_v12  ;;  %v236_v17 = vpop.f32.mrb[1].mxu0 }
  0xf2   :  { %v5841_v18 = vadd.f32 %v5829_v12, %v236_v17  ;;  %v4887_v19 = vpop.f32.mrb[2].mxu0 }
  0xf3   :  { %v239_v20 = vpop.f32.mrb[3].mxu0  ;;  %v5846_v22 = vadd.f32 %v4887_v19, %v5829_v12  ;;  %v342_v24 = vmul.f32 %v5838_v16, %v5838_v16  ;;  %v305_v28 = vsel %vm6854_vm2, %v5838_v16, 0.0 }
  0xf4   :  { %v340_v21 = vmul.f32 %v5841_v18, %v5841_v18  ;;  %v5849_v23 = vadd.f32 %v5829_v12, %v239_v20  ;;  %v302_v25 = vsel %vm6854_vm2, %v5841_v18, 0.0 }
  0xf5   :  { %v343_v31 = vmul.f32 %v5846_v22, %v5846_v22  ;;  %v359_v34 = vsel %vm6854_vm2, %v342_v24, 0.0  ;;  %v307_v38 = vsel %vm6854_vm2, %v5846_v22, 0.0 }
  0xf6   :  { %v303_v26 = vsel %vm6854_vm2, %v5849_v23, 0.0  ;;  %v341_v27 = vmul.f32 %v5849_v23, %v5849_v23  ;;  %v356_v29 = vsel %vm6854_vm2, %v340_v21, 0.0 }
  0xf7   :  { %v304_v30 = vadd.f32 %v303_v26, %v302_v25  ;;  %v361_v45 = vsel %vm6854_vm2, %v343_v31, 0.0 }
  0xf8   :  { %v357_v32 = vsel %vm6854_vm2, %v341_v27, 0.0  ;;  %v4890_v33 = vpop.f32.mrb[4].mxu0 }
  0xf9   :  { %v306_v35 = vadd.f32 %v305_v28, %v304_v30  ;;  %v358_v36 = vadd.f32 %v357_v32, %v356_v29  ;;  %v252_v37 = vpop.f32.mrb[5].mxu0  ;;  %v5872_v42 = vadd.f32 %v4890_v33, %v5829_v12 }
  0xfa   :  { %v5869_v39 = vadd.f32 %v5829_v12, %v252_v37  ;;  %v4891_v40 = vpop.f32.mrb[6].mxu0 }
  0xfb   :  { %v360_v41 = vadd.f32 %v359_v34, %v358_v36  ;;  %v308_v43 = vadd.f32 %v307_v38, %v306_v35  ;;  %v255_v44 = vpop.f32.mrb[7].mxu0  ;;  %v5883_v51 = vadd.f32 %v4891_v40, %v5829_v12  ;;  %v346_v54 = vmul.f32 %v5872_v42, %v5872_v42 }
  0xfc   :  { %v309_v46 = vsel %vm6854_vm2, %v5869_v39, 0.0  ;;  %v344_v47 = vmul.f32 %v5869_v39, %v5869_v39  ;;  %v5880_v48 = vadd.f32 %v5829_v12, %v255_v44  ;;  %v313_v58 = vsel %vm6854_vm2, %v5872_v42, 0.0 }
  0xfd   :  { %v310_v49 = vadd.f32 %v309_v46, %v308_v43  ;;  %v362_v50 = vadd.f32 %v361_v45, %v360_v41  ;;  %v347_v60 = vmul.f32 %v5883_v51, %v5883_v51  ;;  %v315_v0 = vsel %vm6854_vm2, %v5883_v51, 0.0 }
  0xfe   :  { %v363_v52 = vsel %vm6854_vm2, %v344_v47, 0.0  ;;  %v311_v53 = vsel %vm6854_vm2, %v5880_v48, 0.0  ;;  %v345_v57 = vmul.f32 %v5880_v48, %v5880_v48  ;;  %v367_v4 = vsel %vm6854_vm2, %v346_v54, 0.0 }
  0xff   :  { %v364_v55 = vadd.f32 %v363_v52, %v362_v50  ;;  %v312_v56 = vadd.f32 %v311_v53, %v310_v49  ;;  %v369_v13 = vsel %vm6854_vm2, %v347_v60, 0.0 }
 0x100   :  { %v4894_v59 = vpop.f32.mrb[8].mxu0  ;;  %v365_v62 = vsel %vm6854_vm2, %v345_v57, 0.0 }
 0x101   :  { %v314_v61 = vadd.f32 %v313_v58, %v312_v56  ;;  %v268_v63 = vpop.f32.mrb[9].mxu0  ;;  %v366_v1 = vadd.f32 %v365_v62, %v364_v55  ;;  %v5904_v5 = vadd.f32 %v4894_v59, %v5829_v12 }
 0x102   :  { %v5900_v2 = vadd.f32 %v5829_v12, %v268_v63  ;;  %v4895_v3 = vpop.f32.mrb[10].mxu0 }
 0x103   :  { %v316_v6 = vadd.f32 %v315_v0, %v314_v61  ;;  %v271_v7 = vpop.f32.mrb[11].mxu0  ;;  %v368_v8 = vadd.f32 %v367_v4, %v366_v1  ;;  %v5915_v15 = vadd.f32 %v4895_v3, %v5829_v12  ;;  %v321_v24 = vsel %vm6854_vm2, %v5904_v5, 0.0 }
 0x104   :  { %v317_v9 = vsel %vm6854_vm2, %v5900_v2, 0.0  ;;  %v348_v10 = vmul.f32 %v5900_v2, %v5900_v2  ;;  %v5911_v11 = vadd.f32 %v5829_v12, %v271_v7  ;;  %v350_v25 = vmul.f32 %v5904_v5, %v5904_v5 }
 0x105   :  { %v318_v14 = vadd.f32 %v317_v9, %v316_v6  ;;  %v370_v17 = vadd.f32 %v369_v13, %v368_v8  ;;  %v351_v30 = vmul.f32 %v5915_v15, %v5915_v15  ;;  %v323_v33 = vsel %vm6854_vm2, %v5915_v15, 0.0 }
 0x106   :  { %v371_v19 = vsel %vm6854_vm2, %v348_v10, 0.0  ;;  %v319_v20 = vsel %vm6854_vm2, %v5911_v11, 0.0  ;;  %v349_v21 = vmul.f32 %v5911_v11, %v5911_v11  ;;  %v375_v37 = vsel %vm6854_vm2, %v350_v25, 0.0 }
 0x107   :  { %v320_v26 = vadd.f32 %v319_v20, %v318_v14  ;;  %v372_v27 = vadd.f32 %v371_v19, %v370_v17  ;;  %v377_v47 = vsel %vm6854_vm2, %v351_v30, 0.0 }
 0x108   :  { %v373_v28 = vsel %vm6854_vm2, %v349_v21, 0.0  ;;  %v4898_v29 = vpop.f32.mrb[12].mxu0 }
 0x109   :  { %v322_v31 = vadd.f32 %v321_v24, %v320_v26  ;;  %v284_v32 = vpop.f32.mrb[13].mxu0  ;;  %v374_v34 = vadd.f32 %v373_v28, %v372_v27  ;;  %v5936_v38 = vadd.f32 %v4898_v29, %v5829_v12 }
 0x10a   :  { %v5932_v35 = vadd.f32 %v5829_v12, %v284_v32  ;;  %v4899_v36 = vpop.f32.mrb[14].mxu0 }
 0x10b   :  { %v324_v40 = vadd.f32 %v323_v33, %v322_v31  ;;  %v287_v41 = vpop.f32.mrb[15].mxu0  ;;  %v376_v43 = vadd.f32 %v375_v37, %v374_v34  ;;  %v5947_v50 = vadd.f32 %v4899_v36, %v5829_v12  ;;  %v354_v56 = vmul.f32 %v5936_v38, %v5936_v38  ;;  %v299_v33 = vld [vmem:[%s6872_s4] sm:$0x1] }
 0x10c   :  { %v325_v44 = vsel %vm6854_vm2, %v5932_v35, 0.0  ;;  %v352_v45 = vmul.f32 %v5932_v35, %v5932_v35  ;;  %v5943_v46 = vadd.f32 %v5829_v12, %v287_v41  ;;  %v329_v58 = vsel %vm6854_vm2, %v5936_v38, 0.0 }
 0x10d   :  { %v326_v49 = vadd.f32 %v325_v44, %v324_v40  ;;  %v378_v52 = vadd.f32 %v377_v47, %v376_v43  ;;  %v355_v60 = vmul.f32 %v5947_v50, %v5947_v50  ;;  %v331_v62 = vsel %vm6854_vm2, %v5947_v50, 0.0  ;;  %v300_v40 = vld [vmem:[%s6873_s0] sm:$0x1] }
 0x10e   :  { %v379_v53 = vsel %vm6854_vm2, %v352_v45, 0.0  ;;  %v327_v54 = vsel %vm6854_vm2, %v5943_v46, 0.0  ;;  %v353_v55 = vmul.f32 %v5943_v46, %v5943_v46  ;;  %v383_v0 = vsel %vm6854_vm2, %v354_v56, 0.0 }
 0x10f   :  { %v328_v57 = vadd.f32 %v327_v54, %v326_v49  ;;  %v380_v59 = vadd.f32 %v379_v53, %v378_v52  ;;  %v385_v4 = vsel %vm6854_vm2, %v355_v60, 0.0  ;;  %v402_v31 = vlaneseq }
 0x110   :  { %v381_v12 = vsel %vm6854_vm2, %v353_v55, 0.0 }
 0x111   :  { %v330_v61 = vadd.f32 %v329_v58, %v328_v57  ;;  %v382_v63 = vadd.f32 %v381_v12, %v380_v59  ;;  %v403_v32 = vshrl.u32 %v402_v31, 7 }
 0x113   :  { %v332_v1 = vadd.f32 %v331_v62, %v330_v61  ;;  %v384_v3 = vadd.f32 %v383_v0, %v382_v63  ;;  %v5968_v34 = vsub.s32 0, %v403_v32 }
 0x115   :  { %v333_v6 = vrot.slane %v332_v1, 4  ;;  %v386_v7 = vadd.f32 %v385_v4, %v384_v3 }
 0x117   :  { %v334_v8 = vadd.f32 %v333_v6, %v332_v1  ;;  %v387_v9 = vrot.slane %v386_v7, 4 }
 0x119   :  { %v335_v10 = vrot.slane %v334_v8, 2  ;;  %v388_v13 = vadd.f32 %v387_v9, %v386_v7 }
 0x11b   :  { %v336_v14 = vadd.f32 %v335_v10, %v334_v8  ;;  %v389_v17 = vrot.slane %v388_v13, 2 }
 0x11d   :  { %v337_v19 = vrot.slane %v336_v14, 1  ;;  %v390_v20 = vadd.f32 %v389_v17, %v388_v13 }
 0x11f   :  { %v338_v21 = vadd.f32 %v337_v19, %v336_v14  ;;  %v391_v24 = vrot.slane %v390_v20, 1 }
 0x121   :  { %v339_v25 = vmul.f32 0.0078125, %v338_v21  ;;  %v392_v26 = vadd.f32 %v391_v24, %v390_v20 }
 0x123   :  { %v394_v27 = vmul.f32 %v339_v25, %v339_v25  ;;  %v393_v28 = vmul.f32 0.0078125, %v392_v26 }
 0x125   :  { %v395_v29 = vsub.f32 %v393_v28, %v394_v27 }
 0x127   :  { %v396_v30 = vadd.f32 1e-05, %v395_v29 }
 0x129   :  { %5621 = vrsqrt.f32 %v396_v30 }
 0x133   :  { %v5622_v36 = vpop.eup %5621 }
 0x134   :  { %v398_v37 = vmul.f32 %v5622_v36, %v299_v33 }
 0x136   :  { %v399_v41 = vmul.f32 %v398_v37, %v339_v25  ;;  %v405_v43 = vrot.slane %v398_v37, %v5968_v34 }
 0x138   :  { %v400_v44 = vsub.f32 %v300_v40, %v399_v41  ;;  %v407_v45 = vmul.f32 %v405_v43, %v5841_v18  ;;  %v408_v47 = vmul.f32 %v405_v43, %v5849_v23  ;;  %v411_v49 = vmul.f32 %v405_v43, %v5869_v39 }
 0x139   :  { %v412_v52 = vmul.f32 %v405_v43, %v5880_v48  ;;  %v413_v53 = vmul.f32 %v405_v43, %v5872_v42  ;;  %v414_v54 = vmul.f32 %v405_v43, %v5883_v51  ;;  %v415_v55 = vmul.f32 %v405_v43, %v5900_v2 }
 0x13a   :  { %v416_v56 = vmul.f32 %v405_v43, %v5911_v11  ;;  %v417_v57 = vmul.f32 %v405_v43, %v5904_v5  ;;  %v418_v58 = vmul.f32 %v405_v43, %v5915_v15  ;;  %v419_v18 = vmul.f32 %v405_v43, %v5932_v35 }
 0x13b   :  { %v420_v23 = vmul.f32 %v405_v43, %v5943_v46  ;;  %v421_v39 = vmul.f32 %v405_v43, %v5936_v38  ;;  %v409_v48 = vmul.f32 %v405_v43, %v5838_v16  ;;  %v410_v42 = vmul.f32 %v405_v43, %v5846_v22 }
 0x13c   :  { %v422_v51 = vmul.f32 %v405_v43, %v5947_v50  ;;  %v427_v2 = vrot.slane %v400_v44, %v5968_v34 }
 0x13e   :  { %v429_v59 = vadd.f32 %v427_v2, %v407_v45  ;;  %v430_v11 = vadd.f32 %v427_v2, %v408_v47  ;;  %v431_v12 = vadd.f32 %v427_v2, %v409_v48  ;;  %v432_v5 = vadd.f32 %v427_v2, %v410_v42  ;;  %v5537_v48 = vld [vmem:[%s6874_s7] sm:$0xff]   ;;  %v5538_v42 = vld [vmem:[%s6874_s7 + $0x10] sm:$0xff]  }
 0x13f   :  { %v433_v60 = vadd.f32 %v427_v2, %v411_v49  ;;  %v434_v15 = vadd.f32 %v427_v2, %v412_v52  ;;  %v435_v61 = vadd.f32 %v427_v2, %v413_v53  ;;  %v436_v35 = vadd.f32 %v427_v2, %v414_v54 }
 0x140   :  { %v437_v62 = vadd.f32 %v427_v2, %v415_v55  ;;  %v438_v46 = vadd.f32 %v427_v2, %v416_v56  ;;  %v439_v63 = vadd.f32 %v427_v2, %v417_v57  ;;  %v440_v38 = vadd.f32 %v427_v2, %v418_v58 }
 0x141   :  { %v441_v0 = vadd.f32 %v427_v2, %v419_v18  ;;  %v442_v16 = vadd.f32 %v427_v2, %v420_v23  ;;  %v443_v1 = vadd.f32 %v427_v2, %v421_v39  ;;  %v444_v22 = vadd.f32 %v427_v2, %v422_v51  ;;  %v5536_v18 = vld [vmem:[%s6874_s7 + $0x8] sm:$0xff]   ;;  %v5535_v39 = vld [vmem:[%s6871_s8 + $0x18] sm:$0xff]  }
 0x142   :  { %vm445_vm3 = vcmp.ge.f32.partialorder %v429_v59, 0.0  ;;  %vm446_vm4 = vcmp.ge.f32.partialorder %v430_v11, 0.0  ;;  %vm447_vm5 = vcmp.ge.f32.partialorder %v431_v12, 0.0  ;;  %vm448_vm6 = vcmp.ge.f32.partialorder %v432_v5, 0.0  ;;  %v5534_v23 = vld [vmem:[%s6871_s8 + $0x8] sm:$0xff]  }
 0x143   :  { %vm449_vm7 = vcmp.ge.f32.partialorder %v433_v60, 0.0  ;;  %vm450_vm8 = vcmp.ge.f32.partialorder %v434_v15, 0.0  ;;  %vm451_vm9 = vcmp.ge.f32.partialorder %v435_v61, 0.0  ;;  %vm452_vm10 = vcmp.ge.f32.partialorder %v436_v35, 0.0 }
 0x144   :  { %vm453_vm11 = vcmp.ge.f32.partialorder %v437_v62, 0.0  ;;  %vm454_vm12 = vcmp.ge.f32.partialorder %v438_v46, 0.0  ;;  %vm455_vm13 = vcmp.ge.f32.partialorder %v439_v63, 0.0  ;;  %vm456_vm14 = vcmp.ge.f32.partialorder %v440_v38, 0.0 }
 0x145   :  { %vm457_vm15 = vcmp.ge.f32.partialorder %v441_v0, 0.0  ;;  %vm458_vm0 = vcmp.ge.f32.partialorder %v442_v16, 0.0  ;;  %vm459_vm1 = vcmp.ge.f32.partialorder %v443_v1, 0.0  ;;  %vm460_vm2 = vcmp.ge.f32.partialorder %v444_v22, 0.0 }
 0x146   :  { %v461_v50 = vmul.f32 0.03, %v429_v59  ;;  %v462_v3 = vmul.f32 0.03, %v430_v11  ;;  %v463_v4 = vmul.f32 0.03, %v431_v12 }
 0x147   :  { %v464_v6 = vmul.f32 0.03, %v432_v5  ;;  %v465_v7 = vmul.f32 0.03, %v433_v60  ;;  %v466_v8 = vmul.f32 0.03, %v434_v15 }
 0x148   :  { %v467_v9 = vmul.f32 0.03, %v435_v61  ;;  %v468_v10 = vmul.f32 0.03, %v436_v35  ;;  %v469_v13 = vmul.f32 0.03, %v437_v62  ;;  %v477_v14 = vsel %vm445_vm3, %v429_v59, %v461_v50 }
 0x149   :  { %v470_v17 = vmul.f32 0.03, %v438_v46  ;;  %v471_v19 = vmul.f32 0.03, %v439_v63  ;;  %v472_v20 = vmul.f32 0.03, %v440_v38  ;;  %v478_v21 = vsel %vm446_vm4, %v430_v11, %v462_v3 }
 0x14a   :  { %v473_v24 = vmul.f32 0.03, %v441_v0  ;;  %v474_v25 = vmul.f32 0.03, %v442_v16  ;;  %v475_v26 = vmul.f32 0.03, %v443_v1  ;;  %v479_v27 = vsel %vm447_vm5, %v431_v12, %v463_v4 }
 0x14b   :  { %v476_v28 = vmul.f32 0.03, %v444_v22  ;;  %v480_v29 = vsel %vm448_vm6, %v432_v5, %v464_v6  ;;  %v481_v30 = vsel %vm449_vm7, %v433_v60, %v465_v7  ;;  %v482_v31 = vsel %vm450_vm8, %v434_v15, %v466_v8 }
 0x14c   :  { %v483_v32 = vsel %vm451_vm9, %v435_v61, %v467_v9  ;;  %v484_v33 = vsel %vm452_vm10, %v436_v35, %v468_v10  ;;  %v485_v36 = vsel %vm453_vm11, %v437_v62, %v469_v13  ;;  %v486_v37 = vsel %vm454_vm12, %v438_v46, %v470_v17  ;;  %v5545_v17 = vld [vmem:[%s6871_s8 + $0x30] sm:$0xff]  }
 0x14d   :  { %v487_v40 = vsel %vm455_vm13, %v439_v63, %v471_v19  ;;  %v488_v41 = vsel %vm456_vm14, %v440_v38, %v472_v20  ;;  %v489_v43 = vsel %vm457_vm15, %v441_v0, %v473_v24  ;;  %v490_v44 = vsel %vm458_vm0, %v442_v16, %v474_v25  ;;  %v5539_v63 = vld [vmem:[%s6871_s8 + $0x20] sm:$0xff]   ;;  %v5540_v38 = vld [vmem:[%s6871_s8 + $0x28] sm:$0xff]   ;;  %v5546_v19 = vld [vmem:[%s6871_s8 + $0x38] sm:$0xff]  }
 0x14e   :  { %v491_v45 = vsel %vm459_vm1, %v443_v1, %v475_v26  ;;  %v492_v47 = vsel %vm460_vm2, %v444_v22, %v476_v28  ;;  %v6007_v49 = vpack.c.bf16 %v478_v21, %v477_v14  ;;  %v6009_v52 = vpack.c.bf16 %v480_v29, %v479_v27  ;;  %v5541_v0 = vld [vmem:[%s6871_s8 + $0x40] sm:$0xff]   ;;  %v5542_v16 = vld [vmem:[%s6871_s8 + $0x48] sm:$0xff]   ;;  %v5547_v20 = vld [vmem:[%s6874_s7 + $0x18] sm:$0xff]  }
 0x14f   :  { %v6011_v53 = vpack.c.bf16 %v482_v31, %v481_v30  ;;  %v6013_v54 = vpack.c.bf16 %v484_v33, %v483_v32  ;;  %v6015_v55 = vpack.c.bf16 %v486_v37, %v485_v36  ;;  %v6017_v56 = vpack.c.bf16 %v488_v41, %v487_v40  ;;  %v5543_v1 = vld [vmem:[%s6871_s8 + $0x60] sm:$0xff]   ;;  %v5544_v22 = vld [vmem:[%s6871_s8 + $0x68] sm:$0xff]   ;;  %v5551_v30 = vld [vmem:[%s6871_s8 + $0x70] sm:$0xff]  }
 0x150   :  { %v6019_v57 = vpack.c.bf16 %v490_v44, %v489_v43  ;;  %v6021_v58 = vpack.c.bf16 %v492_v47, %v491_v45  ;;  %4900 = vmatprep.subr.bf16.mxu1 %v6007_v49  ;;  %4920 = vmatprep.subr.bf16.mxu0 %v6007_v49  ;;  %vm6875_vm1 = vcmask 130048   ;;  %v5548_v21 = vld [vmem:[%s6874_s7 + $0x20] sm:$0xff]   ;;  %v5552_v31 = vld [vmem:[%s6871_s8 + $0x78] sm:$0xff]  }
 0x151   :  { %4901 = vmatpush3.bf16.msra.mxu1 %v6007_v49  ;;  %4921 = vmatpush3.bf16.msra.mxu0 %v6007_v49  ;;  %vm6876_vm2 = vmmov %vm6875_vm1 }
 0x152   :  { %4902 = vmatprep.subr.bf16.mxu1 %v6009_v52  ;;  %4922 = vmatprep.subr.bf16.mxu0 %v6009_v52  ;;  %vm6877_vm3 = vmmov %vm6875_vm1 }
 0x153   :  { %vm6878_vm4 = vmmov %vm6875_vm1 }
 0x154   :  { %vm6879_vm5 = vmmov %vm6875_vm1 }
 0x155   :  { %4903 = vmatpush3.bf16.msra.mxu1 %v6009_v52  ;;  %4923 = vmatpush3.bf16.msra.mxu0 %v6009_v52  ;;  %vm6880_vm6 = vmmov %vm6875_vm1 }
 0x156   :  { %4904 = vmatprep.subr.bf16.mxu1 %v6011_v53  ;;  %4924 = vmatprep.subr.bf16.mxu0 %v6011_v53  ;;  %vm6881_vm7 = vmmov %vm6875_vm1 }
 0x157   :  { %vm6882_vm8 = vmmov %vm6875_vm1 }
 0x158   :  { %vm6883_vm9 = vmmov %vm6875_vm1 }
 0x159   :  { %4905 = vmatpush3.bf16.msra.mxu1 %v6011_v53  ;;  %4925 = vmatpush3.bf16.msra.mxu0 %v6011_v53  ;;  %vm6884_vm10 = vmmov %vm6875_vm1 }
 0x15a   :  { %4906 = vmatprep.subr.bf16.mxu1 %v6013_v54  ;;  %4926 = vmatprep.subr.bf16.mxu0 %v6013_v54  ;;  %vm6885_vm11 = vmmov %vm6875_vm1 }
 0x15b   :  { %vm6886_vm12 = vmmov %vm6875_vm1 }
 0x15c   :  { %vm6887_vm13 = vmmov %vm6875_vm1 }
 0x15d   :  { %4907 = vmatpush3.bf16.msra.mxu1 %v6013_v54  ;;  %4927 = vmatpush3.bf16.msra.mxu0 %v6013_v54  ;;  %vm6888_vm14 = vmmov %vm6875_vm1 }
 0x15e   :  { %4908 = vmatprep.subr.bf16.mxu1 %v6015_v55  ;;  %4928 = vmatprep.subr.bf16.mxu0 %v6015_v55  ;;  %vm6889_vm15 = vmmov %vm6875_vm1 }
 0x15f   :  { %vm6890_vm0 = vmmov %vm6875_vm1 }
 0x161   :  { %4909 = vmatpush3.bf16.msra.mxu1 %v6015_v55  ;;  %4929 = vmatpush3.bf16.msra.mxu0 %v6015_v55 }
 0x162   :  { %4910 = vmatprep.subr.bf16.mxu1 %v6017_v56  ;;  %4930 = vmatprep.subr.bf16.mxu0 %v6017_v56 }
 0x165   :  { %4911 = vmatpush3.bf16.msra.mxu1 %v6017_v56  ;;  %4931 = vmatpush3.bf16.msra.mxu0 %v6017_v56 }
 0x166   :  { %4912 = vmatprep.subr.bf16.mxu1 %v6019_v57  ;;  %4932 = vmatprep.subr.bf16.mxu0 %v6019_v57 }
 0x169   :  { %4913 = vmatpush3.bf16.msra.mxu1 %v6019_v57  ;;  %4933 = vmatpush3.bf16.msra.mxu0 %v6019_v57 }
 0x16a   :  { %4914 = vmatprep.subr.bf16.mxu1 %v6021_v58  ;;  %4934 = vmatprep.subr.bf16.mxu0 %v6021_v58 }
 0x16d   :  { %4915 = vmatpush3.bf16.msra.mxu1 %v6021_v58  ;;  %4935 = vmatpush3.bf16.msra.mxu0 %v6021_v58 }
 0x16e   :  { %4940 = vmatprep.subr.bf16.mxu0 %v5536_v18  ;;  %4946 = vmatprep.subr.bf16.mxu1 %v5537_v48 }
 0x170   :  { %4917 = vmatmul.mubr.bf16.vlgmr.msra.gmra.mrb[0].mxu1 %v5534_v23  ;;  %4937 = vmatmul.mubr.bf16.vlgmr.msra.gmra.mrb[16].mxu0 %v5535_v39  ;;  %v5549_v39 = vld [vmem:[%s6871_s8 + $0x50] sm:$0xff]  }
 0x171   :  { %4941 = vmatpush3.bf16.msra.mxu0 %v5536_v18  ;;  %4947 = vmatpush3.bf16.msra.mxu1 %v5537_v48  ;;  %v5550_v48 = vld [vmem:[%s6871_s8 + $0x58] sm:$0xff]  }
 0x172   :  { %4952 = vmatprep.subr.bf16.mxu0 %v6007_v49  ;;  %4972 = vmatprep.subr.bf16.mxu1 %v5538_v42 }
 0x243   :  { %v4918_v51 = vpop.f32.mrb[0].mxu1  ;;  %v4938_v2 = vpop.f32.mrb[16].mxu0 }
 0x244   :  { %v551_v59 = vpop.f32.mrb[1].mxu1  ;;  %v621_v11 = vpop.f32.mrb[17].mxu0 }
 0x245   :  { %v4919_v12 = vpop.f32.mrb[2].mxu1  ;;  %v4939_v5 = vpop.f32.mrb[18].mxu0 }
 0x246   :  { %v567_v60 = vpack.c.bf16 %v4919_v12, %v4918_v51  ;;  %v637_v15 = vpack.c.bf16 %v4939_v5, %v4938_v2  ;;  %v554_v61 = vpop.f32.mrb[3].mxu1  ;;  %v624_v35 = vpop.f32.mrb[19].mxu0  ;;  %v5554_v51 = vld [vmem:[%s6874_s7 + $0x30] sm:$0xff]  }
 0x247   :  { %v566_v62 = vpack.c.bf16 %v554_v61, %v551_v59  ;;  %v636_v46 = vpack.c.bf16 %v624_v35, %v621_v11 }
 0x249   :  { %4942 = vmatprep.mubr.msk.bf16.mxu0 %vm6875_vm1, %v636_v46  ;;  %4948 = vmatprep.mubr.msk.bf16.mxu1 %vm6876_vm2, %v566_v62  ;;  %vm6891_vm1 = vmmov %vm6890_vm0 }
 0x24a   :  { %4943 = vmatmul.mubr.msk.bf16.vlgmr.msra.gmra.mrb[20].mxu0 %vm6877_vm3, %v637_v15  ;;  %4949 = vmatmul.mubr.msk.bf16.vlgmr.msra.gmra.mrb[4].mxu1 %vm6878_vm4, %v567_v60  ;;  %vm6892_vm2 = vmmov %vm6890_vm0  ;;  %vm5634_vm3 = vmmov 0   ;;  %vm1728_vm4 = vcmask 261120  }
 0x24b   :  { %4953 = vmatpush3.bf16.msra.mxu0 %v6007_v49  ;;  %4973 = vmatpush3.bf16.msra.mxu1 %v5538_v42  ;;  %v5553_v42 = vld [vmem:[%s6874_s7 + $0x28] sm:$0xff]  }
 0x24c   :  { %4954 = vmatprep.subr.bf16.mxu0 %v6009_v52  ;;  %4978 = vmatprep.subr.bf16.mxu1 %v6007_v49 }
 0x24d   :  { %4968 = vmatprep.mubr.bf16.mxu0 %v5539_v63 }
 0x24f   :  { %4955 = vmatpush3.bf16.msra.mxu0 %v6009_v52 }
 0x250   :  { %4956 = vmatprep.subr.bf16.mxu0 %v6011_v53 }
 0x253   :  { %4957 = vmatpush3.bf16.msra.mxu0 %v6011_v53 }
 0x254   :  { %4958 = vmatprep.subr.bf16.mxu0 %v6013_v54 }
 0x257   :  { %4959 = vmatpush3.bf16.msra.mxu0 %v6013_v54 }
 0x258   :  { %4960 = vmatprep.subr.bf16.mxu0 %v6015_v55 }
 0x25b   :  { %4961 = vmatpush3.bf16.msra.mxu0 %v6015_v55 }
 0x25c   :  { %4962 = vmatprep.subr.bf16.mxu0 %v6017_v56 }
 0x25f   :  { %4963 = vmatpush3.bf16.msra.mxu0 %v6017_v56 }
 0x260   :  { %4964 = vmatprep.subr.bf16.mxu0 %v6019_v57 }
 0x263   :  { %4965 = vmatpush3.bf16.msra.mxu0 %v6019_v57 }
 0x264   :  { %4966 = vmatprep.subr.bf16.mxu0 %v6021_v58 }
 0x267   :  { %4967 = vmatpush3.bf16.msra.mxu0 %v6021_v58 }
 0x268   :  { %5004 = vmatprep.subr.bf16.mxu0 %v6007_v49 }
 0x26a   :  { %4969 = vmatmul.mubr.bf16.vlgmr.msra.gmra.mrb[24].mxu0 %v5540_v38  ;;  %v5555_v38 = vld [vmem:[%s6874_s7 + $0x38] sm:$0xff]  }
 0x26b   :  { %5005 = vmatpush3.bf16.msra.mxu0 %v6007_v49  ;;  %5020 = vmatprep.mubr.bf16.mxu0 %v5541_v0  ;;  %v5556_v0 = vld [vmem:[%s6871_s8 + $0x80] sm:$0xff]  }
 0x26c   :  { %5006 = vmatprep.subr.bf16.mxu0 %v6009_v52 }
 0x26f   :  { %5007 = vmatpush3.bf16.msra.mxu0 %v6009_v52 }
 0x270   :  { %5008 = vmatprep.subr.bf16.mxu0 %v6011_v53 }
 0x273   :  { %5009 = vmatpush3.bf16.msra.mxu0 %v6011_v53 }
 0x274   :  { %5010 = vmatprep.subr.bf16.mxu0 %v6013_v54 }
 0x277   :  { %5011 = vmatpush3.bf16.msra.mxu0 %v6013_v54 }
 0x278   :  { %5012 = vmatprep.subr.bf16.mxu0 %v6015_v55 }
 0x27b   :  { %5013 = vmatpush3.bf16.msra.mxu0 %v6015_v55 }
 0x27c   :  { %5014 = vmatprep.subr.bf16.mxu0 %v6017_v56 }
 0x27f   :  { %5015 = vmatpush3.bf16.msra.mxu0 %v6017_v56 }
 0x280   :  { %5016 = vmatprep.subr.bf16.mxu0 %v6019_v57 }
 0x283   :  { %5017 = vmatpush3.bf16.msra.mxu0 %v6019_v57 }
 0x284   :  { %5018 = vmatprep.subr.bf16.mxu0 %v6021_v58 }
 0x287   :  { %5019 = vmatpush3.bf16.msra.mxu0 %v6021_v58 }
 0x288   :  { %5056 = vmatprep.subr.bf16.mxu0 %v6007_v49 }
 0x28a   :  { %5021 = vmatmul.mubr.bf16.vlgmr.msra.gmra.mrb[28].mxu0 %v5542_v16 }
 0x28b   :  { %5057 = vmatpush3.bf16.msra.mxu0 %v6007_v49  ;;  %5072 = vmatprep.mubr.bf16.mxu0 %v5543_v1  ;;  %v5633_v1 = vmov 0.0  }
 0x28c   :  { %5058 = vmatprep.subr.bf16.mxu0 %v6009_v52 }
 0x28f   :  { %5059 = vmatpush3.bf16.msra.mxu0 %v6009_v52 }
 0x290   :  { %5060 = vmatprep.subr.bf16.mxu0 %v6011_v53 }
 0x293   :  { %5061 = vmatpush3.bf16.msra.mxu0 %v6011_v53 }
 0x294   :  { %5062 = vmatprep.subr.bf16.mxu0 %v6013_v54 }
 0x297   :  { %5063 = vmatpush3.bf16.msra.mxu0 %v6013_v54 }
 0x298   :  { %5064 = vmatprep.subr.bf16.mxu0 %v6015_v55 }
 0x29b   :  { %5065 = vmatpush3.bf16.msra.mxu0 %v6015_v55 }
 0x29c   :  { %5066 = vmatprep.subr.bf16.mxu0 %v6017_v56 }
 0x29f   :  { %5067 = vmatpush3.bf16.msra.mxu0 %v6017_v56 }
 0x2a0   :  { %5068 = vmatprep.subr.bf16.mxu0 %v6019_v57 }
 0x2a3   :  { %5069 = vmatpush3.bf16.msra.mxu0 %v6019_v57 }
 0x2a4   :  { %5070 = vmatprep.subr.bf16.mxu0 %v6021_v58 }
 0x2a7   :  { %5071 = vmatpush3.bf16.msra.mxu0 %v6021_v58 }
 0x2a8   :  { %5082 = vmatprep.subr.bf16.mxu0 %v6007_v49 }
 0x2aa   :  { %5073 = vmatmul.mubr.bf16.vlgmr.msra.gmra.mrb[32].mxu0 %v5544_v22 }
 0x2ab   :  { %5083 = vmatpush3.bf16.msra.mxu0 %v6007_v49  ;;  %5098 = vmatprep.mubr.bf16.mxu0 %v5551_v30 }
 0x2ac   :  { %5084 = vmatprep.subr.bf16.mxu0 %v6009_v52 }
 0x2af   :  { %5085 = vmatpush3.bf16.msra.mxu0 %v6009_v52 }
 0x2b0   :  { %5086 = vmatprep.subr.bf16.mxu0 %v6011_v53 }
 0x2b3   :  { %5087 = vmatpush3.bf16.msra.mxu0 %v6011_v53 }
 0x2b4   :  { %5088 = vmatprep.subr.bf16.mxu0 %v6013_v54 }
 0x2b7   :  { %5089 = vmatpush3.bf16.msra.mxu0 %v6013_v54 }
 0x2b8   :  { %5090 = vmatprep.subr.bf16.mxu0 %v6015_v55 }
 0x2bb   :  { %5091 = vmatpush3.bf16.msra.mxu0 %v6015_v55 }
 0x2bc   :  { %5092 = vmatprep.subr.bf16.mxu0 %v6017_v56 }
 0x2bf   :  { %5093 = vmatpush3.bf16.msra.mxu0 %v6017_v56 }
 0x2c0   :  { %5094 = vmatprep.subr.bf16.mxu0 %v6019_v57 }
 0x2c3   :  { %5095 = vmatpush3.bf16.msra.mxu0 %v6019_v57 }
 0x2c4   :  { %5096 = vmatprep.subr.bf16.mxu0 %v6021_v58 }
 0x2c7   :  { %5097 = vmatpush3.bf16.msra.mxu0 %v6021_v58 }
 0x2c8   :  { %5134 = vmatprep.subr.bf16.mxu0 %v5633_v1 }
 0x2ca   :  { %5099 = vmatmul.mubr.bf16.vlgmr.msra.gmra.mrb[36].mxu0 %v5552_v31 }
 0x2cb   :  { %5138 = vmatprep.mubr.msk.bf16.mxu0 %vm5634_vm3, %v5633_v1 }
 0x31d   :  { %v6157_v50 = vpop.f32.mrb[20].mxu0 }
 0x31e   :  { %v6159_v3 = vpop.f32.mrb[21].mxu0 }
 0x31f   :  { %v6161_v4 = vpop.f32.mrb[22].mxu0 }
 0x320   :  { %v6163_v6 = vpop.f32.mrb[23].mxu0 }
 0x33d   :  { %v4970_v7 = vpop.f32.mrb[24].mxu0 }
 0x33e   :  { %v814_v8 = vpop.f32.mrb[25].mxu0 }
 0x33f   :  { %v4971_v9 = vpop.f32.mrb[26].mxu0 }
 0x340   :  { %v830_v10 = vpack.c.bf16 %v4971_v9, %v4970_v7  ;;  %v817_v13 = vpop.f32.mrb[27].mxu0  ;;  %v4400_v7 = vld [vmem:[%s6893_s10] ss:$0 sm:$0xff]  ;;  %s6898_s10 = sld [smem:[#allocation14_spill]] }
 0x341   :  { %v829_v14 = vpack.c.bf16 %v817_v13, %v814_v8 }
 0x343   :  { %4974 = vmatprep.mubr.msk.bf16.mxu1 %vm6879_vm5, %v829_v14 }
 0x344   :  { %4975 = vmatmul.mubr.msk.bf16.vlgmr.msra.gmra.mrb[4].mxu1 %vm6880_vm6, %v830_v10 }
 0x345   :  { %4979 = vmatpush3.bf16.msra.mxu1 %v6007_v49  ;;  %4994 = vmatprep.mubr.bf16.mxu1 %v5545_v17 }
 0x346   :  { %4980 = vmatprep.subr.bf16.mxu1 %v6009_v52 }
 0x349   :  { %4981 = vmatpush3.bf16.msra.mxu1 %v6009_v52 }
 0x34a   :  { %4982 = vmatprep.subr.bf16.mxu1 %v6011_v53 }
 0x34d   :  { %4983 = vmatpush3.bf16.msra.mxu1 %v6011_v53 }
 0x34e   :  { %4984 = vmatprep.subr.bf16.mxu1 %v6013_v54 }
 0x351   :  { %4985 = vmatpush3.bf16.msra.mxu1 %v6013_v54 }
 0x352   :  { %4986 = vmatprep.subr.bf16.mxu1 %v6015_v55 }
 0x355   :  { %4987 = vmatpush3.bf16.msra.mxu1 %v6015_v55 }
 0x356   :  { %4988 = vmatprep.subr.bf16.mxu1 %v6017_v56 }
 0x359   :  { %4989 = vmatpush3.bf16.msra.mxu1 %v6017_v56 }
 0x35a   :  { %4990 = vmatprep.subr.bf16.mxu1 %v6019_v57 }
 0x35d   :  { %4991 = vmatpush3.bf16.msra.mxu1 %v6019_v57  ;;  %v5022_v24 = vpop.f32.mrb[28].mxu0 }
 0x35e   :  { %4992 = vmatprep.subr.bf16.mxu1 %v6021_v58  ;;  %v1086_v25 = vpop.f32.mrb[29].mxu0 }
 0x35f   :  { %v5023_v26 = vpop.f32.mrb[30].mxu0 }
 0x360   :  { %v1102_v27 = vpack.c.bf16 %v5023_v26, %v5022_v24  ;;  %v1089_v28 = vpop.f32.mrb[31].mxu0 }
 0x361   :  { %4993 = vmatpush3.bf16.msra.mxu1 %v6021_v58  ;;  %v1101_v29 = vpack.c.bf16 %v1089_v28, %v1086_v25 }
 0x362   :  { %4998 = vmatprep.subr.bf16.mxu1 %v5547_v20 }
 0x364   :  { %4995 = vmatmul.mubr.bf16.vlgmr.msra.gmra.mrb[8].mxu1 %v5546_v19 }
 0x365   :  { %4999 = vmatpush3.bf16.msra.mxu1 %v5547_v20 }
 0x366   :  { %5024 = vmatprep.subr.bf16.mxu1 %v5548_v21 }
 0x37d   :  { %v6200_v32 = vpop.f32.mrb[32].mxu0 }
 0x37e   :  { %v1358_v33 = vpop.f32.mrb[33].mxu0 }
 0x37f   :  { %v5075_v36 = vpop.f32.mrb[34].mxu0 }
 0x380   :  { %v1374_v37 = vpack.c.bf16 %v5075_v36, %v6200_v32  ;;  %v1361_v40 = vpop.f32.mrb[35].mxu0 }
 0x381   :  { %v1373_v41 = vpack.c.bf16 %v1361_v40, %v1358_v33 }
 0x39d   :  { %v5100_v2 = vpop.f32.mrb[36].mxu0 }
 0x39e   :  { %v1494_v59 = vpop.f32.mrb[37].mxu0 }
 0x39f   :  { %v5101_v11 = vpop.f32.mrb[38].mxu0 }
 0x3a0   :  { %v1510_v12 = vpack.c.bf16 %v5101_v11, %v5100_v2  ;;  %v1497_v5 = vpop.f32.mrb[39].mxu0 }
 0x3a1   :  { %v1509_v60 = vpack.c.bf16 %v1497_v5, %v1494_v59 }
 0x437   :  { %v4996_v43 = vpop.f32.mrb[8].mxu1 }
 0x438   :  { %v950_v44 = vpop.f32.mrb[9].mxu1 }
 0x439   :  { %v4997_v45 = vpop.f32.mrb[10].mxu1 }
 0x43a   :  { %v966_v47 = vpack.c.bf16 %v4997_v45, %v4996_v43  ;;  %v953_v18 = vpop.f32.mrb[11].mxu1 }
 0x43b   :  { %v965_v23 = vpack.c.bf16 %v953_v18, %v950_v44 }
 0x43d   :  { %5000 = vmatprep.mubr.msk.bf16.mxu1 %vm6881_vm7, %v965_v23 }
 0x43e   :  { %5001 = vmatmul.mubr.msk.bf16.vlgmr.msra.gmra.mrb[4].mxu1 %vm6882_vm8, %v966_v47 }
 0x43f   :  { %5025 = vmatpush3.bf16.msra.mxu1 %v5548_v21  ;;  %5026 = vmatprep.mubr.msk.bf16.mxu1 %vm6883_vm9, %v1101_v29  ;;  %vm2771_vm9 = vcmask 523264  }
 0x440   :  { %5030 = vmatprep.subr.bf16.mxu1 %v6007_v49 }
 0x44a   :  { %5027 = vmatmul.mubr.msk.bf16.vlgmr.msra.gmra.mrb[4].mxu1 %vm6884_vm10, %v1102_v27 }
 0x44b   :  { %5031 = vmatpush3.bf16.msra.mxu1 %v6007_v49  ;;  %5046 = vmatprep.mubr.bf16.mxu1 %v5549_v39 }
 0x44c   :  { %5032 = vmatprep.subr.bf16.mxu1 %v6009_v52 }
 0x44f   :  { %5033 = vmatpush3.bf16.msra.mxu1 %v6009_v52 }
 0x450   :  { %5034 = vmatprep.subr.bf16.mxu1 %v6011_v53 }
 0x453   :  { %5035 = vmatpush3.bf16.msra.mxu1 %v6011_v53 }
 0x454   :  { %5036 = vmatprep.subr.bf16.mxu1 %v6013_v54 }
 0x457   :  { %5037 = vmatpush3.bf16.msra.mxu1 %v6013_v54 }
 0x458   :  { %5038 = vmatprep.subr.bf16.mxu1 %v6015_v55 }
 0x45b   :  { %5039 = vmatpush3.bf16.msra.mxu1 %v6015_v55 }
 0x45c   :  { %5040 = vmatprep.subr.bf16.mxu1 %v6017_v56 }
 0x45f   :  { %5041 = vmatpush3.bf16.msra.mxu1 %v6017_v56 }
 0x460   :  { %5042 = vmatprep.subr.bf16.mxu1 %v6019_v57 }
 0x463   :  { %5043 = vmatpush3.bf16.msra.mxu1 %v6019_v57 }
 0x464   :  { %5044 = vmatprep.subr.bf16.mxu1 %v6021_v58 }
 0x467   :  { %5045 = vmatpush3.bf16.msra.mxu1 %v6021_v58 }
 0x468   :  { %5050 = vmatprep.subr.bf16.mxu1 %v5553_v42 }
 0x46a   :  { %5047 = vmatmul.mubr.bf16.vlgmr.msra.gmra.mrb[12].mxu1 %v5550_v48 }
 0x46b   :  { %5051 = vmatpush3.bf16.msra.mxu1 %v5553_v42 }
 0x46c   :  { %5076 = vmatprep.subr.bf16.mxu1 %v5554_v51 }
 0x53d   :  { %v5048_v15 = vpop.f32.mrb[12].mxu1 }
 0x53e   :  { %v1222_v61 = vpop.f32.mrb[13].mxu1 }
 0x53f   :  { %v5049_v35 = vpop.f32.mrb[14].mxu1 }
 0x540   :  { %v1238_v62 = vpack.c.bf16 %v5049_v35, %v5048_v15  ;;  %v1225_v46 = vpop.f32.mrb[15].mxu1  ;;  %v1726_v35 = vld [vmem:[%s6894_s2] sm:$0x1] }
 0x541   :  { %v1237_v63 = vpack.c.bf16 %v1225_v46, %v1222_v61 }
 0x543   :  { %5052 = vmatprep.mubr.msk.bf16.mxu1 %vm6885_vm11, %v1237_v63  ;;  %v1727_v63 = vld [vmem:[%s6895_s6] sm:$0x1]  ;;  %vm2819_vm11 = vcmask 1043456  }
 0x544   :  { %5053 = vmatmul.mubr.msk.bf16.vlgmr.msra.gmra.mrb[4].mxu1 %vm6886_vm12, %v1238_v62  ;;  %vm2815_vm12 = vcmask 64512  }
 0x545   :  { %5078 = vmatprep.mubr.msk.bf16.mxu1 %vm6887_vm13, %v1373_v41  ;;  %5077 = vmatpush3.bf16.msra.mxu1 %v5554_v51  ;;  %vm6899_vm13 = vcmask 1041408  }
 0x546   :  { %5102 = vmatprep.subr.bf16.mxu1 %v5555_v38 }
 0x550   :  { %5079 = vmatmul.mubr.msk.bf16.vlgmr.msra.gmra.mrb[4].mxu1 %vm6888_vm14, %v1374_v37  ;;  %vm6900_vm14 = vmmov %vm6899_vm13 }
 0x551   :  { %5103 = vmatpush3.bf16.msra.mxu1 %v5555_v38  ;;  %5104 = vmatprep.mubr.msk.bf16.mxu1 %vm6889_vm15, %v1509_v60 }
 0x552   :  { %5108 = vmatprep.subr.bf16.mxu1 %v6007_v49 }
 0x55c   :  { %5105 = vmatmul.mubr.msk.bf16.vlgmr.msra.gmra.mrb[4].mxu1 %vm6890_vm0, %v1510_v12  ;;  %vm3979_vm0 = vcmask 1040384  }
 0x55d   :  { %5109 = vmatpush3.bf16.msra.mxu1 %v6007_v49  ;;  %5124 = vmatprep.mubr.bf16.mxu1 %v5556_v0  ;;  %v5557_v49 = vld [vmem:[%s6871_s8 + $0x88] sm:$0xff]  }
 0x55e   :  { %5110 = vmatprep.subr.bf16.mxu1 %v6009_v52 }
 0x561   :  { %5111 = vmatpush3.bf16.msra.mxu1 %v6009_v52  ;;  %v5558_v52 = vld [vmem:[%s6874_s7 + $0x40] sm:$0xff]   ;;  %s6897_s7 = sld [smem:[#allocation13_spill]] }
 0x562   :  { %5112 = vmatprep.subr.bf16.mxu1 %v6011_v53 }
 0x565   :  { %5113 = vmatpush3.bf16.msra.mxu1 %v6011_v53 }
 0x566   :  { %5114 = vmatprep.subr.bf16.mxu1 %v6013_v54 }
 0x569   :  { %5115 = vmatpush3.bf16.msra.mxu1 %v6013_v54 }
 0x56a   :  { %5116 = vmatprep.subr.bf16.mxu1 %v6015_v55 }
 0x56d   :  { %5117 = vmatpush3.bf16.msra.mxu1 %v6015_v55 }
 0x56e   :  { %5118 = vmatprep.subr.bf16.mxu1 %v6017_v56 }
 0x571   :  { %5119 = vmatpush3.bf16.msra.mxu1 %v6017_v56 }
 0x572   :  { %5120 = vmatprep.subr.bf16.mxu1 %v6019_v57 }
 0x575   :  { %5121 = vmatpush3.bf16.msra.mxu1 %v6019_v57 }
 0x576   :  { %5122 = vmatprep.subr.bf16.mxu1 %v6021_v58 }
 0x579   :  { %5123 = vmatpush3.bf16.msra.mxu1 %v6021_v58 }
 0x57a   :  { %5128 = vmatprep.subr.bf16.mxu1 %v5558_v52 }
 0x57c   :  { %5125 = vmatmul.mubr.bf16.vlgmr.msra.gmra.mrb[16].mxu1 %v5557_v49 }
 0x57d   :  { %5129 = vmatpush3.bf16.msra.mxu1 %v5558_v52 }
 0x57e   :  { %5166 = vmatprep.subr.bf16.mxu1 %v5633_v1 }
 0x64f   :  { %v5126_v53 = vpop.f32.mrb[16].mxu1 }
 0x650   :  { %v1630_v54 = vpop.f32.mrb[17].mxu1 }
 0x651   :  { %v5127_v55 = vpop.f32.mrb[18].mxu1 }
 0x652   :  { %v1646_v56 = vpack.c.bf16 %v5127_v55, %v5126_v53  ;;  %v1633_v57 = vpop.f32.mrb[19].mxu1 }
 0x653   :  { %v1645_v16 = vpack.c.bf16 %v1633_v57, %v1630_v54 }
 0x655   :  { %5130 = vmatprep.mubr.msk.bf16.mxu1 %vm6891_vm1, %v1645_v16  ;;  %vm3975_vm1 = vcmask 15360  }
 0x656   :  { %5131 = vmatmul.mubr.msk.bf16.vlgmr.msra.gmra.mrb[4].mxu1 %vm6892_vm2, %v1646_v56  ;;  %vm4137_vm2 = vcmask 254976  }
 0x657   :  { %5170 = vmatprep.mubr.msk.bf16.mxu1 %vm5634_vm3, %v5633_v1 }
 0x729   :  { %v5132_v58 = vpop.f32.mrb[4].mxu1 }
 0x72a   :  { %v5483_v22 = vadd.f32 %v5132_v58, %v6157_v50  ;;  %v1696_v8 = vpop.f32.mrb[5].mxu1 }
 0x72b   :  { %v5484_v9 = vadd.f32 %v1696_v8, %v6159_v3  ;;  %v5133_v10 = vpop.f32.mrb[6].mxu1 }
 0x72c   :  { %v5485_v13 = vadd.f32 %v5133_v10, %v6161_v4  ;;  %v1699_v14 = vpop.f32.mrb[7].mxu1  ;;  %v1724_v17 = vadd.f32 %v5483_v22, %v4400_v7 }
 0x72d   :  { %v1722_v19 = vadd.f32 %v5484_v9, %v4400_v7  ;;  %v5486_v20 = vadd.f32 %v1699_v14, %v6163_v6 }
 0x72e   :  { %v1725_v24 = vadd.f32 %v5485_v13, %v4400_v7  ;;  %v1745_v50 = vmul.f32 %v1724_v17, %v1724_v17  ;;  %v1732_v3 = vsel %vm1728_vm4, %v1724_v17, 0.0 }
 0x72f   :  { %v1743_v21 = vmul.f32 %v1722_v19, %v1722_v19  ;;  %v1723_v25 = vadd.f32 %v5486_v20, %v4400_v7  ;;  %v1729_v26 = vsel %vm1728_vm4, %v1722_v19, 0.0 }
 0x730   :  { %v1746_v30 = vmul.f32 %v1725_v24, %v1725_v24  ;;  %v1750_v33 = vsel %vm1728_vm4, %v1745_v50, 0.0  ;;  %v1734_v36 = vsel %vm1728_vm4, %v1725_v24, 0.0  ;;  %v4402_v50 = vld [vmem:[%s6896_s29 + $0x4] sm:$0xf] }
 0x731   :  { %v1730_v27 = vsel %vm1728_vm4, %v1723_v25, 0.0  ;;  %v1744_v28 = vmul.f32 %v1723_v25, %v1723_v25  ;;  %v1747_v4 = vsel %vm1728_vm4, %v1743_v21, 0.0 }
 0x732   :  { %v1731_v29 = vadd.f32 %v1730_v27, %v1729_v26  ;;  %v1752_v41 = vsel %vm1728_vm4, %v1746_v30, 0.0  ;;  %v4423_v26 = vld [vmem:[%s6896_s29 + $0xc] sm:$0xf]  ;;  %v4432_v27 = vld [vmem:[%s6896_s29 + $0x10] sm:$0xf] }
 0x733   :  { %v1748_v31 = vsel %vm1728_vm4, %v1744_v28, 0.0  ;;  %v4441_v28 = vld [vmem:[%s6896_s29 + $0x14] sm:$0xf] }
 0x734   :  { %v1733_v32 = vadd.f32 %v1732_v3, %v1731_v29  ;;  %v1749_v6 = vadd.f32 %v1748_v31, %v1747_v4  ;;  %v4450_v29 = vld [vmem:[%s6896_s29 + $0x18] sm:$0xf]  ;;  %v4459_v3 = vld [vmem:[%s6896_s29 + $0x1c] sm:$0xf]  ;;  %v4468_v4 = vld [vmem:[%s6896_s29 + $0x20] sm:$0xf] }
 0x735   :  { %v5559_v30 = vld [vmem:[%s6897_s7 + $0x10] sm:$0xff]   ;;  %v5560_v31 = vld [vmem:[%s6897_s7 + $0x18] sm:$0xff]  }
 0x736   :  { %v1735_v37 = vadd.f32 %v1734_v36, %v1733_v32  ;;  %v1751_v40 = vadd.f32 %v1750_v33, %v1749_v6 }
 0x738   :  { %v1736_v43 = vrot.slane %v1735_v37, 4  ;;  %v1753_v44 = vadd.f32 %v1752_v41, %v1751_v40 }
 0x73a   :  { %v1737_v45 = vadd.f32 %v1736_v43, %v1735_v37  ;;  %v1754_v47 = vrot.slane %v1753_v44, 4 }
 0x73c   :  { %v1738_v18 = vrot.slane %v1737_v45, 2  ;;  %v1755_v23 = vadd.f32 %v1754_v47, %v1753_v44 }
 0x73e   :  { %v1739_v39 = vadd.f32 %v1738_v18, %v1737_v45  ;;  %v1756_v48 = vrot.slane %v1755_v23, 2  ;;  %v5561_v45 = vld [vmem:[%s6897_s7] sm:$0xff]  }
 0x740   :  { %v1740_v42 = vrot.slane %v1739_v39, 1  ;;  %v1757_v51 = vadd.f32 %v1756_v48, %v1755_v23 }
 0x742   :  { %v1741_v2 = vadd.f32 %v1740_v42, %v1739_v39  ;;  %v1758_v59 = vrot.slane %v1757_v51, 1 }
 0x744   :  { %v1742_v11 = vmul.f32 0.03125, %v1741_v2  ;;  %v1759_v12 = vadd.f32 %v1758_v59, %v1757_v51  ;;  %v5562_v59 = vld [vmem:[%s6897_s7 + $0x8] sm:$0xff]  }
 0x746   :  { %v1760_v5 = vmul.f32 0.03125, %v1759_v12  ;;  %v1761_v60 = vmul.f32 %v1742_v11, %v1742_v11 }
 0x748   :  { %v1762_v15 = vsub.f32 %v1760_v5, %v1761_v60 }
 0x74a   :  { %v1763_v61 = vadd.f32 1e-05, %v1762_v15 }
 0x74c   :  { %5623 = vrsqrt.f32 %v1763_v61 }
 0x756   :  { %v5624_v62 = vpop.eup %5623 }
 0x757   :  { %v1765_v46 = vmul.f32 %v5624_v62, %v1726_v35  ;;  %v5564_v35 = vld [vmem:[%s6897_s7 + $0x28] sm:$0xff]  }
 0x759   :  { %v1766_v38 = vmul.f32 %v1765_v46, %v1742_v11  ;;  %v1772_v0 = vrot.slane %v1765_v46, %v5968_v34  ;;  %v5563_v11 = vld [vmem:[%s6897_s7 + $0x20] sm:$0xff]   ;;  %v5565_v46 = vld [vmem:[%s6897_s7 + $0x30] sm:$0xff]  }
 0x75b   :  { %v1767_v49 = vsub.f32 %v1727_v63, %v1766_v38  ;;  %v1774_v52 = vmul.f32 %v1772_v0, %v1722_v19  ;;  %v1775_v53 = vmul.f32 %v1772_v0, %v1723_v25  ;;  %v1776_v54 = vmul.f32 %v1772_v0, %v1724_v17  ;;  %v4414_v25 = vld [vmem:[%s6896_s29 + $0x8] sm:$0xf] }
 0x75c   :  { %v1777_v55 = vmul.f32 %v1772_v0, %v1725_v24  ;;  %v1802_v24 = vld [vmem:[%s6896_s29] sm:$0xf] }
 0x75d   :  { %v1782_v56 = vrot.slane %v1767_v49, %v5968_v34 }
 0x75f   :  { %v1784_v57 = vadd.f32 %v1782_v56, %v1774_v52  ;;  %v1785_v16 = vadd.f32 %v1782_v56, %v1775_v53  ;;  %v1786_v58 = vadd.f32 %v1782_v56, %v1776_v54  ;;  %v1787_v22 = vadd.f32 %v1782_v56, %v1777_v55  ;;  %v5566_v52 = vld [vmem:[%s6897_s7 + $0x38] sm:$0xff]   ;;  %v5567_v54 = vld [vmem:[%s6897_s7 + $0x40] sm:$0xff]  }
 0x761   :  { %vm1788_vm5 = vcmp.ge.f32.partialorder %v1784_v57, 0.0  ;;  %vm1789_vm6 = vcmp.ge.f32.partialorder %v1785_v16, 0.0  ;;  %vm1790_vm7 = vcmp.ge.f32.partialorder %v1786_v58, 0.0  ;;  %vm1791_vm8 = vcmp.ge.f32.partialorder %v1787_v22, 0.0 }
 0x762   :  { %v1792_v7 = vmul.f32 0.03, %v1784_v57  ;;  %v1793_v8 = vmul.f32 0.03, %v1785_v16  ;;  %v1794_v9 = vmul.f32 0.03, %v1786_v58 }
 0x763   :  { %v1795_v10 = vmul.f32 0.03, %v1787_v22 }
 0x764   :  { %v1796_v13 = vsel %vm1788_vm5, %v1784_v57, %v1792_v7  ;;  %v1797_v14 = vsel %vm1789_vm6, %v1785_v16, %v1793_v8  ;;  %v1798_v19 = vsel %vm1790_vm7, %v1786_v58, %v1794_v9  ;;  %v5568_v58 = vld [vmem:[%s6897_s7 + $0x48] sm:$0xff]   ;;  %v5569_v7 = vld [vmem:[%s6897_s7 + $0x50] sm:$0xff]   ;;  %vm4279_vm5 = vcmask 123968  }
 0x765   :  { %v1799_v20 = vsel %vm1791_vm8, %v1787_v22, %v1795_v10  ;;  %v1800_v17 = vpack.c.bf16 %v1797_v14, %v1796_v13  ;;  %v5570_v14 = vld [vmem:[%s6897_s7 + $0x58] sm:$0xff]   ;;  %vm4281_vm6 = vcmask 189568  }
 0x766   :  { %v1801_v21 = vpack.c.bf16 %v1799_v20, %v1798_v19  ;;  %v5571_v20 = vld [vmem:[%s6897_s7 + $0x60] sm:$0xff]  }
 0x767   :  { %5135 = vmatpush3.bf16.msra.mxu0 %v1800_v17  ;;  %5167 = vmatpush3.bf16.msra.mxu1 %v1800_v17 }
 0x768   :  { %5136 = vmatprep.subr.bf16.mxu0 %v5633_v1  ;;  %5168 = vmatprep.subr.bf16.mxu1 %v5633_v1 }
 0x76b   :  { %5137 = vmatpush3.bf16.msra.mxu0 %v1801_v21  ;;  %5169 = vmatpush3.bf16.msra.mxu1 %v1801_v21 }
 0x76c   :  { %5142 = vmatprep.subr.bf16.mxu0 %v5633_v1  ;;  %5182 = vmatprep.subr.bf16.mxu1 %v5633_v1 }
 0x76e   :  { %5139 = vmatmul.mubr.msk.bf16.vlgmr.msra.gmra.mrb[40].mxu0 %vm1728_vm4, %v1802_v24  ;;  %5171 = vmatmul.mubr.msk.bf16.vlgmr.msra.gmra.mrb[20].mxu1 %vm1728_vm4, %v4414_v25 }
 0x76f   :  { %5143 = vmatpush3.bf16.msra.mxu0 %v1800_v17  ;;  %5183 = vmatpush3.bf16.msra.mxu1 %v1800_v17 }
 0x770   :  { %5144 = vmatprep.subr.bf16.mxu0 %v5633_v1  ;;  %5184 = vmatprep.subr.bf16.mxu1 %v5633_v1 }
 0x771   :  { %5146 = vmatprep.mubr.msk.bf16.mxu0 %vm5634_vm3, %v5633_v1  ;;  %5186 = vmatprep.mubr.msk.bf16.mxu1 %vm5634_vm3, %v5633_v1 }
 0x773   :  { %5145 = vmatpush3.bf16.msra.mxu0 %v1801_v21  ;;  %5185 = vmatpush3.bf16.msra.mxu1 %v1801_v21 }
 0x774   :  { %5198 = vmatprep.subr.bf16.mxu1 %v5633_v1  ;;  %5150 = vmatprep.subr.bf16.mxu0 %v5633_v1 }
 0x776   :  { %5147 = vmatmul.mubr.msk.bf16.vlgmr.msra.gmra.mrb[44].mxu0 %vm1728_vm4, %v4402_v50  ;;  %5187 = vmatmul.mubr.msk.bf16.vlgmr.msra.gmra.mrb[24].mxu1 %vm1728_vm4, %v4423_v26  ;;  %v5572_v50 = vld [vmem:[%s6897_s7 + $0x68] sm:$0xff]  }
 0x777   :  { %5199 = vmatpush3.bf16.msra.mxu1 %v1800_v17  ;;  %5202 = vmatprep.mubr.msk.bf16.mxu1 %vm5634_vm3, %v5633_v1 }
 0x778   :  { %5200 = vmatprep.subr.bf16.mxu1 %v5633_v1  ;;  %5154 = vmatprep.mubr.msk.bf16.mxu0 %vm5634_vm3, %v5633_v1 }
 0x779   :  { %5151 = vmatpush3.bf16.msra.mxu0 %v5559_v30 }
 0x77a   :  { %5152 = vmatprep.subr.bf16.mxu0 %v5633_v1 }
 0x77b   :  { %5201 = vmatpush3.bf16.msra.mxu1 %v1801_v21 }
 0x77c   :  { %5214 = vmatprep.subr.bf16.mxu1 %v5633_v1 }
 0x77d   :  { %5153 = vmatpush3.bf16.msra.mxu0 %v5560_v31 }
 0x77e   :  { %5203 = vmatmul.mubr.msk.bf16.vlgmr.msra.gmra.mrb[28].mxu1 %vm1728_vm4, %v4432_v27  ;;  %5158 = vmatprep.subr.bf16.mxu0 %v5633_v1  ;;  %v5573_v27 = vld [vmem:[%s6897_s7 + $0x70] sm:$0xff]  }
 0x77f   :  { %5215 = vmatpush3.bf16.msra.mxu1 %v1800_v17  ;;  %5218 = vmatprep.mubr.msk.bf16.mxu1 %vm5634_vm3, %v5633_v1 }
 0x780   :  { %5216 = vmatprep.subr.bf16.mxu1 %v5633_v1 }
 0x783   :  { %5217 = vmatpush3.bf16.msra.mxu1 %v1801_v21 }
 0x784   :  { %5230 = vmatprep.subr.bf16.mxu1 %v5633_v1 }
 0x786   :  { %5219 = vmatmul.mubr.msk.bf16.vlgmr.msra.gmra.mrb[32].mxu1 %vm1728_vm4, %v4441_v28  ;;  %v5574_v28 = vld [vmem:[%s6897_s7 + $0x78] sm:$0xff]  }
 0x787   :  { %5231 = vmatpush3.bf16.msra.mxu1 %v1800_v17  ;;  %5234 = vmatprep.mubr.msk.bf16.mxu1 %vm5634_vm3, %v5633_v1 }
 0x788   :  { %5232 = vmatprep.subr.bf16.mxu1 %v5633_v1 }
 0x78b   :  { %5233 = vmatpush3.bf16.msra.mxu1 %v1801_v21 }
 0x78c   :  { %5246 = vmatprep.subr.bf16.mxu1 %v5633_v1 }
 0x78e   :  { %5235 = vmatmul.mubr.msk.bf16.vlgmr.msra.gmra.mrb[36].mxu1 %vm1728_vm4, %v4450_v29 }
 0x78f   :  { %5247 = vmatpush3.bf16.msra.mxu1 %v1800_v17  ;;  %5250 = vmatprep.mubr.msk.bf16.mxu1 %vm5634_vm3, %v5633_v1 }
 0x790   :  { %5248 = vmatprep.subr.bf16.mxu1 %v5633_v1 }
 0x793   :  { %5249 = vmatpush3.bf16.msra.mxu1 %v1801_v21 }
 0x794   :  { %5262 = vmatprep.subr.bf16.mxu1 %v5633_v1 }
 0x796   :  { %5251 = vmatmul.mubr.msk.bf16.vlgmr.msra.gmra.mrb[40].mxu1 %vm1728_vm4, %v4459_v3  ;;  %v5575_v3 = vld [vmem:[%s6897_s7 + $0x80] sm:$0xff]  }
 0x797   :  { %5263 = vmatpush3.bf16.msra.mxu1 %v1800_v17  ;;  %5266 = vmatprep.mubr.msk.bf16.mxu1 %vm5634_vm3, %v5633_v1 }
 0x798   :  { %5264 = vmatprep.subr.bf16.mxu1 %v5633_v1 }
 0x79b   :  { %5265 = vmatpush3.bf16.msra.mxu1 %v1801_v21 }
 0x79c   :  { %5278 = vmatprep.subr.bf16.mxu1 %v5633_v1 }
 0x79e   :  { %5267 = vmatmul.mubr.msk.bf16.vlgmr.msra.gmra.mrb[44].mxu1 %vm1728_vm4, %v4468_v4  ;;  %v5576_v4 = vld [vmem:[%s6897_s7 + $0x88] sm:$0xff]  }
 0x79f   :  { %5280 = vmatprep.mubr.msk.bf16.mxu1 %vm5634_vm3, %v5633_v1 }
 0x841   :  { %v1840_v32 = vpop.f32.mrb[40].mxu0  ;;  %v2051_v6 = vpop.f32.mrb[20].mxu1 }
 0x842   :  { %v5140_v33 = vpop.f32.mrb[41].mxu0  ;;  %v5172_v36 = vpop.f32.mrb[21].mxu1  ;;  %v1846_v5 = vpack.c.bf16 %v1840_v32, %v1840_v32  ;;  %v2057_v62 = vpack.c.bf16 %v2051_v6, %v2051_v6 }
 0x843   :  { %v1843_v37 = vpop.f32.mrb[42].mxu0  ;;  %v2054_v40 = vpop.f32.mrb[22].mxu1 }
 0x844   :  { %v5141_v41 = vpop.f32.mrb[43].mxu0  ;;  %v5173_v43 = vpop.f32.mrb[23].mxu1 }
 0x849   :  { %v1890_v44 = vpop.f32.mrb[44].mxu0  ;;  %v2158_v47 = vpop.f32.mrb[24].mxu1 }
 0x84a   :  { %v1896_v18 = vpack.c.bf16 %v1890_v44, %v1890_v44  ;;  %v5148_v23 = vpop.f32.mrb[45].mxu0  ;;  %v5188_v39 = vpop.f32.mrb[25].mxu1  ;;  %v2164_v53 = vpack.c.bf16 %v2158_v47, %v2158_v47 }
 0x84b   :  { %v1893_v48 = vpop.f32.mrb[46].mxu0  ;;  %v2161_v42 = vpop.f32.mrb[26].mxu1 }
 0x84c   :  { %v5149_v51 = vpop.f32.mrb[47].mxu0  ;;  %5155 = vmatmul.mubr.msk.bf16.vlgmr.msra.gmra.mrb[48].mxu0 %vm1728_vm4, %v1896_v18  ;;  %v5189_v2 = vpop.f32.mrb[27].mxu1 }
 0x84d   :  { %5159 = vmatpush3.bf16.msra.mxu0 %v5561_v45  ;;  %5162 = vmatprep.mubr.msk.bf16.mxu0 %vm5634_vm3, %v5633_v1 }
 0x84e   :  { %5160 = vmatprep.subr.bf16.mxu0 %v5633_v1 }
 0x851   :  { %5161 = vmatpush3.bf16.msra.mxu0 %v5562_v59  ;;  %v2265_v12 = vpop.f32.mrb[28].mxu1 }
 0x852   :  { %5174 = vmatprep.subr.bf16.mxu0 %v5633_v1  ;;  %v5204_v60 = vpop.f32.mrb[29].mxu1  ;;  %v2271_v22 = vpack.c.bf16 %v2265_v12, %v2265_v12 }
 0x853   :  { %v2268_v15 = vpop.f32.mrb[30].mxu1 }
 0x854   :  { %5163 = vmatmul.mubr.msk.bf16.vlgmr.msra.gmra.mrb[52].mxu0 %vm1728_vm4, %v1846_v5  ;;  %v5205_v61 = vpop.f32.mrb[31].mxu1 }
 0x855   :  { %5175 = vmatpush3.bf16.msra.mxu0 %v5563_v11  ;;  %5178 = vmatprep.mubr.msk.bf16.mxu0 %vm5634_vm3, %v5633_v1 }
 0x856   :  { %5176 = vmatprep.subr.bf16.mxu0 %v5633_v1 }
 0x859   :  { %5177 = vmatpush3.bf16.msra.mxu0 %v5564_v35  ;;  %v2372_v63 = vpop.f32.mrb[32].mxu1 }
 0x85a   :  { %5190 = vmatprep.subr.bf16.mxu0 %v5633_v1  ;;  %v5220_v38 = vpop.f32.mrb[33].mxu1  ;;  %v2378_v19 = vpack.c.bf16 %v2372_v63, %v2372_v63 }
 0x85b   :  { %v2375_v0 = vpop.f32.mrb[34].mxu1 }
 0x85c   :  { %5179 = vmatmul.mubr.msk.bf16.vlgmr.msra.gmra.mrb[56].mxu0 %vm1728_vm4, %v2057_v62  ;;  %v5221_v49 = vpop.f32.mrb[35].mxu1 }
 0x85d   :  { %5191 = vmatpush3.bf16.msra.mxu0 %v5565_v46  ;;  %5194 = vmatprep.mubr.msk.bf16.mxu0 %vm5634_vm3, %v5633_v1 }
 0x85e   :  { %5192 = vmatprep.subr.bf16.mxu0 %v5633_v1 }
 0x861   :  { %5193 = vmatpush3.bf16.msra.mxu0 %v5566_v52  ;;  %v2479_v55 = vpop.f32.mrb[36].mxu1 }
 0x862   :  { %5206 = vmatprep.subr.bf16.mxu0 %v5633_v1  ;;  %v5236_v56 = vpop.f32.mrb[37].mxu1  ;;  %v2485_v26 = vpack.c.bf16 %v2479_v55, %v2479_v55 }
 0x863   :  { %v2482_v57 = vpop.f32.mrb[38].mxu1 }
 0x864   :  { %5195 = vmatmul.mubr.msk.bf16.vlgmr.msra.gmra.mrb[60].mxu0 %vm1728_vm4, %v2164_v53  ;;  %v5237_v16 = vpop.f32.mrb[39].mxu1 }
 0x865   :  { %5207 = vmatpush3.bf16.msra.mxu0 %v5567_v54  ;;  %5210 = vmatprep.mubr.msk.bf16.mxu0 %vm5634_vm3, %v5633_v1 }
 0x866   :  { %5208 = vmatprep.subr.bf16.mxu0 %v5633_v1 }
 0x869   :  { %5209 = vmatpush3.bf16.msra.mxu0 %v5568_v58  ;;  %v2586_v8 = vpop.f32.mrb[40].mxu1  ;;  %v4477_v58 = vld [vmem:[%s6830_s12] ss:$0 sm:$0xff] }
 0x86a   :  { %5222 = vmatprep.subr.bf16.mxu0 %v5633_v1  ;;  %v5252_v9 = vpop.f32.mrb[41].mxu1  ;;  %v2592_v29 = vpack.c.bf16 %v2586_v8, %v2586_v8 }
 0x86b   :  { %v2589_v10 = vpop.f32.mrb[42].mxu1 }
 0x86c   :  { %5211 = vmatmul.mubr.msk.bf16.vlgmr.msra.gmra.mrb[64].mxu0 %vm1728_vm4, %v2271_v22  ;;  %v5253_v13 = vpop.f32.mrb[43].mxu1 }
 0x86d   :  { %5223 = vmatpush3.bf16.msra.mxu0 %v5569_v7  ;;  %5226 = vmatprep.mubr.msk.bf16.mxu0 %vm5634_vm3, %v5633_v1 }
 0x86e   :  { %5224 = vmatprep.subr.bf16.mxu0 %v5633_v1 }
 0x871   :  { %5225 = vmatpush3.bf16.msra.mxu0 %v5570_v14  ;;  %v2693_v17 = vpop.f32.mrb[44].mxu1 }
 0x872   :  { %5238 = vmatprep.subr.bf16.mxu0 %v5633_v1  ;;  %v5268_v21 = vpop.f32.mrb[45].mxu1  ;;  %v2699_v30 = vpack.c.bf16 %v2693_v17, %v2693_v17 }
 0x873   :  { %v2696_v24 = vpop.f32.mrb[46].mxu1 }
 0x874   :  { %5227 = vmatmul.mubr.msk.bf16.vlgmr.msra.gmra.mrb[68].mxu0 %vm1728_vm4, %v2378_v19  ;;  %v5269_v25 = vpop.f32.mrb[47].mxu1 }
 0x875   :  { %5239 = vmatpush3.bf16.msra.mxu0 %v5571_v20  ;;  %5242 = vmatprep.mubr.msk.bf16.mxu0 %vm5634_vm3, %v5633_v1 }
 0x876   :  { %5240 = vmatprep.subr.bf16.mxu0 %v5633_v1 }
 0x879   :  { %5241 = vmatpush3.bf16.msra.mxu0 %v5572_v50 }
 0x87a   :  { %5254 = vmatprep.subr.bf16.mxu0 %v5633_v1 }
 0x87c   :  { %5243 = vmatmul.mubr.msk.bf16.vlgmr.msra.gmra.mrb[72].mxu0 %vm1728_vm4, %v2485_v26 }
 0x87d   :  { %5255 = vmatpush3.bf16.msra.mxu0 %v5573_v27  ;;  %5258 = vmatprep.mubr.msk.bf16.mxu0 %vm5634_vm3, %v5633_v1 }
 0x87e   :  { %5256 = vmatprep.subr.bf16.mxu0 %v5633_v1 }
 0x881   :  { %5257 = vmatpush3.bf16.msra.mxu0 %v5574_v28 }
 0x882   :  { %5270 = vmatprep.subr.bf16.mxu0 %v5633_v1 }
 0x884   :  { %5259 = vmatmul.mubr.msk.bf16.vlgmr.msra.gmra.mrb[76].mxu0 %vm1728_vm4, %v2592_v29 }
 0x885   :  { %5271 = vmatpush3.bf16.msra.mxu0 %v5575_v3  ;;  %5274 = vmatprep.mubr.msk.bf16.mxu0 %vm5634_vm3, %v5633_v1 }
 0x886   :  { %5272 = vmatprep.subr.bf16.mxu0 %v5633_v1 }
 0x889   :  { %5273 = vmatpush3.bf16.msra.mxu0 %v5576_v4 }
 0x88a   :  { %5284 = vmatprep.subr.bf16.mxu0 %v5633_v1 }
 0x88c   :  { %5275 = vmatmul.mubr.msk.bf16.vlgmr.msra.gmra.mrb[80].mxu0 %vm1728_vm4, %v2699_v30 }
 0x88d   :  { %5286 = vmatprep.mubr.msk.bf16.mxu0 %vm5634_vm3, %v5633_v1 }
 0x91f   :  { %v1951_v31 = vpop.f32.mrb[48].mxu0 }
 0x920   :  { %v5156_v32 = vpop.f32.mrb[49].mxu0 }
 0x921   :  { %v1954_v6 = vpop.f32.mrb[50].mxu0 }
 0x922   :  { %v5157_v33 = vpop.f32.mrb[51].mxu0 }
 0x927   :  { %v2006_v36 = vpop.f32.mrb[52].mxu0 }
 0x928   :  { %v2007_v37 = vadd.f32 %v2006_v36, %v1951_v31  ;;  %v5164_v40 = vpop.f32.mrb[53].mxu0  ;;  %v2769_v36 = vld [vmem:[%s6831_s13] sm:$0x1] }
 0x929   :  { %v2009_v41 = vpop.f32.mrb[54].mxu0 }
 0x92a   :  { %v5165_v43 = vpop.f32.mrb[55].mxu0  ;;  %v2770_v41 = vld [vmem:[%s6832_s14] sm:$0x1] }
 0x92f   :  { %v2112_v44 = vpop.f32.mrb[56].mxu0 }
 0x930   :  { %v2118_v45 = vadd.f32 %v2112_v44, %v2007_v37  ;;  %v5180_v47 = vpop.f32.mrb[57].mxu0 }
 0x931   :  { %v2115_v18 = vpop.f32.mrb[58].mxu0 }
 0x932   :  { %v5181_v23 = vpop.f32.mrb[59].mxu0 }
 0x937   :  { %v2219_v39 = vpop.f32.mrb[60].mxu0 }
 0x938   :  { %v2225_v48 = vadd.f32 %v2219_v39, %v2118_v45  ;;  %v5196_v42 = vpop.f32.mrb[61].mxu0 }
 0x939   :  { %v2222_v51 = vpop.f32.mrb[62].mxu0 }
 0x93a   :  { %v5197_v2 = vpop.f32.mrb[63].mxu0 }
 0x93b   :  { %v2814_v2 = vld [vmem:[%s6833_s15] sm:$0x1] }
 0x93f   :  { %v2326_v59 = vpop.f32.mrb[64].mxu0 }
 0x940   :  { %v2332_v11 = vadd.f32 %v2326_v59, %v2225_v48  ;;  %v5212_v12 = vpop.f32.mrb[65].mxu0  ;;  %v4479_v59 = vld [vmem:[%s6833_s15 + $0x1] sm:$0x1] }
 0x941   :  { %v2329_v5 = vpop.f32.mrb[66].mxu0  ;;  %v5578_v12 = vld [vmem:[%s6898_s10] sm:$0xff]  }
 0x942   :  { %v5213_v60 = vpop.f32.mrb[67].mxu0  ;;  %v5579_v5 = vld [vmem:[%s6898_s10 + $0x28] sm:$0xff]  }
 0x943   :  { %v5580_v60 = vld [vmem:[%s6898_s10 + $0x8] sm:$0xff]  }
 0x947   :  { %v2433_v15 = vpop.f32.mrb[68].mxu0 }
 0x948   :  { %v2439_v61 = vadd.f32 %v2433_v15, %v2332_v11  ;;  %v5228_v35 = vpop.f32.mrb[69].mxu0  ;;  %v5577_v11 = vld [vmem:[%s6898_s10 + $0x20] sm:$0xff]   ;;  %v5581_v15 = vld [vmem:[%s6898_s10 + $0x30] sm:$0xff]  }
 0x949   :  { %v2436_v62 = vpop.f32.mrb[70].mxu0  ;;  %v5583_v35 = vld [vmem:[%s6898_s10 + $0x38] sm:$0xff]  }
 0x94a   :  { %v5229_v46 = vpop.f32.mrb[71].mxu0  ;;  %v5584_v62 = vld [vmem:[%s6898_s10 + $0x18] sm:$0xff]  }
 0x94f   :  { %v2540_v63 = vpop.f32.mrb[72].mxu0 }
 0x950   :  { %v2546_v38 = vadd.f32 %v2540_v63, %v2439_v61  ;;  %v5244_v0 = vpop.f32.mrb[73].mxu0  ;;  %v5582_v61 = vld [vmem:[%s6898_s10 + $0x10] sm:$0xff]  }
 0x951   :  { %v2543_v49 = vpop.f32.mrb[74].mxu0 }
 0x952   :  { %v5245_v52 = vpop.f32.mrb[75].mxu0 }
 0x957   :  { %v2647_v53 = vpop.f32.mrb[76].mxu0 }
 0x958   :  { %v2653_v54 = vadd.f32 %v2647_v53, %v2546_v38  ;;  %v5260_v55 = vpop.f32.mrb[77].mxu0  ;;  %v5585_v53 = vld [vmem:[%s6898_s10 + $0x40] sm:$0xff]  }
 0x959   :  { %v2650_v56 = vpop.f32.mrb[78].mxu0 }
 0x95a   :  { %v5261_v57 = vpop.f32.mrb[79].mxu0 }
 0x95f   :  { %v2754_v16 = vpop.f32.mrb[80].mxu0 }
 0x960   :  { %v2760_v22 = vadd.f32 %v2754_v16, %v2653_v54  ;;  %v5276_v7 = vpop.f32.mrb[81].mxu0  ;;  %v5586_v16 = vld [vmem:[%s6898_s10 + $0x48] sm:$0xff]  }
 0x961   :  { %v2757_v8 = vpop.f32.mrb[82].mxu0  ;;  %v5587_v7 = vld [vmem:[%s6898_s10 + $0x50] sm:$0xff]  }
 0x962   :  { %v2768_v9 = vadd.f32 %v4477_v58, %v2760_v22  ;;  %v5277_v10 = vpop.f32.mrb[83].mxu0  ;;  %v4499_v58 = vld [vmem:[%s6833_s15 + $0x2] sm:$0x1]  ;;  %v4514_v22 = vld [vmem:[%s6833_s15 + $0x3] sm:$0x1] }
 0x963   :  { %v5588_v8 = vld [vmem:[%s6898_s10 + $0x60] sm:$0xff]   ;;  %v5590_v10 = vld [vmem:[%s6898_s10 + $0x68] sm:$0xff]  }
 0x964   :  { %v2772_v13 = vsel %vm2771_vm9, %v2768_v9, 0.0  ;;  %v2780_v14 = vmul.f32 %v2768_v9, %v2768_v9 }
 0x965   :  { %v2773_v19 = vrot.slane %v2772_v13, 4 }
 0x966   :  { %v2781_v20 = vsel %vm2771_vm9, %v2780_v14, 0.0  ;;  %v5592_v14 = vld [vmem:[%s6898_s10 + $0x78] sm:$0xff]  }
 0x967   :  { %v2774_v17 = vadd.f32 %v2773_v19, %v2772_v13  ;;  %v2782_v21 = vrot.slane %v2781_v20, 4  ;;  %v5591_v13 = vld [vmem:[%s6898_s10 + $0x70] sm:$0xff]  }
 0x969   :  { %v2775_v24 = vrot.slane %v2774_v17, 2  ;;  %v2783_v25 = vadd.f32 %v2782_v21, %v2781_v20 }
 0x96b   :  { %v2776_v50 = vadd.f32 %v2775_v24, %v2774_v17  ;;  %v2784_v26 = vrot.slane %v2783_v25, 2 }
 0x96d   :  { %v2777_v27 = vrot.slane %v2776_v50, 1  ;;  %v2785_v28 = vadd.f32 %v2784_v26, %v2783_v25 }
 0x96f   :  { %v2778_v29 = vadd.f32 %v2777_v27, %v2776_v50  ;;  %v2786_v3 = vrot.slane %v2785_v28, 1 }
 0x971   :  { %v2779_v4 = vmul.f32 0.125, %v2778_v29  ;;  %v2787_v30 = vadd.f32 %v2786_v3, %v2785_v28 }
 0x973   :  { %v2788_v31 = vmul.f32 0.125, %v2787_v30  ;;  %v2789_v32 = vmul.f32 %v2779_v4, %v2779_v4 }
 0x975   :  { %v2790_v6 = vsub.f32 %v2788_v31, %v2789_v32  ;;  %v4529_v32 = vld [vmem:[%s6833_s15 + $0x4] sm:$0x1] }
 0x977   :  { %v2791_v33 = vadd.f32 1e-05, %v2790_v6 }
 0x979   :  { %5625 = vrsqrt.f32 %v2791_v33  ;;  %v5593_v33 = vld [vmem:[%s6898_s10 + $0x80] sm:$0xff]  }
 0x983   :  { %v5626_v37 = vpop.eup %5625 }
 0x984   :  { %v2793_v40 = vmul.f32 %v5626_v37, %v2769_v36 }
 0x986   :  { %v2794_v43 = vmul.f32 %v2793_v40, %v2779_v4  ;;  %v2800_v44 = vrot.slane %v2793_v40, %v5968_v34 }
 0x988   :  { %v2795_v45 = vsub.f32 %v2770_v41, %v2794_v43  ;;  %v2802_v47 = vmul.f32 %v2800_v44, %v2768_v9  ;;  %v5589_v9 = vld [vmem:[%s6898_s10 + $0x58] sm:$0xff]   ;;  %v5594_v41 = vld [vmem:[%s6898_s10 + $0x88] sm:$0xff]   ;;  %v4544_v43 = vld [vmem:[%s6833_s15 + $0x5] sm:$0x1] }
 0x989   :  { %v5595_v44 = vld [vmem:[%s6898_s10 + $0x90] sm:$0xff]  }
 0x98a   :  { %v2807_v18 = vrot.slane %v2795_v45, %v5968_v34  ;;  %v5596_v45 = vld [vmem:[%s6898_s10 + $0xa0] sm:$0xff]  }
 0x98c   :  { %v2809_v23 = vadd.f32 %v2807_v18, %v2802_v47  ;;  %v5597_v47 = vld [vmem:[%s6898_s10 + $0x98] sm:$0xff]   ;;  %v5598_v18 = vld [vmem:[%s6898_s10 + $0xa8] sm:$0xff]  }
 0x98e   :  { %vm2810_vm10 = vcmp.ge.f32.partialorder %v2809_v23, 0.0  ;;  %v2811_v39 = vmul.f32 0.03, %v2809_v23 }
 0x990   :  { %v2812_v48 = vsel %vm2810_vm10, %v2809_v23, %v2811_v39  ;;  %v5599_v23 = vld [vmem:[%s6898_s10 + $0xb0] sm:$0xff]   ;;  %v5600_v39 = vld [vmem:[%s6898_s10 + $0xb8] sm:$0xff]  }
 0x991   :  { %v2813_v42 = vpack.c.bf16 %v2812_v48, %v2812_v48 }
 0x993   :  { %v6484_v51 = vsel %vm2819_vm11, %v2813_v42, 0 }
 0x994   :  { %5279 = vmatpush3.bf16.msra.mxu1 %v6484_v51  ;;  %5285 = vmatpush3.bf16.msra.mxu0 %v6484_v51 }
 0x995   :  { %5290 = vmatprep.subr.bf16.mxu1 %v5633_v1  ;;  %5302 = vmatprep.subr.bf16.mxu0 %v5633_v1 }
 0x997   :  { %5281 = vmatmul.mubr.msk.bf16.vlgmr.msra.gmra.mrb[48].mxu1 %vm2815_vm12, %v2814_v2  ;;  %5287 = vmatmul.mubr.msk.bf16.vlgmr.msra.gmra.mrb[84].mxu0 %vm2815_vm12, %v4479_v59 }
 0x998   :  { %5291 = vmatpush3.bf16.msra.mxu1 %v5577_v11  ;;  %5303 = vmatpush3.bf16.msra.mxu0 %v5578_v12 }
 0x999   :  { %5292 = vmatprep.subr.bf16.mxu1 %v5633_v1  ;;  %5304 = vmatprep.subr.bf16.mxu0 %v5633_v1 }
 0x99a   :  { %5298 = vmatprep.mubr.msk.bf16.mxu1 %vm5634_vm3, %v5633_v1  ;;  %5310 = vmatprep.mubr.msk.bf16.mxu0 %vm5634_vm3, %v5633_v1 }
 0x99c   :  { %5293 = vmatpush3.bf16.msra.mxu1 %v5579_v5  ;;  %5305 = vmatpush3.bf16.msra.mxu0 %v5580_v60 }
 0x99d   :  { %5294 = vmatprep.subr.bf16.mxu1 %v5633_v1  ;;  %5306 = vmatprep.subr.bf16.mxu0 %v5633_v1 }
 0x9a0   :  { %5295 = vmatpush3.bf16.msra.mxu1 %v5581_v15  ;;  %5307 = vmatpush3.bf16.msra.mxu0 %v5582_v61 }
 0x9a1   :  { %5296 = vmatprep.subr.bf16.mxu1 %v5633_v1  ;;  %5308 = vmatprep.subr.bf16.mxu0 %v5633_v1 }
 0x9a4   :  { %5297 = vmatpush3.bf16.msra.mxu1 %v5583_v35  ;;  %5309 = vmatpush3.bf16.msra.mxu0 %v5584_v62 }
 0x9a5   :  { %5314 = vmatprep.subr.bf16.mxu1 %v5633_v1  ;;  %5320 = vmatprep.subr.bf16.mxu0 %v5633_v1 }
 0xa6a   :  { %v2857_v46 = vpop.f32.mrb[48].mxu1  ;;  %v2911_v63 = vpop.f32.mrb[84].mxu0 }
 0xa6b   :  { %v2863_v38 = vpack.c.bf16 %v2857_v46, %v2857_v46  ;;  %v2917_v0 = vpack.c.bf16 %v2911_v63, %v2911_v63  ;;  %v5288_v49 = vpop.f32.mrb[85].mxu0  ;;  %v5282_v52 = vpop.f32.mrb[49].mxu1 }
 0xa6c   :  { %v2914_v54 = vpop.f32.mrb[86].mxu0  ;;  %v2860_v55 = vpop.f32.mrb[50].mxu1  ;;  %v4559_v49 = vld [vmem:[%s6833_s15 + $0x6] sm:$0x1] }
 0xa6d   :  { %v5289_v56 = vpop.f32.mrb[87].mxu0  ;;  %5299 = vmatmul.mubr.msk.bf16.vlgmr.msra.gmra.mrb[52].mxu1 %vm2771_vm9, %v2917_v0  ;;  %5311 = vmatmul.mubr.msk.bf16.vlgmr.msra.gmra.mrb[88].mxu0 %vm2771_vm9, %v2863_v38  ;;  %v5283_v57 = vpop.f32.mrb[51].mxu1 }
 0xa6e   :  { %5315 = vmatpush3.bf16.msra.mxu1 %v6484_v51  ;;  %5316 = vmatprep.mubr.msk.bf16.mxu1 %vm5634_vm3, %v5633_v1  ;;  %v5602_v57 = vld [vmem:[%s6898_s10 + $0xc8] sm:$0xff]  }
 0xa6f   :  { %5332 = vmatprep.subr.bf16.mxu1 %v5633_v1  ;;  %5321 = vmatpush3.bf16.msra.mxu0 %v5585_v53  ;;  %v5601_v53 = vld [vmem:[%s6898_s10 + $0xc0] sm:$0xff]  }
 0xa70   :  { %5322 = vmatprep.subr.bf16.mxu0 %v5633_v1  ;;  %5328 = vmatprep.mubr.msk.bf16.mxu0 %vm5634_vm3, %v5633_v1 }
 0xa73   :  { %5323 = vmatpush3.bf16.msra.mxu0 %v5586_v16  ;;  %v4574_v16 = vld [vmem:[%s6833_s15 + $0x7] sm:$0x1] }
 0xa74   :  { %5324 = vmatprep.subr.bf16.mxu0 %v5633_v1 }
 0xa75   :  { %5317 = vmatmul.mubr.msk.bf16.vlgmr.msra.gmra.mrb[56].mxu1 %vm2815_vm12, %v4499_v58  ;;  %v5603_v58 = vld [vmem:[%s6898_s10 + $0xd0] sm:$0xff]  }
 0xa76   :  { %5333 = vmatpush3.bf16.msra.mxu1 %v6484_v51  ;;  %5334 = vmatprep.mubr.msk.bf16.mxu1 %vm5634_vm3, %v5633_v1 }
 0xa77   :  { %5338 = vmatprep.subr.bf16.mxu1 %v5633_v1  ;;  %5325 = vmatpush3.bf16.msra.mxu0 %v5587_v7  ;;  %v5605_v7 = vld [vmem:[%s6898_s10 + $0xd8] sm:$0xff]  }
 0xa78   :  { %5326 = vmatprep.subr.bf16.mxu0 %v5633_v1 }
 0xa7b   :  { %5327 = vmatpush3.bf16.msra.mxu0 %v5589_v9  ;;  %v5607_v9 = vld [vmem:[%s6898_s10 + $0xf0] sm:$0xff]  }
 0xa7c   :  { %5350 = vmatprep.subr.bf16.mxu0 %v5633_v1 }
 0xa7d   :  { %5335 = vmatmul.mubr.msk.bf16.vlgmr.msra.gmra.mrb[60].mxu1 %vm2815_vm12, %v4514_v22  ;;  %v5604_v22 = vld [vmem:[%s6898_s10 + $0xe0] sm:$0xff]  }
 0xa7e   :  { %5346 = vmatprep.mubr.msk.bf16.mxu1 %vm5634_vm3, %v5633_v1  ;;  %5339 = vmatpush3.bf16.msra.mxu1 %v5588_v8  ;;  %v5606_v8 = vld [vmem:[%s6898_s10 + $0xe8] sm:$0xff]  }
 0xa7f   :  { %5340 = vmatprep.subr.bf16.mxu1 %v5633_v1 }
 0xa82   :  { %5341 = vmatpush3.bf16.msra.mxu1 %v5590_v10  ;;  %v5608_v10 = vld [vmem:[%s6898_s10 + $0xf8] sm:$0xff]  }
 0xa83   :  { %5342 = vmatprep.subr.bf16.mxu1 %v5633_v1 }
 0xa86   :  { %5343 = vmatpush3.bf16.msra.mxu1 %v5591_v13 }
 0xa87   :  { %5344 = vmatprep.subr.bf16.mxu1 %v5633_v1 }
 0xa8a   :  { %5345 = vmatpush3.bf16.msra.mxu1 %v5592_v14 }
 0xa8b   :  { %5368 = vmatprep.subr.bf16.mxu1 %v5633_v1 }
 0xb40   :  { %v2988_v19 = vpop.f32.mrb[52].mxu1  ;;  %v3055_v20 = vpop.f32.mrb[88].mxu0 }
 0xb41   :  { %v3056_v17 = vadd.f32 %v3055_v20, %v2988_v19  ;;  %v5300_v21 = vpop.f32.mrb[53].mxu1  ;;  %v5312_v24 = vpop.f32.mrb[89].mxu0 }
 0xb42   :  { %v2991_v25 = vpop.f32.mrb[54].mxu1  ;;  %v3058_v50 = vpop.f32.mrb[90].mxu0 }
 0xb43   :  { %v5301_v26 = vpop.f32.mrb[55].mxu1  ;;  %v5313_v27 = vpop.f32.mrb[91].mxu0 }
 0xb48   :  { %v3100_v28 = vpop.f32.mrb[56].mxu1 }
 0xb49   :  { %v3106_v29 = vpack.c.bf16 %v3100_v28, %v3100_v28  ;;  %v5318_v3 = vpop.f32.mrb[57].mxu1 }
 0xb4a   :  { %v3103_v4 = vpop.f32.mrb[58].mxu1 }
 0xb4b   :  { %v5319_v30 = vpop.f32.mrb[59].mxu1  ;;  %5329 = vmatmul.mubr.msk.bf16.vlgmr.msra.gmra.mrb[92].mxu0 %vm2771_vm9, %v3106_v29 }
 0xb4c   :  { %5351 = vmatpush3.bf16.msra.mxu0 %v6484_v51  ;;  %5352 = vmatprep.mubr.msk.bf16.mxu0 %vm5634_vm3, %v5633_v1 }
 0xb4d   :  { %5356 = vmatprep.subr.bf16.mxu0 %v5633_v1 }
 0xb50   :  { %v3223_v31 = vpop.f32.mrb[60].mxu1 }
 0xb51   :  { %v3229_v6 = vpack.c.bf16 %v3223_v31, %v3223_v31  ;;  %v5336_v36 = vpop.f32.mrb[61].mxu1  ;;  %v4589_v31 = vld [vmem:[%s6833_s15 + $0x8] sm:$0x1] }
 0xb52   :  { %v3226_v37 = vpop.f32.mrb[62].mxu1 }
 0xb53   :  { %5347 = vmatmul.mubr.msk.bf16.vlgmr.msra.gmra.mrb[64].mxu1 %vm2771_vm9, %v3229_v6  ;;  %5353 = vmatmul.mubr.msk.bf16.vlgmr.msra.gmra.mrb[96].mxu0 %vm2815_vm12, %v4529_v32  ;;  %v5337_v40 = vpop.f32.mrb[63].mxu1  ;;  %v5609_v32 = vld [vmem:[%s6898_s10 + $0x100] sm:$0xff]   ;;  %v5610_v37 = vld [vmem:[%s6898_s10 + $0x108] sm:$0xff]  }
 0xb54   :  { %5369 = vmatpush3.bf16.msra.mxu1 %v6484_v51  ;;  %5370 = vmatprep.mubr.msk.bf16.mxu1 %vm5634_vm3, %v5633_v1  ;;  %v5611_v40 = vld [vmem:[%s6898_s10 + $0x110] sm:$0xff]  }
 0xb55   :  { %5357 = vmatpush3.bf16.msra.mxu0 %v5593_v33  ;;  %5374 = vmatprep.subr.bf16.mxu1 %v5633_v1 }
 0xb56   :  { %5358 = vmatprep.subr.bf16.mxu0 %v5633_v1  ;;  %5364 = vmatprep.mubr.msk.bf16.mxu0 %vm5634_vm3, %v5633_v1 }
 0xb59   :  { %5359 = vmatpush3.bf16.msra.mxu0 %v5594_v41  ;;  %v5612_v41 = vld [vmem:[%s6898_s10 + $0x118] sm:$0xff]  }
 0xb5a   :  { %5360 = vmatprep.subr.bf16.mxu0 %v5633_v1 }
 0xb5b   :  { %5371 = vmatmul.mubr.msk.bf16.vlgmr.msra.gmra.mrb[68].mxu1 %vm2815_vm12, %v4544_v43 }
 0xb5c   :  { %5382 = vmatprep.mubr.msk.bf16.mxu1 %vm5634_vm3, %v5633_v1  ;;  %5375 = vmatpush3.bf16.msra.mxu1 %v5596_v45 }
 0xb5d   :  { %5361 = vmatpush3.bf16.msra.mxu0 %v5595_v44  ;;  %5376 = vmatprep.subr.bf16.mxu1 %v5633_v1 }
 0xb5e   :  { %5362 = vmatprep.subr.bf16.mxu0 %v5633_v1 }
 0xb60   :  { %5377 = vmatpush3.bf16.msra.mxu1 %v5598_v18 }
 0xb61   :  { %5363 = vmatpush3.bf16.msra.mxu0 %v5597_v47  ;;  %5378 = vmatprep.subr.bf16.mxu1 %v5633_v1 }
 0xb62   :  { %5386 = vmatprep.subr.bf16.mxu0 %v5633_v1 }
 0xb64   :  { %5379 = vmatpush3.bf16.msra.mxu1 %v5599_v23 }
 0xb65   :  { %5380 = vmatprep.subr.bf16.mxu1 %v5633_v1 }
 0xb68   :  { %5381 = vmatpush3.bf16.msra.mxu1 %v5600_v39 }
 0xb69   :  { %5404 = vmatprep.subr.bf16.mxu1 %v5633_v1 }
 0xc1e   :  { %v3177_v48 = vpop.f32.mrb[92].mxu0 }
 0xc1f   :  { %v3183_v42 = vadd.f32 %v3177_v48, %v3056_v17  ;;  %v5330_v2 = vpop.f32.mrb[93].mxu0 }
 0xc20   :  { %v3180_v59 = vpop.f32.mrb[94].mxu0 }
 0xc21   :  { %v5331_v11 = vpop.f32.mrb[95].mxu0 }
 0xc26   :  { %v3300_v12 = vpop.f32.mrb[64].mxu1  ;;  %v3346_v5 = vpop.f32.mrb[96].mxu0 }
 0xc27   :  { %v3306_v60 = vadd.f32 %v3300_v12, %v3183_v42  ;;  %v3352_v15 = vpack.c.bf16 %v3346_v5, %v3346_v5  ;;  %v5354_v61 = vpop.f32.mrb[97].mxu0  ;;  %v5348_v35 = vpop.f32.mrb[65].mxu1 }
 0xc28   :  { %v3349_v62 = vpop.f32.mrb[98].mxu0  ;;  %v3303_v46 = vpop.f32.mrb[66].mxu1  ;;  %v4604_v61 = vld [vmem:[%s6835_s17] ss:$0 sm:$0xff] }
 0xc29   :  { %v5355_v63 = vpop.f32.mrb[99].mxu0  ;;  %5365 = vmatmul.mubr.msk.bf16.vlgmr.msra.gmra.mrb[100].mxu0 %vm2771_vm9, %v3352_v15  ;;  %v5349_v38 = vpop.f32.mrb[67].mxu1 }
 0xc2a   :  { %5387 = vmatpush3.bf16.msra.mxu0 %v6484_v51  ;;  %5388 = vmatprep.mubr.msk.bf16.mxu0 %vm5634_vm3, %v5633_v1 }
 0xc2b   :  { %5392 = vmatprep.subr.bf16.mxu0 %v5633_v1 }
 0xc2e   :  { %v3469_v0 = vpop.f32.mrb[68].mxu1 }
 0xc2f   :  { %v3475_v52 = vpack.c.bf16 %v3469_v0, %v3469_v0  ;;  %v5372_v54 = vpop.f32.mrb[69].mxu1 }
 0xc30   :  { %v3472_v55 = vpop.f32.mrb[70].mxu1 }
 0xc31   :  { %5383 = vmatmul.mubr.msk.bf16.vlgmr.msra.gmra.mrb[72].mxu1 %vm2771_vm9, %v3475_v52  ;;  %5389 = vmatmul.mubr.msk.bf16.vlgmr.msra.gmra.mrb[104].mxu0 %vm2815_vm12, %v4559_v49  ;;  %v5373_v56 = vpop.f32.mrb[71].mxu1 }
 0xc32   :  { %5405 = vmatpush3.bf16.msra.mxu1 %v6484_v51  ;;  %5406 = vmatprep.mubr.msk.bf16.mxu1 %vm5634_vm3, %v5633_v1 }
 0xc33   :  { %5393 = vmatpush3.bf16.msra.mxu0 %v5601_v53  ;;  %5410 = vmatprep.subr.bf16.mxu1 %v5633_v1 }
 0xc34   :  { %5394 = vmatprep.subr.bf16.mxu0 %v5633_v1  ;;  %5400 = vmatprep.mubr.msk.bf16.mxu0 %vm5634_vm3, %v5633_v1 }
 0xc37   :  { %5395 = vmatpush3.bf16.msra.mxu0 %v5602_v57 }
 0xc38   :  { %5396 = vmatprep.subr.bf16.mxu0 %v5633_v1 }
 0xc39   :  { %5407 = vmatmul.mubr.msk.bf16.vlgmr.msra.gmra.mrb[76].mxu1 %vm2815_vm12, %v4574_v16 }
 0xc3a   :  { %5418 = vmatprep.mubr.msk.bf16.mxu1 %vm5634_vm3, %v5633_v1  ;;  %5411 = vmatpush3.bf16.msra.mxu1 %v5604_v22 }
 0xc3b   :  { %5397 = vmatpush3.bf16.msra.mxu0 %v5603_v58  ;;  %5412 = vmatprep.subr.bf16.mxu1 %v5633_v1 }
 0xc3c   :  { %5398 = vmatprep.subr.bf16.mxu0 %v5633_v1 }
 0xc3e   :  { %5413 = vmatpush3.bf16.msra.mxu1 %v5606_v8 }
 0xc3f   :  { %5399 = vmatpush3.bf16.msra.mxu0 %v5605_v7  ;;  %5414 = vmatprep.subr.bf16.mxu1 %v5633_v1 }
 0xc40   :  { %5422 = vmatprep.subr.bf16.mxu0 %v5633_v1 }
 0xc42   :  { %5415 = vmatpush3.bf16.msra.mxu1 %v5607_v9 }
 0xc43   :  { %5416 = vmatprep.subr.bf16.mxu1 %v5633_v1 }
 0xc46   :  { %5417 = vmatpush3.bf16.msra.mxu1 %v5608_v10 }
 0xc47   :  { %5440 = vmatprep.subr.bf16.mxu1 %v5633_v1 }
 0xcfc   :  { %v3423_v13 = vpop.f32.mrb[100].mxu0 }
 0xcfd   :  { %v3429_v14 = vadd.f32 %v3423_v13, %v3306_v60  ;;  %v5366_v19 = vpop.f32.mrb[101].mxu0 }
 0xcfe   :  { %v3426_v20 = vpop.f32.mrb[102].mxu0 }
 0xcff   :  { %v5367_v17 = vpop.f32.mrb[103].mxu0 }
 0xd04   :  { %v3546_v21 = vpop.f32.mrb[72].mxu1  ;;  %v3592_v24 = vpop.f32.mrb[104].mxu0 }
 0xd05   :  { %v3552_v25 = vadd.f32 %v3546_v21, %v3429_v14  ;;  %v3598_v50 = vpack.c.bf16 %v3592_v24, %v3592_v24  ;;  %v5390_v26 = vpop.f32.mrb[105].mxu0  ;;  %v5384_v27 = vpop.f32.mrb[73].mxu1  ;;  %v3930_v21 = vld [vmem:[%s6836_s18] sm:$0x1] }
 0xd06   :  { %v3595_v28 = vpop.f32.mrb[106].mxu0  ;;  %v3549_v29 = vpop.f32.mrb[74].mxu1 }
 0xd07   :  { %v5391_v3 = vpop.f32.mrb[107].mxu0  ;;  %5401 = vmatmul.mubr.msk.bf16.vlgmr.msra.gmra.mrb[108].mxu0 %vm2771_vm9, %v3598_v50  ;;  %v5385_v4 = vpop.f32.mrb[75].mxu1  ;;  %v3931_v50 = vld [vmem:[%s6837_s19] sm:$0x1] }
 0xd08   :  { %5423 = vmatpush3.bf16.msra.mxu0 %v6484_v51  ;;  %5424 = vmatprep.mubr.msk.bf16.mxu0 %vm5634_vm3, %v5633_v1 }
 0xd09   :  { %5428 = vmatprep.subr.bf16.mxu0 %v5633_v1 }
 0xd0c   :  { %v3715_v30 = vpop.f32.mrb[76].mxu1 }
 0xd0d   :  { %v3721_v6 = vpack.c.bf16 %v3715_v30, %v3715_v30  ;;  %v5408_v33 = vpop.f32.mrb[77].mxu1 }
 0xd0e   :  { %v3718_v36 = vpop.f32.mrb[78].mxu1  ;;  %v3974_v33 = vld [vmem:[%s6838_s20] sm:$0x1] }
 0xd0f   :  { %5419 = vmatmul.mubr.msk.bf16.vlgmr.msra.gmra.mrb[80].mxu1 %vm2771_vm9, %v3721_v6  ;;  %5425 = vmatmul.mubr.msk.bf16.vlgmr.msra.gmra.mrb[112].mxu0 %vm2815_vm12, %v4589_v31  ;;  %v5409_v51 = vpop.f32.mrb[79].mxu1  ;;  %v5613_v36 = vld [vmem:[%s6834_s21] sm:$0xff]  }
 0xd10   :  { %5429 = vmatpush3.bf16.msra.mxu0 %v5609_v32  ;;  %5436 = vmatprep.mubr.msk.bf16.mxu0 %vm5634_vm3, %v5633_v1  ;;  %v5614_v51 = vld [vmem:[%s6834_s21 + $0x8] sm:$0xff]  }
 0xd11   :  { %5430 = vmatprep.subr.bf16.mxu0 %v5633_v1  ;;  %5442 = vmatprep.mubr.msk.bf16.mxu1 %vm5634_vm3, %v5633_v1 }
 0xd14   :  { %5431 = vmatpush3.bf16.msra.mxu0 %v5610_v37  ;;  %v5615_v37 = vld [vmem:[%s6834_s21 + $0x10] sm:$0xff]  }
 0xd15   :  { %5432 = vmatprep.subr.bf16.mxu0 %v5633_v1 }
 0xd18   :  { %5433 = vmatpush3.bf16.msra.mxu0 %v5611_v40  ;;  %v5616_v40 = vld [vmem:[%s6834_s21 + $0x18] sm:$0xff]  }
 0xd19   :  { %5434 = vmatprep.subr.bf16.mxu0 %v5633_v1 }
 0xd1c   :  { %5435 = vmatpush3.bf16.msra.mxu0 %v5612_v41  ;;  %v5617_v41 = vld [vmem:[%s6834_s21 + $0x20] sm:$0xff]  }
 0xdda   :  { %v3669_v43 = vpop.f32.mrb[108].mxu0 }
 0xddb   :  { %v3675_v44 = vadd.f32 %v3669_v43, %v3552_v25  ;;  %v5402_v45 = vpop.f32.mrb[109].mxu0  ;;  %v5618_v43 = vld [vmem:[%s6834_s21 + $0x28] sm:$0xff]  }
 0xddc   :  { %v3672_v47 = vpop.f32.mrb[110].mxu0  ;;  %v5620_v45 = vld [vmem:[%s6834_s21 + $0x38] sm:$0xff]  }
 0xddd   :  { %v5403_v18 = vpop.f32.mrb[111].mxu0 }
 0xde2   :  { %v3792_v23 = vpop.f32.mrb[80].mxu1  ;;  %v3838_v39 = vpop.f32.mrb[112].mxu0 }
 0xde3   :  { %v3798_v48 = vadd.f32 %v3792_v23, %v3675_v44  ;;  %v3844_v42 = vpack.c.bf16 %v3838_v39, %v3838_v39  ;;  %v5426_v2 = vpop.f32.mrb[113].mxu0  ;;  %v5420_v59 = vpop.f32.mrb[81].mxu1  ;;  %v5619_v44 = vld [vmem:[%s6834_s21 + $0x30] sm:$0xff]  }
 0xde4   :  { %v3841_v11 = vpop.f32.mrb[114].mxu0  ;;  %v3795_v12 = vpop.f32.mrb[82].mxu1  ;;  %v4180_v2 = vld [vmem:[%s6839_s25 + $0x8] sm:$0xff]  ;;  %v5635_v59 = vmov 0.0|0.0  }
 0xde5   :  { %v5427_v5 = vpop.f32.mrb[115].mxu0  ;;  %5437 = vmatmul.mubr.msk.bf16.vlgmr.msra.gmra.mrb[116].mxu0 %vm2771_vm9, %v3844_v42  ;;  %v5421_v60 = vpop.f32.mrb[83].mxu1  ;;  %v4179_v42 = vld [vmem:[%s6839_s25] sm:$0xff]  ;;  %5477 = vmatprep.subr.bf16.mxu0 %v5635_v59  ;;  %v4181_v11 = vld [vmem:[%s6839_s25 + $0x10] sm:$0xff]  ;;  %v4182_v12 = vld [vmem:[%s6839_s25 + $0x18] sm:$0xff] }
 0xde6   :  { %5474 = vmatprep.mubr.msk.f32.mxu0 %vm5634_vm3, %v5633_v1  ;;  %v5481_v5 = vpack.c.bf16 %v4182_v12, %v4181_v11  ;;  %v4606_v60 = vld [vmem:[%s6840_s22] ss:$0 sm:$0xff] }
 0xeb8   :  { %v3915_v15 = vpop.f32.mrb[116].mxu0 }
 0xeb9   :  { %v3921_v35 = vadd.f32 %v3915_v15, %v3798_v48  ;;  %v5438_v62 = vpop.f32.mrb[117].mxu0 }
 0xeba   :  { %v3918_v46 = vpop.f32.mrb[118].mxu0 }
 0xebb   :  { %v3929_v63 = vadd.f32 %v4604_v61, %v3921_v35  ;;  %v5439_v38 = vpop.f32.mrb[119].mxu0 }
 0xebd   :  { %v3932_v0 = vsel %vm6899_vm13, %v3929_v63, 0.0  ;;  %v3940_v49 = vmul.f32 %v3929_v63, %v3929_v63 }
 0xebe   :  { %v3933_v52 = vrot.slane %v3932_v0, 4 }
 0xebf   :  { %v3941_v53 = vsel %vm6900_vm14, %v3940_v49, 0.0 }
 0xec0   :  { %v3934_v54 = vadd.f32 %v3933_v52, %v3932_v0  ;;  %v3942_v55 = vrot.slane %v3941_v53, 4 }
 0xec2   :  { %v3935_v56 = vrot.slane %v3934_v54, 2  ;;  %v3943_v57 = vadd.f32 %v3942_v55, %v3941_v53 }
 0xec4   :  { %v3936_v16 = vadd.f32 %v3935_v56, %v3934_v54  ;;  %v3944_v58 = vrot.slane %v3943_v57, 2 }
 0xec6   :  { %v3937_v22 = vrot.slane %v3936_v16, 1  ;;  %v3945_v7 = vadd.f32 %v3944_v58, %v3943_v57 }
 0xec8   :  { %v3938_v8 = vadd.f32 %v3937_v22, %v3936_v16  ;;  %v3946_v9 = vrot.slane %v3945_v7, 1 }
 0xeca   :  { %v3939_v10 = vmul.f32 0.5, %v3938_v8  ;;  %v3947_v13 = vadd.f32 %v3946_v9, %v3945_v7 }
 0xecc   :  { %v3948_v14 = vmul.f32 0.5, %v3947_v13  ;;  %v3949_v19 = vmul.f32 %v3939_v10, %v3939_v10 }
 0xece   :  { %v3950_v20 = vsub.f32 %v3948_v14, %v3949_v19 }
 0xed0   :  { %v3951_v17 = vadd.f32 1e-05, %v3950_v20  ;;  %v4135_v20 = vld [vmem:[%s6841_s23] sm:$0x1] }
 0xed2   :  { %5627 = vrsqrt.f32 %v3951_v17 }
 0xedc   :  { %v5628_v24 = vpop.eup %5627 }
 0xedd   :  { %v3953_v25 = vmul.f32 %v5628_v24, %v3930_v21  ;;  %v4136_v24 = vld [vmem:[%s6842_s24] sm:$0x1]  ;;  %s5636_s24 = smov 120  }
 0xedf   :  { %v3954_v26 = vmul.f32 %v3953_v25, %v3939_v10  ;;  %v3960_v27 = vrot.slane %v3953_v25, %v5968_v34 }
 0xee1   :  { %v3955_v28 = vsub.f32 %v3931_v50, %v3954_v26  ;;  %v3962_v29 = vmul.f32 %v3960_v27, %v3929_v63 }
 0xee3   :  { %v3967_v3 = vrot.slane %v3955_v28, %v5968_v34 }
 0xee5   :  { %v3969_v4 = vadd.f32 %v3967_v3, %v3962_v29 }
 0xee7   :  { %vm3970_vm15 = vcmp.ge.f32.partialorder %v3969_v4, 0.0  ;;  %v3971_v30 = vmul.f32 0.03, %v3969_v4 }
 0xee9   :  { %v3972_v31 = vsel %vm3970_vm15, %v3969_v4, %v3971_v30  ;;  %v4615_v30 = vld [vmem:[%s6843_s26] ss:$0 sm:$0xff] }
 0xeea   :  { %v3973_v32 = vpack.c.bf16 %v3972_v31, %v3972_v31 }
 0xeec   :  { %v3981_v6 = vsel %vm3979_vm0, %v3973_v32, 0 }
 0xeed   :  { %5441 = vmatpush3.bf16.msra.mxu1 %v3981_v6 }
 0xeee   :  { %5446 = vmatprep.subr.bf16.mxu1 %v5633_v1 }
 0xef0   :  { %5443 = vmatmul.mubr.msk.bf16.vlgmr.msra.gmra.mrb[84].mxu1 %vm3975_vm1, %v3974_v33 }
 0xef1   :  { %5447 = vmatpush3.bf16.msra.mxu1 %v5613_v36  ;;  %5462 = vmatprep.mubr.msk.bf16.mxu1 %vm5634_vm3, %v5633_v1 }
 0xef2   :  { %5448 = vmatprep.subr.bf16.mxu1 %v5633_v1 }
 0xef5   :  { %5449 = vmatpush3.bf16.msra.mxu1 %v5614_v51 }
 0xef6   :  { %5450 = vmatprep.subr.bf16.mxu1 %v5633_v1 }
 0xef9   :  { %5451 = vmatpush3.bf16.msra.mxu1 %v5615_v37 }
 0xefa   :  { %5452 = vmatprep.subr.bf16.mxu1 %v5633_v1 }
 0xefd   :  { %5453 = vmatpush3.bf16.msra.mxu1 %v5616_v40 }
 0xefe   :  { %5454 = vmatprep.subr.bf16.mxu1 %v5633_v1 }
 0xf01   :  { %5455 = vmatpush3.bf16.msra.mxu1 %v5617_v41 }
 0xf02   :  { %5456 = vmatprep.subr.bf16.mxu1 %v5633_v1 }
 0xf05   :  { %5457 = vmatpush3.bf16.msra.mxu1 %v5618_v43 }
 0xf06   :  { %5458 = vmatprep.subr.bf16.mxu1 %v5633_v1 }
 0xf09   :  { %5459 = vmatpush3.bf16.msra.mxu1 %v5619_v44 }
 0xf0a   :  { %5460 = vmatprep.subr.bf16.mxu1 %v5633_v1  ;;  %v5478_v1 = vpack.c.bf16 %v4180_v2, %v4179_v42 }
 0xf0c   :  { %5479 = vmatpush3.bf16.msra.mxu0 %v5478_v1 }
 0xf0d   :  { %5461 = vmatpush3.bf16.msra.mxu1 %v5620_v45  ;;  %5480 = vmatprep.subr.bf16.mxu0 %v5635_v59 }
 0xf10   :  { %5482 = vmatpush3.bf16.msra.mxu0 %v5481_v5 }
 0xfc3   :  { %v4017_v47 = vpop.f32.mrb[84].mxu1 }
 0xfc4   :  { %v4023_v18 = vpack.c.bf16 %v4017_v47, %v4017_v47  ;;  %v5444_v23 = vpop.f32.mrb[85].mxu1 }
 0xfc5   :  { %v4020_v39 = vpop.f32.mrb[86].mxu1 }
 0xfc6   :  { %5463 = vmatmul.mubr.bf16.vlgmr.msra.gmra.mrb[88].mxu1 %v4023_v18  ;;  %v5445_v48 = vpop.f32.mrb[87].mxu1 }
0x1099   :  { %v4129_v15 = vpop.f32.mrb[88].mxu1 }
0x109a   :  { %v4130_v61 = vadd.f32 %v4606_v60, %v4129_v15  ;;  %v5464_v35 = vpop.f32.mrb[89].mxu1 }
0x109b   :  { %v4132_v62 = vpop.f32.mrb[90].mxu1 }
0x109c   :  { %v4138_v46 = vsel %vm4137_vm2, %v4130_v61, 0.0  ;;  %v4146_v63 = vmul.f32 %v4130_v61, %v4130_v61  ;;  %v5465_v38 = vpop.f32.mrb[91].mxu1 }
0x109d   :  { %v4139_v0 = vrot.slane %v4138_v46, 4 }
0x109e   :  { %v4147_v49 = vsel %vm4137_vm2, %v4146_v63, 0.0 }
0x109f   :  { %v4140_v52 = vadd.f32 %v4139_v0, %v4138_v46  ;;  %v4148_v53 = vrot.slane %v4147_v49, 4 }
0x10a1   :  { %v4141_v54 = vrot.slane %v4140_v52, 2  ;;  %v4149_v55 = vadd.f32 %v4148_v53, %v4147_v49 }
0x10a3   :  { %v4142_v56 = vadd.f32 %v4141_v54, %v4140_v52  ;;  %v4150_v57 = vrot.slane %v4149_v55, 2 }
0x10a5   :  { %v4143_v16 = vrot.slane %v4142_v56, 1  ;;  %v4151_v58 = vadd.f32 %v4150_v57, %v4149_v55 }
0x10a7   :  { %v4144_v22 = vadd.f32 %v4143_v16, %v4142_v56  ;;  %v4152_v7 = vrot.slane %v4151_v58, 1 }
0x10a9   :  { %v4145_v8 = vmul.f32 0.5, %v4144_v22  ;;  %v4153_v9 = vadd.f32 %v4152_v7, %v4151_v58 }
0x10ab   :  { %v4154_v10 = vmul.f32 0.5, %v4153_v9  ;;  %v4155_v13 = vmul.f32 %v4145_v8, %v4145_v8 }
0x10ad   :  { %v4156_v14 = vsub.f32 %v4154_v10, %v4155_v13 }
0x10af   :  { %v4157_v19 = vadd.f32 1e-05, %v4156_v14 }
0x10b1   :  { %5629 = vrsqrt.f32 %v4157_v19 }
0x10bb   :  { %v5630_v17 = vpop.eup %5629 }
0x10bc   :  { %v4159_v21 = vmul.f32 %v5630_v17, %v4135_v20 }
0x10be   :  { %v4160_v25 = vmul.f32 %v4159_v21, %v4145_v8  ;;  %v4166_v50 = vrot.slane %v4159_v21, %v5968_v34 }
0x10c0   :  { %v4161_v26 = vsub.f32 %v4136_v24, %v4160_v25  ;;  %v4168_v27 = vmul.f32 %v4166_v50, %v4130_v61 }
0x10c2   :  { %v4173_v28 = vrot.slane %v4161_v26, %v5968_v34  ;;  %v4263_v34 = vld [vmem:[%s6844_s27] sm:$0x3] }
0x10c4   :  { %v4175_v29 = vadd.f32 %v4173_v28, %v4168_v27 }
0x10c6   :  { %vm4176_vm3 = vcmp.ge.f32.partialorder %v4175_v29, 0.0  ;;  %v4177_v3 = vmul.f32 0.03, %v4175_v29 }
0x10c8   :  { %v4178_v4 = vsel %vm4176_vm3, %v4175_v29, %v4177_v3 }
0x10c9   :  { %5475 = vmatmul.mubr.msk.f32.vlgmr.msra.gmra.mrb[120].mxu0 %vm1728_vm4, %v4178_v4  ;;  %vm4273_vm4 = vcmask 58368  }
0x119c   :  { %v4259_v31 = vpop.f32.mrb[120].mxu0 }
0x119d   :  { %v4260_v32 = vadd.f32 %v4615_v30, %v4259_v31  ;;  %v5476_v6 = vpop.f32.mrb[121].mxu0 }
0x119f   :  { %v4264_v33 = vmul.f32 0.5, %v4260_v32 }
0x11a1   :  { %v4265_v36 = vmul.f32 1.442695, %v4264_v33 }
0x11a3   :  { %5631 = vpow2.f32 %v4265_v36 }
0x11ad   :  { %v5632_v51 = vpop.eup %5631 }
0x11ae   :  { %4268 = vrot.lane.b32.xlu0 %v5632_v51, %s5636_s24 }
0x11b2   :  { %4276 = vrot.lane.b32.xlu0 %v4260_v32, %s5637_s1 }
0x1220   :  { %v4269_v37 = vpop.permute.xlu0 %4268 }
0x1221   :  { %v4271_v40 = vmul.f32 %v4269_v37, %v4263_v34 }
0x1223   :  { %v4272_v41 = vadd.f32 %v4271_v40, %v4260_v32 }
0x1224   :  { %v4277_v43 = vpop.permute.xlu0 %4276 }
0x1225   :  { %4274 = vst.msk [vmem:[%s6845_s28] sm:$0x3] %vm4273_vm4, %v4272_v41 }
0x1226   :  { %4280 = vst.msk [vmem:[%s6845_s28] sm:$0x3] %vm4279_vm5, %v4277_v43 }
0x1227   :  { %4282 = vst.msk [vmem:[%s6845_s28] sm:$0x3] %vm4281_vm6, %v4277_v43 }

</bundles_post_ra>
